<compile_context>
chip_gen: v6e
topology: v6e:2x2x1
jax: 0.10.0
libtpu: 0.0.40
codegen_flags: <defaults>
</compile_context>

<pallas_src>
import math

import jax
import jax.numpy as jnp
from jax import lax
from jax.experimental import pallas as pl
from jax.experimental.pallas import tpu as pltpu

# ---------------- problem configuration (small, valid grouped conv) -------------
N = 2          # batch
C_IN = 8       # input channels
GROUPS = 8     # depthwise-style grouping (== C_IN, like the original)
C_OUT = 16     # out channels (multiple of groups)
K = 3          # kernel size
STRIDE = 1
PAD = 1
DIL = 2        # (original used 16; scaled down with the spatial size)
H = W = 18

CIN_G = C_IN // GROUPS      # 1
COUT_G = C_OUT // GROUPS    # 2
H_PAD = H + 2 * PAD         # 20
W_PAD = W + 2 * PAD         # 20
H_OUT = (H + 2 * PAD - DIL * (K - 1) - 1) // STRIDE + 1   # 16
W_OUT = (W + 2 * PAD - DIL * (K - 1) - 1) // STRIDE + 1   # 16
T = K * K                   # 9 taps

_INV_SQRT2 = 1.0 / math.sqrt(2.0)


def _conv_gelu_kernel(x_ref, w_ref, b_ref, o_ref):
    """One batch element per grid step.

    x_ref : (1, C_IN, H_PAD, W_PAD) f32 VMEM -- padded input image
    w_ref : (C_OUT * K * K,)        f32 SMEM -- flat OIHW grouped weights (CIN_G == 1)
    b_ref : (C_OUT,)                f32 SMEM
    o_ref : (1, C_OUT, H_OUT, W_OUT) f32 VMEM
    """
    for g in range(GROUPS):
        img = x_ref[0, g]                                 # (H_PAD, W_PAD) load once
        # 9 dilated tap windows of this group's (single) input channel (static slices)
        wins = [
            img[kh * DIL: kh * DIL + H_OUT, kw * DIL: kw * DIL + W_OUT]
            for kh in range(K) for kw in range(K)
        ]
        for j in range(COUT_G):
            c = g * COUT_G + j
            # bias-initialized accumulator; 9 scalar-broadcast MACs on the VPU
            acc = b_ref[c] + w_ref[c * T] * wins[0]
            for t in range(1, T):
                acc = acc + w_ref[c * T + t] * wins[t]
            v1 = acc
            v2 = 0.5 * v1 * (1.0 + lax.erf(v1 * _INV_SQRT2))   # exact GELU (torch .gelu())
            o_ref[0, c] = (v1 * v2).astype(o_ref.dtype)


@jax.jit
def conv_gelu_mul(x, w_grouped, b):
    """x: (N, C_IN, H, W); w_grouped: (C_OUT, CIN_G, K, K) with CIN_G == 1; b: (C_OUT,)."""
    x_pad = jnp.pad(x.astype(jnp.float32),
                    ((0, 0), (0, 0), (PAD, PAD), (PAD, PAD)))     # (N, C_IN, 20, 20)
    w_flat = w_grouped.astype(jnp.float32).reshape(C_OUT * T)      # (144,)  kh-major, kw-minor
    b_flat = b.astype(jnp.float32)                                 # (16,)

    return pl.pallas_call(
        _conv_gelu_kernel,
        out_shape=jax.ShapeDtypeStruct((N, C_OUT, H_OUT, W_OUT), jnp.float32),
        grid=(N,),
        in_specs=[
            pl.BlockSpec((1, C_IN, H_PAD, W_PAD), lambda n: (n, 0, 0, 0)),
            pl.BlockSpec(memory_space=pltpu.MemorySpace.SMEM),
            pl.BlockSpec(memory_space=pltpu.MemorySpace.SMEM),
        ],
        out_specs=pl.BlockSpec((1, C_OUT, H_OUT, W_OUT), lambda n: (n, 0, 0, 0)),
        compiler_params=pltpu.CompilerParams(
            dimension_semantics=("parallel",)),
    )(x_pad, w_flat, b_flat)


def _reference(x, w_grouped, b):
    v1 = lax.conv_general_dilated(
        x, w_grouped,
        window_strides=(STRIDE, STRIDE),
        padding=((PAD, PAD), (PAD, PAD)),
        rhs_dilation=(DIL, DIL),
        dimension_numbers=("NCHW", "OIHW", "NCHW"),
        feature_group_count=GROUPS,
        precision=lax.Precision.HIGHEST,
    ) + b.reshape(1, C_OUT, 1, 1)
    v2 = jax.nn.gelu(v1, approximate=False)
    return v1 * v2


if __name__ == "__main__":
    key = jax.random.PRNGKey(0)
    kx, kw, kb = jax.random.split(key, 3)

    x = jax.random.normal(kx, (N, C_IN, H, W), dtype=jnp.float32)
    # deterministic PyTorch-ish init (kaiming-uniform style bound)
    fan_in = CIN_G * K * K
    bound = 1.0 / math.sqrt(fan_in)
    w_grouped = jax.random.uniform(
        kw, (C_OUT, CIN_G, K, K), minval=-bound, maxval=bound, dtype=jnp.float32
    )
    b = jax.random.uniform(kb, (C_OUT,), minval=-bound, maxval=bound,
                           dtype=jnp.float32)

    out = jax.block_until_ready(conv_gelu_mul(x, w_grouped, b))

    ref = _reference(x, w_grouped, b)
    assert out.shape == (N, C_OUT, H_OUT, W_OUT)
    err = float(jnp.max(jnp.abs(out - ref)))
    assert jnp.allclose(out, ref, rtol=1e-4, atol=1e-5), err
    print("KERNEL_OK")
</pallas_src>

<mosaic_0001>
module attributes {stable_mosaic.version = 11 : i64} {
  func.func @_conv_gelu_kernel(%arg0: i32, %arg1: memref<1x8x20x20xf32, #tpu.memory_space<vmem>>, %arg2: memref<144xf32, #tpu.memory_space<smem>>, %arg3: memref<16xf32, #tpu.memory_space<smem>>, %arg4: memref<1x16x16x16xf32, #tpu.memory_space<vmem>>) attributes {dimension_semantics = [#tpu.dimension_semantics<parallel>], iteration_bounds = array<i64: 2>, scalar_prefetch = 0 : i64, scratch_operands = 0 : i64, tpu.core_type = #tpu.core_type<tc>, window_params = [{transform_indices = @transform_0, window_bounds = array<i64: 1, 8, 20, 20>}, {transform_indices = @transform_1, window_bounds = array<i64: 144>}, {transform_indices = @transform_2, window_bounds = array<i64: 16>}, {transform_indices = @transform_3, window_bounds = array<i64: 1, 16, 16, 16>}]} {
    %c0 = arith.constant 0 : index
    %c0_0 = arith.constant 0 : index
    %c0_1 = arith.constant 0 : index
    %c0_2 = arith.constant 0 : index
    %0 = vector.load %arg1[%c0, %c0_0, %c0_1, %c0_2] : memref<1x8x20x20xf32, #tpu.memory_space<vmem>>, vector<1x1x20x20xf32>
    %1 = vector.shape_cast %0 : vector<1x1x20x20xf32> to vector<20x20xf32>
    %2 = vector.extract_strided_slice %1 {offsets = [0, 0], sizes = [16, 16], strides = [1, 1]} : vector<20x20xf32> to vector<16x16xf32>
    %3 = vector.extract_strided_slice %1 {offsets = [0, 2], sizes = [16, 16], strides = [1, 1]} : vector<20x20xf32> to vector<16x16xf32>
    %4 = vector.extract_strided_slice %1 {offsets = [0, 4], sizes = [16, 16], strides = [1, 1]} : vector<20x20xf32> to vector<16x16xf32>
    %5 = vector.extract_strided_slice %1 {offsets = [2, 0], sizes = [16, 16], strides = [1, 1]} : vector<20x20xf32> to vector<16x16xf32>
    %6 = vector.extract_strided_slice %1 {offsets = [2, 2], sizes = [16, 16], strides = [1, 1]} : vector<20x20xf32> to vector<16x16xf32>
    %7 = vector.extract_strided_slice %1 {offsets = [2, 4], sizes = [16, 16], strides = [1, 1]} : vector<20x20xf32> to vector<16x16xf32>
    %8 = vector.extract_strided_slice %1 {offsets = [4, 0], sizes = [16, 16], strides = [1, 1]} : vector<20x20xf32> to vector<16x16xf32>
    %9 = vector.extract_strided_slice %1 {offsets = [4, 2], sizes = [16, 16], strides = [1, 1]} : vector<20x20xf32> to vector<16x16xf32>
    %10 = vector.extract_strided_slice %1 {offsets = [4, 4], sizes = [16, 16], strides = [1, 1]} : vector<20x20xf32> to vector<16x16xf32>
    %c0_3 = arith.constant 0 : index
    %11 = memref.load %arg3[%c0_3] : memref<16xf32, #tpu.memory_space<smem>>
    %c0_4 = arith.constant 0 : index
    %12 = memref.load %arg2[%c0_4] : memref<144xf32, #tpu.memory_space<smem>>
    %13 = vector.broadcast %12 : f32 to vector<16x16xf32>
    %14 = arith.mulf %13, %2 : vector<16x16xf32>
    %15 = vector.broadcast %11 : f32 to vector<16x16xf32>
    %16 = arith.addf %15, %14 : vector<16x16xf32>
    %c1 = arith.constant 1 : index
    %17 = memref.load %arg2[%c1] : memref<144xf32, #tpu.memory_space<smem>>
    %18 = vector.broadcast %17 : f32 to vector<16x16xf32>
    %19 = arith.mulf %18, %3 : vector<16x16xf32>
    %20 = arith.addf %16, %19 : vector<16x16xf32>
    %c2 = arith.constant 2 : index
    %21 = memref.load %arg2[%c2] : memref<144xf32, #tpu.memory_space<smem>>
    %22 = vector.broadcast %21 : f32 to vector<16x16xf32>
    %23 = arith.mulf %22, %4 : vector<16x16xf32>
    %24 = arith.addf %20, %23 : vector<16x16xf32>
    %c3 = arith.constant 3 : index
    %25 = memref.load %arg2[%c3] : memref<144xf32, #tpu.memory_space<smem>>
    %26 = vector.broadcast %25 : f32 to vector<16x16xf32>
    %27 = arith.mulf %26, %5 : vector<16x16xf32>
    %28 = arith.addf %24, %27 : vector<16x16xf32>
    %c4 = arith.constant 4 : index
    %29 = memref.load %arg2[%c4] : memref<144xf32, #tpu.memory_space<smem>>
    %30 = vector.broadcast %29 : f32 to vector<16x16xf32>
    %31 = arith.mulf %30, %6 : vector<16x16xf32>
    %32 = arith.addf %28, %31 : vector<16x16xf32>
    %c5 = arith.constant 5 : index
    %33 = memref.load %arg2[%c5] : memref<144xf32, #tpu.memory_space<smem>>
    %34 = vector.broadcast %33 : f32 to vector<16x16xf32>
    %35 = arith.mulf %34, %7 : vector<16x16xf32>
    %36 = arith.addf %32, %35 : vector<16x16xf32>
    %c6 = arith.constant 6 : index
    %37 = memref.load %arg2[%c6] : memref<144xf32, #tpu.memory_space<smem>>
    %38 = vector.broadcast %37 : f32 to vector<16x16xf32>
    %39 = arith.mulf %38, %8 : vector<16x16xf32>
    %40 = arith.addf %36, %39 : vector<16x16xf32>
    %c7 = arith.constant 7 : index
    %41 = memref.load %arg2[%c7] : memref<144xf32, #tpu.memory_space<smem>>
    %42 = vector.broadcast %41 : f32 to vector<16x16xf32>
    %43 = arith.mulf %42, %9 : vector<16x16xf32>
    %44 = arith.addf %40, %43 : vector<16x16xf32>
    %c8 = arith.constant 8 : index
    %45 = memref.load %arg2[%c8] : memref<144xf32, #tpu.memory_space<smem>>
    %46 = vector.broadcast %45 : f32 to vector<16x16xf32>
    %47 = arith.mulf %46, %10 : vector<16x16xf32>
    %48 = arith.addf %44, %47 : vector<16x16xf32>
    %cst = arith.constant 5.000000e-01 : f32
    %49 = vector.broadcast %cst : f32 to vector<16x16xf32>
    %50 = arith.mulf %49, %48 : vector<16x16xf32>
    %cst_5 = arith.constant 0.707106769 : f32
    %51 = vector.broadcast %cst_5 : f32 to vector<16x16xf32>
    %52 = arith.mulf %48, %51 : vector<16x16xf32>
    %53 = math.erf %52 : vector<16x16xf32>
    %cst_6 = arith.constant 1.000000e+00 : f32
    %54 = vector.broadcast %cst_6 : f32 to vector<16x16xf32>
    %55 = arith.addf %54, %53 : vector<16x16xf32>
    %56 = arith.mulf %50, %55 : vector<16x16xf32>
    %57 = arith.mulf %48, %56 : vector<16x16xf32>
    %c0_7 = arith.constant 0 : index
    %c0_8 = arith.constant 0 : index
    %c0_9 = arith.constant 0 : index
    %c0_10 = arith.constant 0 : index
    %58 = vector.load %arg4[%c0_7, %c0_8, %c0_9, %c0_10] : memref<1x16x16x16xf32, #tpu.memory_space<vmem>>, vector<1x1x16x16xf32>
    %59 = vector.shape_cast %58 : vector<1x1x16x16xf32> to vector<16x16xf32>
    %60 = vector.shape_cast %57 : vector<16x16xf32> to vector<1x1x16x16xf32>
    tpu.vector_store %arg4[%c0_7, %c0_8, %c0_9, %c0_10], %60 {strides = array<i32>} : memref<1x16x16x16xf32, #tpu.memory_space<vmem>>, vector<1x1x16x16xf32>,
    %c1_11 = arith.constant 1 : index
    %61 = memref.load %arg3[%c1_11] : memref<16xf32, #tpu.memory_space<smem>>
    %c9 = arith.constant 9 : index
    %62 = memref.load %arg2[%c9] : memref<144xf32, #tpu.memory_space<smem>>
    %63 = vector.broadcast %62 : f32 to vector<16x16xf32>
    %64 = arith.mulf %63, %2 : vector<16x16xf32>
    %65 = vector.broadcast %61 : f32 to vector<16x16xf32>
    %66 = arith.addf %65, %64 : vector<16x16xf32>
    %c10 = arith.constant 10 : index
    %67 = memref.load %arg2[%c10] : memref<144xf32, #tpu.memory_space<smem>>
    %68 = vector.broadcast %67 : f32 to vector<16x16xf32>
    %69 = arith.mulf %68, %3 : vector<16x16xf32>
    %70 = arith.addf %66, %69 : vector<16x16xf32>
    %c11 = arith.constant 11 : index
    %71 = memref.load %arg2[%c11] : memref<144xf32, #tpu.memory_space<smem>>
    %72 = vector.broadcast %71 : f32 to vector<16x16xf32>
    %73 = arith.mulf %72, %4 : vector<16x16xf32>
    %74 = arith.addf %70, %73 : vector<16x16xf32>
    %c12 = arith.constant 12 : index
    %75 = memref.load %arg2[%c12] : memref<144xf32, #tpu.memory_space<smem>>
    %76 = vector.broadcast %75 : f32 to vector<16x16xf32>
    %77 = arith.mulf %76, %5 : vector<16x16xf32>
    %78 = arith.addf %74, %77 : vector<16x16xf32>
    %c13 = arith.constant 13 : index
    %79 = memref.load %arg2[%c13] : memref<144xf32, #tpu.memory_space<smem>>
    %80 = vector.broadcast %79 : f32 to vector<16x16xf32>
    %81 = arith.mulf %80, %6 : vector<16x16xf32>
    %82 = arith.addf %78, %81 : vector<16x16xf32>
    %c14 = arith.constant 14 : index
    %83 = memref.load %arg2[%c14] : memref<144xf32, #tpu.memory_space<smem>>
    %84 = vector.broadcast %83 : f32 to vector<16x16xf32>
    %85 = arith.mulf %84, %7 : vector<16x16xf32>
    %86 = arith.addf %82, %85 : vector<16x16xf32>
    %c15 = arith.constant 15 : index
    %87 = memref.load %arg2[%c15] : memref<144xf32, #tpu.memory_space<smem>>
    %88 = vector.broadcast %87 : f32 to vector<16x16xf32>
    %89 = arith.mulf %88, %8 : vector<16x16xf32>
    %90 = arith.addf %86, %89 : vector<16x16xf32>
    %c16 = arith.constant 16 : index
    %91 = memref.load %arg2[%c16] : memref<144xf32, #tpu.memory_space<smem>>
    %92 = vector.broadcast %91 : f32 to vector<16x16xf32>
    %93 = arith.mulf %92, %9 : vector<16x16xf32>
    %94 = arith.addf %90, %93 : vector<16x16xf32>
    %c17 = arith.constant 17 : index
    %95 = memref.load %arg2[%c17] : memref<144xf32, #tpu.memory_space<smem>>
    %96 = vector.broadcast %95 : f32 to vector<16x16xf32>
    %97 = arith.mulf %96, %10 : vector<16x16xf32>
    %98 = arith.addf %94, %97 : vector<16x16xf32>
    %cst_12 = arith.constant 5.000000e-01 : f32
    %99 = vector.broadcast %cst_12 : f32 to vector<16x16xf32>
    %100 = arith.mulf %99, %98 : vector<16x16xf32>
    %cst_13 = arith.constant 0.707106769 : f32
    %101 = vector.broadcast %cst_13 : f32 to vector<16x16xf32>
    %102 = arith.mulf %98, %101 : vector<16x16xf32>
    %103 = math.erf %102 : vector<16x16xf32>
    %cst_14 = arith.constant 1.000000e+00 : f32
    %104 = vector.broadcast %cst_14 : f32 to vector<16x16xf32>
    %105 = arith.addf %104, %103 : vector<16x16xf32>
    %106 = arith.mulf %100, %105 : vector<16x16xf32>
    %107 = arith.mulf %98, %106 : vector<16x16xf32>
    %c0_15 = arith.constant 0 : index
    %c1_16 = arith.constant 1 : index
    %c0_17 = arith.constant 0 : index
    %c0_18 = arith.constant 0 : index
    %108 = vector.load %arg4[%c0_15, %c1_16, %c0_17, %c0_18] : memref<1x16x16x16xf32, #tpu.memory_space<vmem>>, vector<1x1x16x16xf32>
    %109 = vector.shape_cast %108 : vector<1x1x16x16xf32> to vector<16x16xf32>
    %110 = vector.shape_cast %107 : vector<16x16xf32> to vector<1x1x16x16xf32>
    tpu.vector_store %arg4[%c0_15, %c1_16, %c0_17, %c0_18], %110 {strides = array<i32>} : memref<1x16x16x16xf32, #tpu.memory_space<vmem>>, vector<1x1x16x16xf32>,
    %c0_19 = arith.constant 0 : index
    %c1_20 = arith.constant 1 : index
    %c0_21 = arith.constant 0 : index
    %c0_22 = arith.constant 0 : index
    %111 = vector.load %arg1[%c0_19, %c1_20, %c0_21, %c0_22] : memref<1x8x20x20xf32, #tpu.memory_space<vmem>>, vector<1x1x20x20xf32>
    %112 = vector.shape_cast %111 : vector<1x1x20x20xf32> to vector<20x20xf32>
    %113 = vector.extract_strided_slice %112 {offsets = [0, 0], sizes = [16, 16], strides = [1, 1]} : vector<20x20xf32> to vector<16x16xf32>
    %114 = vector.extract_strided_slice %112 {offsets = [0, 2], sizes = [16, 16], strides = [1, 1]} : vector<20x20xf32> to vector<16x16xf32>
    %115 = vector.extract_strided_slice %112 {offsets = [0, 4], sizes = [16, 16], strides = [1, 1]} : vector<20x20xf32> to vector<16x16xf32>
    %116 = vector.extract_strided_slice %112 {offsets = [2, 0], sizes = [16, 16], strides = [1, 1]} : vector<20x20xf32> to vector<16x16xf32>
    %117 = vector.extract_strided_slice %112 {offsets = [2, 2], sizes = [16, 16], strides = [1, 1]} : vector<20x20xf32> to vector<16x16xf32>
    %118 = vector.extract_strided_slice %112 {offsets = [2, 4], sizes = [16, 16], strides = [1, 1]} : vector<20x20xf32> to vector<16x16xf32>
    %119 = vector.extract_strided_slice %112 {offsets = [4, 0], sizes = [16, 16], strides = [1, 1]} : vector<20x20xf32> to vector<16x16xf32>
    %120 = vector.extract_strided_slice %112 {offsets = [4, 2], sizes = [16, 16], strides = [1, 1]} : vector<20x20xf32> to vector<16x16xf32>
    %121 = vector.extract_strided_slice %112 {offsets = [4, 4], sizes = [16, 16], strides = [1, 1]} : vector<20x20xf32> to vector<16x16xf32>
    %c2_23 = arith.constant 2 : index
    %122 = memref.load %arg3[%c2_23] : memref<16xf32, #tpu.memory_space<smem>>
    %c18 = arith.constant 18 : index
    %123 = memref.load %arg2[%c18] : memref<144xf32, #tpu.memory_space<smem>>
    %124 = vector.broadcast %123 : f32 to vector<16x16xf32>
    %125 = arith.mulf %124, %113 : vector<16x16xf32>
    %126 = vector.broadcast %122 : f32 to vector<16x16xf32>
    %127 = arith.addf %126, %125 : vector<16x16xf32>
    %c19 = arith.constant 19 : index
    %128 = memref.load %arg2[%c19] : memref<144xf32, #tpu.memory_space<smem>>
    %129 = vector.broadcast %128 : f32 to vector<16x16xf32>
    %130 = arith.mulf %129, %114 : vector<16x16xf32>
    %131 = arith.addf %127, %130 : vector<16x16xf32>
    %c20 = arith.constant 20 : index
    %132 = memref.load %arg2[%c20] : memref<144xf32, #tpu.memory_space<smem>>
    %133 = vector.broadcast %132 : f32 to vector<16x16xf32>
    %134 = arith.mulf %133, %115 : vector<16x16xf32>
    %135 = arith.addf %131, %134 : vector<16x16xf32>
    %c21 = arith.constant 21 : index
    %136 = memref.load %arg2[%c21] : memref<144xf32, #tpu.memory_space<smem>>
    %137 = vector.broadcast %136 : f32 to vector<16x16xf32>
    %138 = arith.mulf %137, %116 : vector<16x16xf32>
    %139 = arith.addf %135, %138 : vector<16x16xf32>
    %c22 = arith.constant 22 : index
    %140 = memref.load %arg2[%c22] : memref<144xf32, #tpu.memory_space<smem>>
    %141 = vector.broadcast %140 : f32 to vector<16x16xf32>
    %142 = arith.mulf %141, %117 : vector<16x16xf32>
    %143 = arith.addf %139, %142 : vector<16x16xf32>
    %c23 = arith.constant 23 : index
    %144 = memref.load %arg2[%c23] : memref<144xf32, #tpu.memory_space<smem>>
    %145 = vector.broadcast %144 : f32 to vector<16x16xf32>
    %146 = arith.mulf %145, %118 : vector<16x16xf32>
    %147 = arith.addf %143, %146 : vector<16x16xf32>
    %c24 = arith.constant 24 : index
    %148 = memref.load %arg2[%c24] : memref<144xf32, #tpu.memory_space<smem>>
    %149 = vector.broadcast %148 : f32 to vector<16x16xf32>
    %150 = arith.mulf %149, %119 : vector<16x16xf32>
    %151 = arith.addf %147, %150 : vector<16x16xf32>
    %c25 = arith.constant 25 : index
    %152 = memref.load %arg2[%c25] : memref<144xf32, #tpu.memory_space<smem>>
    %153 = vector.broadcast %152 : f32 to vector<16x16xf32>
    %154 = arith.mulf %153, %120 : vector<16x16xf32>
    %155 = arith.addf %151, %154 : vector<16x16xf32>
    %c26 = arith.constant 26 : index
    %156 = memref.load %arg2[%c26] : memref<144xf32, #tpu.memory_space<smem>>
    %157 = vector.broadcast %156 : f32 to vector<16x16xf32>
    %158 = arith.mulf %157, %121 : vector<16x16xf32>
    %159 = arith.addf %155, %158 : vector<16x16xf32>
    %cst_24 = arith.constant 5.000000e-01 : f32
    %160 = vector.broadcast %cst_24 : f32 to vector<16x16xf32>
    %161 = arith.mulf %160, %159 : vector<16x16xf32>
    %cst_25 = arith.constant 0.707106769 : f32
    %162 = vector.broadcast %cst_25 : f32 to vector<16x16xf32>
    %163 = arith.mulf %159, %162 : vector<16x16xf32>
    %164 = math.erf %163 : vector<16x16xf32>
    %cst_26 = arith.constant 1.000000e+00 : f32
    %165 = vector.broadcast %cst_26 : f32 to vector<16x16xf32>
    %166 = arith.addf %165, %164 : vector<16x16xf32>
    %167 = arith.mulf %161, %166 : vector<16x16xf32>
    %168 = arith.mulf %159, %167 : vector<16x16xf32>
    %c0_27 = arith.constant 0 : index
    %c2_28 = arith.constant 2 : index
    %c0_29 = arith.constant 0 : index
    %c0_30 = arith.constant 0 : index
    %169 = vector.load %arg4[%c0_27, %c2_28, %c0_29, %c0_30] : memref<1x16x16x16xf32, #tpu.memory_space<vmem>>, vector<1x1x16x16xf32>
    %170 = vector.shape_cast %169 : vector<1x1x16x16xf32> to vector<16x16xf32>
    %171 = vector.shape_cast %168 : vector<16x16xf32> to vector<1x1x16x16xf32>
    tpu.vector_store %arg4[%c0_27, %c2_28, %c0_29, %c0_30], %171 {strides = array<i32>} : memref<1x16x16x16xf32, #tpu.memory_space<vmem>>, vector<1x1x16x16xf32>,
    %c3_31 = arith.constant 3 : index
    %172 = memref.load %arg3[%c3_31] : memref<16xf32, #tpu.memory_space<smem>>
    %c27 = arith.constant 27 : index
    %173 = memref.load %arg2[%c27] : memref<144xf32, #tpu.memory_space<smem>>
    %174 = vector.broadcast %173 : f32 to vector<16x16xf32>
    %175 = arith.mulf %174, %113 : vector<16x16xf32>
    %176 = vector.broadcast %172 : f32 to vector<16x16xf32>
    %177 = arith.addf %176, %175 : vector<16x16xf32>
    %c28 = arith.constant 28 : index
    %178 = memref.load %arg2[%c28] : memref<144xf32, #tpu.memory_space<smem>>
    %179 = vector.broadcast %178 : f32 to vector<16x16xf32>
    %180 = arith.mulf %179, %114 : vector<16x16xf32>
    %181 = arith.addf %177, %180 : vector<16x16xf32>
    %c29 = arith.constant 29 : index
    %182 = memref.load %arg2[%c29] : memref<144xf32, #tpu.memory_space<smem>>
    %183 = vector.broadcast %182 : f32 to vector<16x16xf32>
    %184 = arith.mulf %183, %115 : vector<16x16xf32>
    %185 = arith.addf %181, %184 : vector<16x16xf32>
    %c30 = arith.constant 30 : index
    %186 = memref.load %arg2[%c30] : memref<144xf32, #tpu.memory_space<smem>>
    %187 = vector.broadcast %186 : f32 to vector<16x16xf32>
    %188 = arith.mulf %187, %116 : vector<16x16xf32>
    %189 = arith.addf %185, %188 : vector<16x16xf32>
    %c31 = arith.constant 31 : index
    %190 = memref.load %arg2[%c31] : memref<144xf32, #tpu.memory_space<smem>>
    %191 = vector.broadcast %190 : f32 to vector<16x16xf32>
    %192 = arith.mulf %191, %117 : vector<16x16xf32>
    %193 = arith.addf %189, %192 : vector<16x16xf32>
    %c32 = arith.constant 32 : index
    %194 = memref.load %arg2[%c32] : memref<144xf32, #tpu.memory_space<smem>>
    %195 = vector.broadcast %194 : f32 to vector<16x16xf32>
    %196 = arith.mulf %195, %118 : vector<16x16xf32>
    %197 = arith.addf %193, %196 : vector<16x16xf32>
    %c33 = arith.constant 33 : index
    %198 = memref.load %arg2[%c33] : memref<144xf32, #tpu.memory_space<smem>>
    %199 = vector.broadcast %198 : f32 to vector<16x16xf32>
    %200 = arith.mulf %199, %119 : vector<16x16xf32>
    %201 = arith.addf %197, %200 : vector<16x16xf32>
    %c34 = arith.constant 34 : index
    %202 = memref.load %arg2[%c34] : memref<144xf32, #tpu.memory_space<smem>>
    %203 = vector.broadcast %202 : f32 to vector<16x16xf32>
    %204 = arith.mulf %203, %120 : vector<16x16xf32>
    %205 = arith.addf %201, %204 : vector<16x16xf32>
    %c35 = arith.constant 35 : index
    %206 = memref.load %arg2[%c35] : memref<144xf32, #tpu.memory_space<smem>>
    %207 = vector.broadcast %206 : f32 to vector<16x16xf32>
    %208 = arith.mulf %207, %121 : vector<16x16xf32>
    %209 = arith.addf %205, %208 : vector<16x16xf32>
    %cst_32 = arith.constant 5.000000e-01 : f32
    %210 = vector.broadcast %cst_32 : f32 to vector<16x16xf32>
    %211 = arith.mulf %210, %209 : vector<16x16xf32>
    %cst_33 = arith.constant 0.707106769 : f32
    %212 = vector.broadcast %cst_33 : f32 to vector<16x16xf32>
    %213 = arith.mulf %209, %212 : vector<16x16xf32>
    %214 = math.erf %213 : vector<16x16xf32>
    %cst_34 = arith.constant 1.000000e+00 : f32
    %215 = vector.broadcast %cst_34 : f32 to vector<16x16xf32>
    %216 = arith.addf %215, %214 : vector<16x16xf32>
    %217 = arith.mulf %211, %216 : vector<16x16xf32>
    %218 = arith.mulf %209, %217 : vector<16x16xf32>
    %c0_35 = arith.constant 0 : index
    %c3_36 = arith.constant 3 : index
    %c0_37 = arith.constant 0 : index
    %c0_38 = arith.constant 0 : index
    %219 = vector.load %arg4[%c0_35, %c3_36, %c0_37, %c0_38] : memref<1x16x16x16xf32, #tpu.memory_space<vmem>>, vector<1x1x16x16xf32>
    %220 = vector.shape_cast %219 : vector<1x1x16x16xf32> to vector<16x16xf32>
    %221 = vector.shape_cast %218 : vector<16x16xf32> to vector<1x1x16x16xf32>
    tpu.vector_store %arg4[%c0_35, %c3_36, %c0_37, %c0_38], %221 {strides = array<i32>} : memref<1x16x16x16xf32, #tpu.memory_space<vmem>>, vector<1x1x16x16xf32>,
    %c0_39 = arith.constant 0 : index
    %c2_40 = arith.constant 2 : index
    %c0_41 = arith.constant 0 : index
    %c0_42 = arith.constant 0 : index
    %222 = vector.load %arg1[%c0_39, %c2_40, %c0_41, %c0_42] : memref<1x8x20x20xf32, #tpu.memory_space<vmem>>, vector<1x1x20x20xf32>
    %223 = vector.shape_cast %222 : vector<1x1x20x20xf32> to vector<20x20xf32>
    %224 = vector.extract_strided_slice %223 {offsets = [0, 0], sizes = [16, 16], strides = [1, 1]} : vector<20x20xf32> to vector<16x16xf32>
    %225 = vector.extract_strided_slice %223 {offsets = [0, 2], sizes = [16, 16], strides = [1, 1]} : vector<20x20xf32> to vector<16x16xf32>
    %226 = vector.extract_strided_slice %223 {offsets = [0, 4], sizes = [16, 16], strides = [1, 1]} : vector<20x20xf32> to vector<16x16xf32>
    %227 = vector.extract_strided_slice %223 {offsets = [2, 0], sizes = [16, 16], strides = [1, 1]} : vector<20x20xf32> to vector<16x16xf32>
    %228 = vector.extract_strided_slice %223 {offsets = [2, 2], sizes = [16, 16], strides = [1, 1]} : vector<20x20xf32> to vector<16x16xf32>
    %229 = vector.extract_strided_slice %223 {offsets = [2, 4], sizes = [16, 16], strides = [1, 1]} : vector<20x20xf32> to vector<16x16xf32>
    %230 = vector.extract_strided_slice %223 {offsets = [4, 0], sizes = [16, 16], strides = [1, 1]} : vector<20x20xf32> to vector<16x16xf32>
    %231 = vector.extract_strided_slice %223 {offsets = [4, 2], sizes = [16, 16], strides = [1, 1]} : vector<20x20xf32> to vector<16x16xf32>
    %232 = vector.extract_strided_slice %223 {offsets = [4, 4], sizes = [16, 16], strides = [1, 1]} : vector<20x20xf32> to vector<16x16xf32>
    %c4_43 = arith.constant 4 : index
    %233 = memref.load %arg3[%c4_43] : memref<16xf32, #tpu.memory_space<smem>>
    %c36 = arith.constant 36 : index
    %234 = memref.load %arg2[%c36] : memref<144xf32, #tpu.memory_space<smem>>
    %235 = vector.broadcast %234 : f32 to vector<16x16xf32>
    %236 = arith.mulf %235, %224 : vector<16x16xf32>
    %237 = vector.broadcast %233 : f32 to vector<16x16xf32>
    %238 = arith.addf %237, %236 : vector<16x16xf32>
    %c37 = arith.constant 37 : index
    %239 = memref.load %arg2[%c37] : memref<144xf32, #tpu.memory_space<smem>>
    %240 = vector.broadcast %239 : f32 to vector<16x16xf32>
    %241 = arith.mulf %240, %225 : vector<16x16xf32>
    %242 = arith.addf %238, %241 : vector<16x16xf32>
    %c38 = arith.constant 38 : index
    %243 = memref.load %arg2[%c38] : memref<144xf32, #tpu.memory_space<smem>>
    %244 = vector.broadcast %243 : f32 to vector<16x16xf32>
    %245 = arith.mulf %244, %226 : vector<16x16xf32>
    %246 = arith.addf %242, %245 : vector<16x16xf32>
    %c39 = arith.constant 39 : index
    %247 = memref.load %arg2[%c39] : memref<144xf32, #tpu.memory_space<smem>>
    %248 = vector.broadcast %247 : f32 to vector<16x16xf32>
    %249 = arith.mulf %248, %227 : vector<16x16xf32>
    %250 = arith.addf %246, %249 : vector<16x16xf32>
    %c40 = arith.constant 40 : index
    %251 = memref.load %arg2[%c40] : memref<144xf32, #tpu.memory_space<smem>>
    %252 = vector.broadcast %251 : f32 to vector<16x16xf32>
    %253 = arith.mulf %252, %228 : vector<16x16xf32>
    %254 = arith.addf %250, %253 : vector<16x16xf32>
    %c41 = arith.constant 41 : index
    %255 = memref.load %arg2[%c41] : memref<144xf32, #tpu.memory_space<smem>>
    %256 = vector.broadcast %255 : f32 to vector<16x16xf32>
    %257 = arith.mulf %256, %229 : vector<16x16xf32>
    %258 = arith.addf %254, %257 : vector<16x16xf32>
    %c42 = arith.constant 42 : index
    %259 = memref.load %arg2[%c42] : memref<144xf32, #tpu.memory_space<smem>>
    %260 = vector.broadcast %259 : f32 to vector<16x16xf32>
    %261 = arith.mulf %260, %230 : vector<16x16xf32>
    %262 = arith.addf %258, %261 : vector<16x16xf32>
    %c43 = arith.constant 43 : index
    %263 = memref.load %arg2[%c43] : memref<144xf32, #tpu.memory_space<smem>>
    %264 = vector.broadcast %263 : f32 to vector<16x16xf32>
    %265 = arith.mulf %264, %231 : vector<16x16xf32>
    %266 = arith.addf %262, %265 : vector<16x16xf32>
    %c44 = arith.constant 44 : index
    %267 = memref.load %arg2[%c44] : memref<144xf32, #tpu.memory_space<smem>>
    %268 = vector.broadcast %267 : f32 to vector<16x16xf32>
    %269 = arith.mulf %268, %232 : vector<16x16xf32>
    %270 = arith.addf %266, %269 : vector<16x16xf32>
    %cst_44 = arith.constant 5.000000e-01 : f32
    %271 = vector.broadcast %cst_44 : f32 to vector<16x16xf32>
    %272 = arith.mulf %271, %270 : vector<16x16xf32>
    %cst_45 = arith.constant 0.707106769 : f32
    %273 = vector.broadcast %cst_45 : f32 to vector<16x16xf32>
    %274 = arith.mulf %270, %273 : vector<16x16xf32>
    %275 = math.erf %274 : vector<16x16xf32>
    %cst_46 = arith.constant 1.000000e+00 : f32
    %276 = vector.broadcast %cst_46 : f32 to vector<16x16xf32>
    %277 = arith.addf %276, %275 : vector<16x16xf32>
    %278 = arith.mulf %272, %277 : vector<16x16xf32>
    %279 = arith.mulf %270, %278 : vector<16x16xf32>
    %c0_47 = arith.constant 0 : index
    %c4_48 = arith.constant 4 : index
    %c0_49 = arith.constant 0 : index
    %c0_50 = arith.constant 0 : index
    %280 = vector.load %arg4[%c0_47, %c4_48, %c0_49, %c0_50] : memref<1x16x16x16xf32, #tpu.memory_space<vmem>>, vector<1x1x16x16xf32>
    %281 = vector.shape_cast %280 : vector<1x1x16x16xf32> to vector<16x16xf32>
    %282 = vector.shape_cast %279 : vector<16x16xf32> to vector<1x1x16x16xf32>
    tpu.vector_store %arg4[%c0_47, %c4_48, %c0_49, %c0_50], %282 {strides = array<i32>} : memref<1x16x16x16xf32, #tpu.memory_space<vmem>>, vector<1x1x16x16xf32>,
    %c5_51 = arith.constant 5 : index
    %283 = memref.load %arg3[%c5_51] : memref<16xf32, #tpu.memory_space<smem>>
    %c45 = arith.constant 45 : index
    %284 = memref.load %arg2[%c45] : memref<144xf32, #tpu.memory_space<smem>>
    %285 = vector.broadcast %284 : f32 to vector<16x16xf32>
    %286 = arith.mulf %285, %224 : vector<16x16xf32>
    %287 = vector.broadcast %283 : f32 to vector<16x16xf32>
    %288 = arith.addf %287, %286 : vector<16x16xf32>
    %c46 = arith.constant 46 : index
    %289 = memref.load %arg2[%c46] : memref<144xf32, #tpu.memory_space<smem>>
    %290 = vector.broadcast %289 : f32 to vector<16x16xf32>
    %291 = arith.mulf %290, %225 : vector<16x16xf32>
    %292 = arith.addf %288, %291 : vector<16x16xf32>
    %c47 = arith.constant 47 : index
    %293 = memref.load %arg2[%c47] : memref<144xf32, #tpu.memory_space<smem>>
    %294 = vector.broadcast %293 : f32 to vector<16x16xf32>
    %295 = arith.mulf %294, %226 : vector<16x16xf32>
    %296 = arith.addf %292, %295 : vector<16x16xf32>
    %c48 = arith.constant 48 : index
    %297 = memref.load %arg2[%c48] : memref<144xf32, #tpu.memory_space<smem>>
    %298 = vector.broadcast %297 : f32 to vector<16x16xf32>
    %299 = arith.mulf %298, %227 : vector<16x16xf32>
    %300 = arith.addf %296, %299 : vector<16x16xf32>
    %c49 = arith.constant 49 : index
    %301 = memref.load %arg2[%c49] : memref<144xf32, #tpu.memory_space<smem>>
    %302 = vector.broadcast %301 : f32 to vector<16x16xf32>
    %303 = arith.mulf %302, %228 : vector<16x16xf32>
    %304 = arith.addf %300, %303 : vector<16x16xf32>
    %c50 = arith.constant 50 : index
    %305 = memref.load %arg2[%c50] : memref<144xf32, #tpu.memory_space<smem>>
    %306 = vector.broadcast %305 : f32 to vector<16x16xf32>
    %307 = arith.mulf %306, %229 : vector<16x16xf32>
    %308 = arith.addf %304, %307 : vector<16x16xf32>
    %c51 = arith.constant 51 : index
    %309 = memref.load %arg2[%c51] : memref<144xf32, #tpu.memory_space<smem>>
    %310 = vector.broadcast %309 : f32 to vector<16x16xf32>
    %311 = arith.mulf %310, %230 : vector<16x16xf32>
    %312 = arith.addf %308, %311 : vector<16x16xf32>
    %c52 = arith.constant 52 : index
    %313 = memref.load %arg2[%c52] : memref<144xf32, #tpu.memory_space<smem>>
    %314 = vector.broadcast %313 : f32 to vector<16x16xf32>
    %315 = arith.mulf %314, %231 : vector<16x16xf32>
    %316 = arith.addf %312, %315 : vector<16x16xf32>
    %c53 = arith.constant 53 : index
    %317 = memref.load %arg2[%c53] : memref<144xf32, #tpu.memory_space<smem>>
    %318 = vector.broadcast %317 : f32 to vector<16x16xf32>
    %319 = arith.mulf %318, %232 : vector<16x16xf32>
    %320 = arith.addf %316, %319 : vector<16x16xf32>
    %cst_52 = arith.constant 5.000000e-01 : f32
    %321 = vector.broadcast %cst_52 : f32 to vector<16x16xf32>
    %322 = arith.mulf %321, %320 : vector<16x16xf32>
    %cst_53 = arith.constant 0.707106769 : f32
    %323 = vector.broadcast %cst_53 : f32 to vector<16x16xf32>
    %324 = arith.mulf %320, %323 : vector<16x16xf32>
    %325 = math.erf %324 : vector<16x16xf32>
    %cst_54 = arith.constant 1.000000e+00 : f32
    %326 = vector.broadcast %cst_54 : f32 to vector<16x16xf32>
    %327 = arith.addf %326, %325 : vector<16x16xf32>
    %328 = arith.mulf %322, %327 : vector<16x16xf32>
    %329 = arith.mulf %320, %328 : vector<16x16xf32>
    %c0_55 = arith.constant 0 : index
    %c5_56 = arith.constant 5 : index
    %c0_57 = arith.constant 0 : index
    %c0_58 = arith.constant 0 : index
    %330 = vector.load %arg4[%c0_55, %c5_56, %c0_57, %c0_58] : memref<1x16x16x16xf32, #tpu.memory_space<vmem>>, vector<1x1x16x16xf32>
    %331 = vector.shape_cast %330 : vector<1x1x16x16xf32> to vector<16x16xf32>
    %332 = vector.shape_cast %329 : vector<16x16xf32> to vector<1x1x16x16xf32>
    tpu.vector_store %arg4[%c0_55, %c5_56, %c0_57, %c0_58], %332 {strides = array<i32>} : memref<1x16x16x16xf32, #tpu.memory_space<vmem>>, vector<1x1x16x16xf32>,
    %c0_59 = arith.constant 0 : index
    %c3_60 = arith.constant 3 : index
    %c0_61 = arith.constant 0 : index
    %c0_62 = arith.constant 0 : index
    %333 = vector.load %arg1[%c0_59, %c3_60, %c0_61, %c0_62] : memref<1x8x20x20xf32, #tpu.memory_space<vmem>>, vector<1x1x20x20xf32>
    %334 = vector.shape_cast %333 : vector<1x1x20x20xf32> to vector<20x20xf32>
    %335 = vector.extract_strided_slice %334 {offsets = [0, 0], sizes = [16, 16], strides = [1, 1]} : vector<20x20xf32> to vector<16x16xf32>
    %336 = vector.extract_strided_slice %334 {offsets = [0, 2], sizes = [16, 16], strides = [1, 1]} : vector<20x20xf32> to vector<16x16xf32>
    %337 = vector.extract_strided_slice %334 {offsets = [0, 4], sizes = [16, 16], strides = [1, 1]} : vector<20x20xf32> to vector<16x16xf32>
    %338 = vector.extract_strided_slice %334 {offsets = [2, 0], sizes = [16, 16], strides = [1, 1]} : vector<20x20xf32> to vector<16x16xf32>
    %339 = vector.extract_strided_slice %334 {offsets = [2, 2], sizes = [16, 16], strides = [1, 1]} : vector<20x20xf32> to vector<16x16xf32>
    %340 = vector.extract_strided_slice %334 {offsets = [2, 4], sizes = [16, 16], strides = [1, 1]} : vector<20x20xf32> to vector<16x16xf32>
    %341 = vector.extract_strided_slice %334 {offsets = [4, 0], sizes = [16, 16], strides = [1, 1]} : vector<20x20xf32> to vector<16x16xf32>
    %342 = vector.extract_strided_slice %334 {offsets = [4, 2], sizes = [16, 16], strides = [1, 1]} : vector<20x20xf32> to vector<16x16xf32>
    %343 = vector.extract_strided_slice %334 {offsets = [4, 4], sizes = [16, 16], strides = [1, 1]} : vector<20x20xf32> to vector<16x16xf32>
    %c6_63 = arith.constant 6 : index
    %344 = memref.load %arg3[%c6_63] : memref<16xf32, #tpu.memory_space<smem>>
    %c54 = arith.constant 54 : index
    %345 = memref.load %arg2[%c54] : memref<144xf32, #tpu.memory_space<smem>>
    %346 = vector.broadcast %345 : f32 to vector<16x16xf32>
    %347 = arith.mulf %346, %335 : vector<16x16xf32>
    %348 = vector.broadcast %344 : f32 to vector<16x16xf32>
    %349 = arith.addf %348, %347 : vector<16x16xf32>
    %c55 = arith.constant 55 : index
    %350 = memref.load %arg2[%c55] : memref<144xf32, #tpu.memory_space<smem>>
    %351 = vector.broadcast %350 : f32 to vector<16x16xf32>
    %352 = arith.mulf %351, %336 : vector<16x16xf32>
    %353 = arith.addf %349, %352 : vector<16x16xf32>
    %c56 = arith.constant 56 : index
    %354 = memref.load %arg2[%c56] : memref<144xf32, #tpu.memory_space<smem>>
    %355 = vector.broadcast %354 : f32 to vector<16x16xf32>
    %356 = arith.mulf %355, %337 : vector<16x16xf32>
    %357 = arith.addf %353, %356 : vector<16x16xf32>
    %c57 = arith.constant 57 : index
    %358 = memref.load %arg2[%c57] : memref<144xf32, #tpu.memory_space<smem>>
    %359 = vector.broadcast %358 : f32 to vector<16x16xf32>
    %360 = arith.mulf %359, %338 : vector<16x16xf32>
    %361 = arith.addf %357, %360 : vector<16x16xf32>
    %c58 = arith.constant 58 : index
    %362 = memref.load %arg2[%c58] : memref<144xf32, #tpu.memory_space<smem>>
    %363 = vector.broadcast %362 : f32 to vector<16x16xf32>
    %364 = arith.mulf %363, %339 : vector<16x16xf32>
    %365 = arith.addf %361, %364 : vector<16x16xf32>
    %c59 = arith.constant 59 : index
    %366 = memref.load %arg2[%c59] : memref<144xf32, #tpu.memory_space<smem>>
    %367 = vector.broadcast %366 : f32 to vector<16x16xf32>
    %368 = arith.mulf %367, %340 : vector<16x16xf32>
    %369 = arith.addf %365, %368 : vector<16x16xf32>
    %c60 = arith.constant 60 : index
    %370 = memref.load %arg2[%c60] : memref<144xf32, #tpu.memory_space<smem>>
    %371 = vector.broadcast %370 : f32 to vector<16x16xf32>
    %372 = arith.mulf %371, %341 : vector<16x16xf32>
    %373 = arith.addf %369, %372 : vector<16x16xf32>
    %c61 = arith.constant 61 : index
    %374 = memref.load %arg2[%c61] : memref<144xf32, #tpu.memory_space<smem>>
    %375 = vector.broadcast %374 : f32 to vector<16x16xf32>
    %376 = arith.mulf %375, %342 : vector<16x16xf32>
    %377 = arith.addf %373, %376 : vector<16x16xf32>
    %c62 = arith.constant 62 : index
    %378 = memref.load %arg2[%c62] : memref<144xf32, #tpu.memory_space<smem>>
    %379 = vector.broadcast %378 : f32 to vector<16x16xf32>
    %380 = arith.mulf %379, %343 : vector<16x16xf32>
    %381 = arith.addf %377, %380 : vector<16x16xf32>
    %cst_64 = arith.constant 5.000000e-01 : f32
    %382 = vector.broadcast %cst_64 : f32 to vector<16x16xf32>
    %383 = arith.mulf %382, %381 : vector<16x16xf32>
    %cst_65 = arith.constant 0.707106769 : f32
    %384 = vector.broadcast %cst_65 : f32 to vector<16x16xf32>
    %385 = arith.mulf %381, %384 : vector<16x16xf32>
    %386 = math.erf %385 : vector<16x16xf32>
    %cst_66 = arith.constant 1.000000e+00 : f32
    %387 = vector.broadcast %cst_66 : f32 to vector<16x16xf32>
    %388 = arith.addf %387, %386 : vector<16x16xf32>
    %389 = arith.mulf %383, %388 : vector<16x16xf32>
    %390 = arith.mulf %381, %389 : vector<16x16xf32>
    %c0_67 = arith.constant 0 : index
    %c6_68 = arith.constant 6 : index
    %c0_69 = arith.constant 0 : index
    %c0_70 = arith.constant 0 : index
    %391 = vector.load %arg4[%c0_67, %c6_68, %c0_69, %c0_70] : memref<1x16x16x16xf32, #tpu.memory_space<vmem>>, vector<1x1x16x16xf32>
    %392 = vector.shape_cast %391 : vector<1x1x16x16xf32> to vector<16x16xf32>
    %393 = vector.shape_cast %390 : vector<16x16xf32> to vector<1x1x16x16xf32>
    tpu.vector_store %arg4[%c0_67, %c6_68, %c0_69, %c0_70], %393 {strides = array<i32>} : memref<1x16x16x16xf32, #tpu.memory_space<vmem>>, vector<1x1x16x16xf32>,
    %c7_71 = arith.constant 7 : index
    %394 = memref.load %arg3[%c7_71] : memref<16xf32, #tpu.memory_space<smem>>
    %c63 = arith.constant 63 : index
    %395 = memref.load %arg2[%c63] : memref<144xf32, #tpu.memory_space<smem>>
    %396 = vector.broadcast %395 : f32 to vector<16x16xf32>
    %397 = arith.mulf %396, %335 : vector<16x16xf32>
    %398 = vector.broadcast %394 : f32 to vector<16x16xf32>
    %399 = arith.addf %398, %397 : vector<16x16xf32>
    %c64 = arith.constant 64 : index
    %400 = memref.load %arg2[%c64] : memref<144xf32, #tpu.memory_space<smem>>
    %401 = vector.broadcast %400 : f32 to vector<16x16xf32>
    %402 = arith.mulf %401, %336 : vector<16x16xf32>
    %403 = arith.addf %399, %402 : vector<16x16xf32>
    %c65 = arith.constant 65 : index
    %404 = memref.load %arg2[%c65] : memref<144xf32, #tpu.memory_space<smem>>
    %405 = vector.broadcast %404 : f32 to vector<16x16xf32>
    %406 = arith.mulf %405, %337 : vector<16x16xf32>
    %407 = arith.addf %403, %406 : vector<16x16xf32>
    %c66 = arith.constant 66 : index
    %408 = memref.load %arg2[%c66] : memref<144xf32, #tpu.memory_space<smem>>
    %409 = vector.broadcast %408 : f32 to vector<16x16xf32>
    %410 = arith.mulf %409, %338 : vector<16x16xf32>
    %411 = arith.addf %407, %410 : vector<16x16xf32>
    %c67 = arith.constant 67 : index
    %412 = memref.load %arg2[%c67] : memref<144xf32, #tpu.memory_space<smem>>
    %413 = vector.broadcast %412 : f32 to vector<16x16xf32>
    %414 = arith.mulf %413, %339 : vector<16x16xf32>
    %415 = arith.addf %411, %414 : vector<16x16xf32>
    %c68 = arith.constant 68 : index
    %416 = memref.load %arg2[%c68] : memref<144xf32, #tpu.memory_space<smem>>
    %417 = vector.broadcast %416 : f32 to vector<16x16xf32>
    %418 = arith.mulf %417, %340 : vector<16x16xf32>
    %419 = arith.addf %415, %418 : vector<16x16xf32>
    %c69 = arith.constant 69 : index
    %420 = memref.load %arg2[%c69] : memref<144xf32, #tpu.memory_space<smem>>
    %421 = vector.broadcast %420 : f32 to vector<16x16xf32>
    %422 = arith.mulf %421, %341 : vector<16x16xf32>
    %423 = arith.addf %419, %422 : vector<16x16xf32>
    %c70 = arith.constant 70 : index
    %424 = memref.load %arg2[%c70] : memref<144xf32, #tpu.memory_space<smem>>
    %425 = vector.broadcast %424 : f32 to vector<16x16xf32>
    %426 = arith.mulf %425, %342 : vector<16x16xf32>
    %427 = arith.addf %423, %426 : vector<16x16xf32>
    %c71 = arith.constant 71 : index
    %428 = memref.load %arg2[%c71] : memref<144xf32, #tpu.memory_space<smem>>
    %429 = vector.broadcast %428 : f32 to vector<16x16xf32>
    %430 = arith.mulf %429, %343 : vector<16x16xf32>
    %431 = arith.addf %427, %430 : vector<16x16xf32>
    %cst_72 = arith.constant 5.000000e-01 : f32
    %432 = vector.broadcast %cst_72 : f32 to vector<16x16xf32>
    %433 = arith.mulf %432, %431 : vector<16x16xf32>
    %cst_73 = arith.constant 0.707106769 : f32
    %434 = vector.broadcast %cst_73 : f32 to vector<16x16xf32>
    %435 = arith.mulf %431, %434 : vector<16x16xf32>
    %436 = math.erf %435 : vector<16x16xf32>
    %cst_74 = arith.constant 1.000000e+00 : f32
    %437 = vector.broadcast %cst_74 : f32 to vector<16x16xf32>
    %438 = arith.addf %437, %436 : vector<16x16xf32>
    %439 = arith.mulf %433, %438 : vector<16x16xf32>
    %440 = arith.mulf %431, %439 : vector<16x16xf32>
    %c0_75 = arith.constant 0 : index
    %c7_76 = arith.constant 7 : index
    %c0_77 = arith.constant 0 : index
    %c0_78 = arith.constant 0 : index
    %441 = vector.load %arg4[%c0_75, %c7_76, %c0_77, %c0_78] : memref<1x16x16x16xf32, #tpu.memory_space<vmem>>, vector<1x1x16x16xf32>
    %442 = vector.shape_cast %441 : vector<1x1x16x16xf32> to vector<16x16xf32>
    %443 = vector.shape_cast %440 : vector<16x16xf32> to vector<1x1x16x16xf32>
    tpu.vector_store %arg4[%c0_75, %c7_76, %c0_77, %c0_78], %443 {strides = array<i32>} : memref<1x16x16x16xf32, #tpu.memory_space<vmem>>, vector<1x1x16x16xf32>,
    %c0_79 = arith.constant 0 : index
    %c4_80 = arith.constant 4 : index
    %c0_81 = arith.constant 0 : index
    %c0_82 = arith.constant 0 : index
    %444 = vector.load %arg1[%c0_79, %c4_80, %c0_81, %c0_82] : memref<1x8x20x20xf32, #tpu.memory_space<vmem>>, vector<1x1x20x20xf32>
    %445 = vector.shape_cast %444 : vector<1x1x20x20xf32> to vector<20x20xf32>
    %446 = vector.extract_strided_slice %445 {offsets = [0, 0], sizes = [16, 16], strides = [1, 1]} : vector<20x20xf32> to vector<16x16xf32>
    %447 = vector.extract_strided_slice %445 {offsets = [0, 2], sizes = [16, 16], strides = [1, 1]} : vector<20x20xf32> to vector<16x16xf32>
    %448 = vector.extract_strided_slice %445 {offsets = [0, 4], sizes = [16, 16], strides = [1, 1]} : vector<20x20xf32> to vector<16x16xf32>
    %449 = vector.extract_strided_slice %445 {offsets = [2, 0], sizes = [16, 16], strides = [1, 1]} : vector<20x20xf32> to vector<16x16xf32>
    %450 = vector.extract_strided_slice %445 {offsets = [2, 2], sizes = [16, 16], strides = [1, 1]} : vector<20x20xf32> to vector<16x16xf32>
    %451 = vector.extract_strided_slice %445 {offsets = [2, 4], sizes = [16, 16], strides = [1, 1]} : vector<20x20xf32> to vector<16x16xf32>
    %452 = vector.extract_strided_slice %445 {offsets = [4, 0], sizes = [16, 16], strides = [1, 1]} : vector<20x20xf32> to vector<16x16xf32>
    %453 = vector.extract_strided_slice %445 {offsets = [4, 2], sizes = [16, 16], strides = [1, 1]} : vector<20x20xf32> to vector<16x16xf32>
    %454 = vector.extract_strided_slice %445 {offsets = [4, 4], sizes = [16, 16], strides = [1, 1]} : vector<20x20xf32> to vector<16x16xf32>
    %c8_83 = arith.constant 8 : index
    %455 = memref.load %arg3[%c8_83] : memref<16xf32, #tpu.memory_space<smem>>
    %c72 = arith.constant 72 : index
    %456 = memref.load %arg2[%c72] : memref<144xf32, #tpu.memory_space<smem>>
    %457 = vector.broadcast %456 : f32 to vector<16x16xf32>
    %458 = arith.mulf %457, %446 : vector<16x16xf32>
    %459 = vector.broadcast %455 : f32 to vector<16x16xf32>
    %460 = arith.addf %459, %458 : vector<16x16xf32>
    %c73 = arith.constant 73 : index
    %461 = memref.load %arg2[%c73] : memref<144xf32, #tpu.memory_space<smem>>
    %462 = vector.broadcast %461 : f32 to vector<16x16xf32>
    %463 = arith.mulf %462, %447 : vector<16x16xf32>
    %464 = arith.addf %460, %463 : vector<16x16xf32>
    %c74 = arith.constant 74 : index
    %465 = memref.load %arg2[%c74] : memref<144xf32, #tpu.memory_space<smem>>
    %466 = vector.broadcast %465 : f32 to vector<16x16xf32>
    %467 = arith.mulf %466, %448 : vector<16x16xf32>
    %468 = arith.addf %464, %467 : vector<16x16xf32>
    %c75 = arith.constant 75 : index
    %469 = memref.load %arg2[%c75] : memref<144xf32, #tpu.memory_space<smem>>
    %470 = vector.broadcast %469 : f32 to vector<16x16xf32>
    %471 = arith.mulf %470, %449 : vector<16x16xf32>
    %472 = arith.addf %468, %471 : vector<16x16xf32>
    %c76 = arith.constant 76 : index
    %473 = memref.load %arg2[%c76] : memref<144xf32, #tpu.memory_space<smem>>
    %474 = vector.broadcast %473 : f32 to vector<16x16xf32>
    %475 = arith.mulf %474, %450 : vector<16x16xf32>
    %476 = arith.addf %472, %475 : vector<16x16xf32>
    %c77 = arith.constant 77 : index
    %477 = memref.load %arg2[%c77] : memref<144xf32, #tpu.memory_space<smem>>
    %478 = vector.broadcast %477 : f32 to vector<16x16xf32>
    %479 = arith.mulf %478, %451 : vector<16x16xf32>
    %480 = arith.addf %476, %479 : vector<16x16xf32>
    %c78 = arith.constant 78 : index
    %481 = memref.load %arg2[%c78] : memref<144xf32, #tpu.memory_space<smem>>
    %482 = vector.broadcast %481 : f32 to vector<16x16xf32>
    %483 = arith.mulf %482, %452 : vector<16x16xf32>
    %484 = arith.addf %480, %483 : vector<16x16xf32>
    %c79 = arith.constant 79 : index
    %485 = memref.load %arg2[%c79] : memref<144xf32, #tpu.memory_space<smem>>
    %486 = vector.broadcast %485 : f32 to vector<16x16xf32>
    %487 = arith.mulf %486, %453 : vector<16x16xf32>
    %488 = arith.addf %484, %487 : vector<16x16xf32>
    %c80 = arith.constant 80 : index
    %489 = memref.load %arg2[%c80] : memref<144xf32, #tpu.memory_space<smem>>
    %490 = vector.broadcast %489 : f32 to vector<16x16xf32>
    %491 = arith.mulf %490, %454 : vector<16x16xf32>
    %492 = arith.addf %488, %491 : vector<16x16xf32>
    %cst_84 = arith.constant 5.000000e-01 : f32
    %493 = vector.broadcast %cst_84 : f32 to vector<16x16xf32>
    %494 = arith.mulf %493, %492 : vector<16x16xf32>
    %cst_85 = arith.constant 0.707106769 : f32
    %495 = vector.broadcast %cst_85 : f32 to vector<16x16xf32>
    %496 = arith.mulf %492, %495 : vector<16x16xf32>
    %497 = math.erf %496 : vector<16x16xf32>
    %cst_86 = arith.constant 1.000000e+00 : f32
    %498 = vector.broadcast %cst_86 : f32 to vector<16x16xf32>
    %499 = arith.addf %498, %497 : vector<16x16xf32>
    %500 = arith.mulf %494, %499 : vector<16x16xf32>
    %501 = arith.mulf %492, %500 : vector<16x16xf32>
    %c0_87 = arith.constant 0 : index
    %c8_88 = arith.constant 8 : index
    %c0_89 = arith.constant 0 : index
    %c0_90 = arith.constant 0 : index
    %502 = vector.load %arg4[%c0_87, %c8_88, %c0_89, %c0_90] : memref<1x16x16x16xf32, #tpu.memory_space<vmem>>, vector<1x1x16x16xf32>
    %503 = vector.shape_cast %502 : vector<1x1x16x16xf32> to vector<16x16xf32>
    %504 = vector.shape_cast %501 : vector<16x16xf32> to vector<1x1x16x16xf32>
    tpu.vector_store %arg4[%c0_87, %c8_88, %c0_89, %c0_90], %504 {strides = array<i32>} : memref<1x16x16x16xf32, #tpu.memory_space<vmem>>, vector<1x1x16x16xf32>,
    %c9_91 = arith.constant 9 : index
    %505 = memref.load %arg3[%c9_91] : memref<16xf32, #tpu.memory_space<smem>>
    %c81 = arith.constant 81 : index
    %506 = memref.load %arg2[%c81] : memref<144xf32, #tpu.memory_space<smem>>
    %507 = vector.broadcast %506 : f32 to vector<16x16xf32>
    %508 = arith.mulf %507, %446 : vector<16x16xf32>
    %509 = vector.broadcast %505 : f32 to vector<16x16xf32>
    %510 = arith.addf %509, %508 : vector<16x16xf32>
    %c82 = arith.constant 82 : index
    %511 = memref.load %arg2[%c82] : memref<144xf32, #tpu.memory_space<smem>>
    %512 = vector.broadcast %511 : f32 to vector<16x16xf32>
    %513 = arith.mulf %512, %447 : vector<16x16xf32>
    %514 = arith.addf %510, %513 : vector<16x16xf32>
    %c83 = arith.constant 83 : index
    %515 = memref.load %arg2[%c83] : memref<144xf32, #tpu.memory_space<smem>>
    %516 = vector.broadcast %515 : f32 to vector<16x16xf32>
    %517 = arith.mulf %516, %448 : vector<16x16xf32>
    %518 = arith.addf %514, %517 : vector<16x16xf32>
    %c84 = arith.constant 84 : index
    %519 = memref.load %arg2[%c84] : memref<144xf32, #tpu.memory_space<smem>>
    %520 = vector.broadcast %519 : f32 to vector<16x16xf32>
    %521 = arith.mulf %520, %449 : vector<16x16xf32>
    %522 = arith.addf %518, %521 : vector<16x16xf32>
    %c85 = arith.constant 85 : index
    %523 = memref.load %arg2[%c85] : memref<144xf32, #tpu.memory_space<smem>>
    %524 = vector.broadcast %523 : f32 to vector<16x16xf32>
    %525 = arith.mulf %524, %450 : vector<16x16xf32>
    %526 = arith.addf %522, %525 : vector<16x16xf32>
    %c86 = arith.constant 86 : index
    %527 = memref.load %arg2[%c86] : memref<144xf32, #tpu.memory_space<smem>>
    %528 = vector.broadcast %527 : f32 to vector<16x16xf32>
    %529 = arith.mulf %528, %451 : vector<16x16xf32>
    %530 = arith.addf %526, %529 : vector<16x16xf32>
    %c87 = arith.constant 87 : index
    %531 = memref.load %arg2[%c87] : memref<144xf32, #tpu.memory_space<smem>>
    %532 = vector.broadcast %531 : f32 to vector<16x16xf32>
    %533 = arith.mulf %532, %452 : vector<16x16xf32>
    %534 = arith.addf %530, %533 : vector<16x16xf32>
    %c88 = arith.constant 88 : index
    %535 = memref.load %arg2[%c88] : memref<144xf32, #tpu.memory_space<smem>>
    %536 = vector.broadcast %535 : f32 to vector<16x16xf32>
    %537 = arith.mulf %536, %453 : vector<16x16xf32>
    %538 = arith.addf %534, %537 : vector<16x16xf32>
    %c89 = arith.constant 89 : index
    %539 = memref.load %arg2[%c89] : memref<144xf32, #tpu.memory_space<smem>>
    %540 = vector.broadcast %539 : f32 to vector<16x16xf32>
    %541 = arith.mulf %540, %454 : vector<16x16xf32>
    %542 = arith.addf %538, %541 : vector<16x16xf32>
    %cst_92 = arith.constant 5.000000e-01 : f32
    %543 = vector.broadcast %cst_92 : f32 to vector<16x16xf32>
    %544 = arith.mulf %543, %542 : vector<16x16xf32>
    %cst_93 = arith.constant 0.707106769 : f32
    %545 = vector.broadcast %cst_93 : f32 to vector<16x16xf32>
    %546 = arith.mulf %542, %545 : vector<16x16xf32>
    %547 = math.erf %546 : vector<16x16xf32>
    %cst_94 = arith.constant 1.000000e+00 : f32
    %548 = vector.broadcast %cst_94 : f32 to vector<16x16xf32>
    %549 = arith.addf %548, %547 : vector<16x16xf32>
    %550 = arith.mulf %544, %549 : vector<16x16xf32>
    %551 = arith.mulf %542, %550 : vector<16x16xf32>
    %c0_95 = arith.constant 0 : index
    %c9_96 = arith.constant 9 : index
    %c0_97 = arith.constant 0 : index
    %c0_98 = arith.constant 0 : index
    %552 = vector.load %arg4[%c0_95, %c9_96, %c0_97, %c0_98] : memref<1x16x16x16xf32, #tpu.memory_space<vmem>>, vector<1x1x16x16xf32>
    %553 = vector.shape_cast %552 : vector<1x1x16x16xf32> to vector<16x16xf32>
    %554 = vector.shape_cast %551 : vector<16x16xf32> to vector<1x1x16x16xf32>
    tpu.vector_store %arg4[%c0_95, %c9_96, %c0_97, %c0_98], %554 {strides = array<i32>} : memref<1x16x16x16xf32, #tpu.memory_space<vmem>>, vector<1x1x16x16xf32>,
    %c0_99 = arith.constant 0 : index
    %c5_100 = arith.constant 5 : index
    %c0_101 = arith.constant 0 : index
    %c0_102 = arith.constant 0 : index
    %555 = vector.load %arg1[%c0_99, %c5_100, %c0_101, %c0_102] : memref<1x8x20x20xf32, #tpu.memory_space<vmem>>, vector<1x1x20x20xf32>
    %556 = vector.shape_cast %555 : vector<1x1x20x20xf32> to vector<20x20xf32>
    %557 = vector.extract_strided_slice %556 {offsets = [0, 0], sizes = [16, 16], strides = [1, 1]} : vector<20x20xf32> to vector<16x16xf32>
    %558 = vector.extract_strided_slice %556 {offsets = [0, 2], sizes = [16, 16], strides = [1, 1]} : vector<20x20xf32> to vector<16x16xf32>
    %559 = vector.extract_strided_slice %556 {offsets = [0, 4], sizes = [16, 16], strides = [1, 1]} : vector<20x20xf32> to vector<16x16xf32>
    %560 = vector.extract_strided_slice %556 {offsets = [2, 0], sizes = [16, 16], strides = [1, 1]} : vector<20x20xf32> to vector<16x16xf32>
    %561 = vector.extract_strided_slice %556 {offsets = [2, 2], sizes = [16, 16], strides = [1, 1]} : vector<20x20xf32> to vector<16x16xf32>
    %562 = vector.extract_strided_slice %556 {offsets = [2, 4], sizes = [16, 16], strides = [1, 1]} : vector<20x20xf32> to vector<16x16xf32>
    %563 = vector.extract_strided_slice %556 {offsets = [4, 0], sizes = [16, 16], strides = [1, 1]} : vector<20x20xf32> to vector<16x16xf32>
    %564 = vector.extract_strided_slice %556 {offsets = [4, 2], sizes = [16, 16], strides = [1, 1]} : vector<20x20xf32> to vector<16x16xf32>
    %565 = vector.extract_strided_slice %556 {offsets = [4, 4], sizes = [16, 16], strides = [1, 1]} : vector<20x20xf32> to vector<16x16xf32>
    %c10_103 = arith.constant 10 : index
    %566 = memref.load %arg3[%c10_103] : memref<16xf32, #tpu.memory_space<smem>>
    %c90 = arith.constant 90 : index
    %567 = memref.load %arg2[%c90] : memref<144xf32, #tpu.memory_space<smem>>
    %568 = vector.broadcast %567 : f32 to vector<16x16xf32>
    %569 = arith.mulf %568, %557 : vector<16x16xf32>
    %570 = vector.broadcast %566 : f32 to vector<16x16xf32>
    %571 = arith.addf %570, %569 : vector<16x16xf32>
    %c91 = arith.constant 91 : index
    %572 = memref.load %arg2[%c91] : memref<144xf32, #tpu.memory_space<smem>>
    %573 = vector.broadcast %572 : f32 to vector<16x16xf32>
    %574 = arith.mulf %573, %558 : vector<16x16xf32>
    %575 = arith.addf %571, %574 : vector<16x16xf32>
    %c92 = arith.constant 92 : index
    %576 = memref.load %arg2[%c92] : memref<144xf32, #tpu.memory_space<smem>>
    %577 = vector.broadcast %576 : f32 to vector<16x16xf32>
    %578 = arith.mulf %577, %559 : vector<16x16xf32>
    %579 = arith.addf %575, %578 : vector<16x16xf32>
    %c93 = arith.constant 93 : index
    %580 = memref.load %arg2[%c93] : memref<144xf32, #tpu.memory_space<smem>>
    %581 = vector.broadcast %580 : f32 to vector<16x16xf32>
    %582 = arith.mulf %581, %560 : vector<16x16xf32>
    %583 = arith.addf %579, %582 : vector<16x16xf32>
    %c94 = arith.constant 94 : index
    %584 = memref.load %arg2[%c94] : memref<144xf32, #tpu.memory_space<smem>>
    %585 = vector.broadcast %584 : f32 to vector<16x16xf32>
    %586 = arith.mulf %585, %561 : vector<16x16xf32>
    %587 = arith.addf %583, %586 : vector<16x16xf32>
    %c95 = arith.constant 95 : index
    %588 = memref.load %arg2[%c95] : memref<144xf32, #tpu.memory_space<smem>>
    %589 = vector.broadcast %588 : f32 to vector<16x16xf32>
    %590 = arith.mulf %589, %562 : vector<16x16xf32>
    %591 = arith.addf %587, %590 : vector<16x16xf32>
    %c96 = arith.constant 96 : index
    %592 = memref.load %arg2[%c96] : memref<144xf32, #tpu.memory_space<smem>>
    %593 = vector.broadcast %592 : f32 to vector<16x16xf32>
    %594 = arith.mulf %593, %563 : vector<16x16xf32>
    %595 = arith.addf %591, %594 : vector<16x16xf32>
    %c97 = arith.constant 97 : index
    %596 = memref.load %arg2[%c97] : memref<144xf32, #tpu.memory_space<smem>>
    %597 = vector.broadcast %596 : f32 to vector<16x16xf32>
    %598 = arith.mulf %597, %564 : vector<16x16xf32>
    %599 = arith.addf %595, %598 : vector<16x16xf32>
    %c98 = arith.constant 98 : index
    %600 = memref.load %arg2[%c98] : memref<144xf32, #tpu.memory_space<smem>>
    %601 = vector.broadcast %600 : f32 to vector<16x16xf32>
    %602 = arith.mulf %601, %565 : vector<16x16xf32>
    %603 = arith.addf %599, %602 : vector<16x16xf32>
    %cst_104 = arith.constant 5.000000e-01 : f32
    %604 = vector.broadcast %cst_104 : f32 to vector<16x16xf32>
    %605 = arith.mulf %604, %603 : vector<16x16xf32>
    %cst_105 = arith.constant 0.707106769 : f32
    %606 = vector.broadcast %cst_105 : f32 to vector<16x16xf32>
    %607 = arith.mulf %603, %606 : vector<16x16xf32>
    %608 = math.erf %607 : vector<16x16xf32>
    %cst_106 = arith.constant 1.000000e+00 : f32
    %609 = vector.broadcast %cst_106 : f32 to vector<16x16xf32>
    %610 = arith.addf %609, %608 : vector<16x16xf32>
    %611 = arith.mulf %605, %610 : vector<16x16xf32>
    %612 = arith.mulf %603, %611 : vector<16x16xf32>
    %c0_107 = arith.constant 0 : index
    %c10_108 = arith.constant 10 : index
    %c0_109 = arith.constant 0 : index
    %c0_110 = arith.constant 0 : index
    %613 = vector.load %arg4[%c0_107, %c10_108, %c0_109, %c0_110] : memref<1x16x16x16xf32, #tpu.memory_space<vmem>>, vector<1x1x16x16xf32>
    %614 = vector.shape_cast %613 : vector<1x1x16x16xf32> to vector<16x16xf32>
    %615 = vector.shape_cast %612 : vector<16x16xf32> to vector<1x1x16x16xf32>
    tpu.vector_store %arg4[%c0_107, %c10_108, %c0_109, %c0_110], %615 {strides = array<i32>} : memref<1x16x16x16xf32, #tpu.memory_space<vmem>>, vector<1x1x16x16xf32>,
    %c11_111 = arith.constant 11 : index
    %616 = memref.load %arg3[%c11_111] : memref<16xf32, #tpu.memory_space<smem>>
    %c99 = arith.constant 99 : index
    %617 = memref.load %arg2[%c99] : memref<144xf32, #tpu.memory_space<smem>>
    %618 = vector.broadcast %617 : f32 to vector<16x16xf32>
    %619 = arith.mulf %618, %557 : vector<16x16xf32>
    %620 = vector.broadcast %616 : f32 to vector<16x16xf32>
    %621 = arith.addf %620, %619 : vector<16x16xf32>
    %c100 = arith.constant 100 : index
    %622 = memref.load %arg2[%c100] : memref<144xf32, #tpu.memory_space<smem>>
    %623 = vector.broadcast %622 : f32 to vector<16x16xf32>
    %624 = arith.mulf %623, %558 : vector<16x16xf32>
    %625 = arith.addf %621, %624 : vector<16x16xf32>
    %c101 = arith.constant 101 : index
    %626 = memref.load %arg2[%c101] : memref<144xf32, #tpu.memory_space<smem>>
    %627 = vector.broadcast %626 : f32 to vector<16x16xf32>
    %628 = arith.mulf %627, %559 : vector<16x16xf32>
    %629 = arith.addf %625, %628 : vector<16x16xf32>
    %c102 = arith.constant 102 : index
    %630 = memref.load %arg2[%c102] : memref<144xf32, #tpu.memory_space<smem>>
    %631 = vector.broadcast %630 : f32 to vector<16x16xf32>
    %632 = arith.mulf %631, %560 : vector<16x16xf32>
    %633 = arith.addf %629, %632 : vector<16x16xf32>
    %c103 = arith.constant 103 : index
    %634 = memref.load %arg2[%c103] : memref<144xf32, #tpu.memory_space<smem>>
    %635 = vector.broadcast %634 : f32 to vector<16x16xf32>
    %636 = arith.mulf %635, %561 : vector<16x16xf32>
    %637 = arith.addf %633, %636 : vector<16x16xf32>
    %c104 = arith.constant 104 : index
    %638 = memref.load %arg2[%c104] : memref<144xf32, #tpu.memory_space<smem>>
    %639 = vector.broadcast %638 : f32 to vector<16x16xf32>
    %640 = arith.mulf %639, %562 : vector<16x16xf32>
    %641 = arith.addf %637, %640 : vector<16x16xf32>
    %c105 = arith.constant 105 : index
    %642 = memref.load %arg2[%c105] : memref<144xf32, #tpu.memory_space<smem>>
    %643 = vector.broadcast %642 : f32 to vector<16x16xf32>
    %644 = arith.mulf %643, %563 : vector<16x16xf32>
    %645 = arith.addf %641, %644 : vector<16x16xf32>
    %c106 = arith.constant 106 : index
    %646 = memref.load %arg2[%c106] : memref<144xf32, #tpu.memory_space<smem>>
    %647 = vector.broadcast %646 : f32 to vector<16x16xf32>
    %648 = arith.mulf %647, %564 : vector<16x16xf32>
    %649 = arith.addf %645, %648 : vector<16x16xf32>
    %c107 = arith.constant 107 : index
    %650 = memref.load %arg2[%c107] : memref<144xf32, #tpu.memory_space<smem>>
    %651 = vector.broadcast %650 : f32 to vector<16x16xf32>
    %652 = arith.mulf %651, %565 : vector<16x16xf32>
    %653 = arith.addf %649, %652 : vector<16x16xf32>
    %cst_112 = arith.constant 5.000000e-01 : f32
    %654 = vector.broadcast %cst_112 : f32 to vector<16x16xf32>
    %655 = arith.mulf %654, %653 : vector<16x16xf32>
    %cst_113 = arith.constant 0.707106769 : f32
    %656 = vector.broadcast %cst_113 : f32 to vector<16x16xf32>
    %657 = arith.mulf %653, %656 : vector<16x16xf32>
    %658 = math.erf %657 : vector<16x16xf32>
    %cst_114 = arith.constant 1.000000e+00 : f32
    %659 = vector.broadcast %cst_114 : f32 to vector<16x16xf32>
    %660 = arith.addf %659, %658 : vector<16x16xf32>
    %661 = arith.mulf %655, %660 : vector<16x16xf32>
    %662 = arith.mulf %653, %661 : vector<16x16xf32>
    %c0_115 = arith.constant 0 : index
    %c11_116 = arith.constant 11 : index
    %c0_117 = arith.constant 0 : index
    %c0_118 = arith.constant 0 : index
    %663 = vector.load %arg4[%c0_115, %c11_116, %c0_117, %c0_118] : memref<1x16x16x16xf32, #tpu.memory_space<vmem>>, vector<1x1x16x16xf32>
    %664 = vector.shape_cast %663 : vector<1x1x16x16xf32> to vector<16x16xf32>
    %665 = vector.shape_cast %662 : vector<16x16xf32> to vector<1x1x16x16xf32>
    tpu.vector_store %arg4[%c0_115, %c11_116, %c0_117, %c0_118], %665 {strides = array<i32>} : memref<1x16x16x16xf32, #tpu.memory_space<vmem>>, vector<1x1x16x16xf32>,
    %c0_119 = arith.constant 0 : index
    %c6_120 = arith.constant 6 : index
    %c0_121 = arith.constant 0 : index
    %c0_122 = arith.constant 0 : index
    %666 = vector.load %arg1[%c0_119, %c6_120, %c0_121, %c0_122] : memref<1x8x20x20xf32, #tpu.memory_space<vmem>>, vector<1x1x20x20xf32>
    %667 = vector.shape_cast %666 : vector<1x1x20x20xf32> to vector<20x20xf32>
    %668 = vector.extract_strided_slice %667 {offsets = [0, 0], sizes = [16, 16], strides = [1, 1]} : vector<20x20xf32> to vector<16x16xf32>
    %669 = vector.extract_strided_slice %667 {offsets = [0, 2], sizes = [16, 16], strides = [1, 1]} : vector<20x20xf32> to vector<16x16xf32>
    %670 = vector.extract_strided_slice %667 {offsets = [0, 4], sizes = [16, 16], strides = [1, 1]} : vector<20x20xf32> to vector<16x16xf32>
    %671 = vector.extract_strided_slice %667 {offsets = [2, 0], sizes = [16, 16], strides = [1, 1]} : vector<20x20xf32> to vector<16x16xf32>
    %672 = vector.extract_strided_slice %667 {offsets = [2, 2], sizes = [16, 16], strides = [1, 1]} : vector<20x20xf32> to vector<16x16xf32>
    %673 = vector.extract_strided_slice %667 {offsets = [2, 4], sizes = [16, 16], strides = [1, 1]} : vector<20x20xf32> to vector<16x16xf32>
    %674 = vector.extract_strided_slice %667 {offsets = [4, 0], sizes = [16, 16], strides = [1, 1]} : vector<20x20xf32> to vector<16x16xf32>
    %675 = vector.extract_strided_slice %667 {offsets = [4, 2], sizes = [16, 16], strides = [1, 1]} : vector<20x20xf32> to vector<16x16xf32>
    %676 = vector.extract_strided_slice %667 {offsets = [4, 4], sizes = [16, 16], strides = [1, 1]} : vector<20x20xf32> to vector<16x16xf32>
    %c12_123 = arith.constant 12 : index
    %677 = memref.load %arg3[%c12_123] : memref<16xf32, #tpu.memory_space<smem>>
    %c108 = arith.constant 108 : index
    %678 = memref.load %arg2[%c108] : memref<144xf32, #tpu.memory_space<smem>>
    %679 = vector.broadcast %678 : f32 to vector<16x16xf32>
    %680 = arith.mulf %679, %668 : vector<16x16xf32>
    %681 = vector.broadcast %677 : f32 to vector<16x16xf32>
    %682 = arith.addf %681, %680 : vector<16x16xf32>
    %c109 = arith.constant 109 : index
    %683 = memref.load %arg2[%c109] : memref<144xf32, #tpu.memory_space<smem>>
    %684 = vector.broadcast %683 : f32 to vector<16x16xf32>
    %685 = arith.mulf %684, %669 : vector<16x16xf32>
    %686 = arith.addf %682, %685 : vector<16x16xf32>
    %c110 = arith.constant 110 : index
    %687 = memref.load %arg2[%c110] : memref<144xf32, #tpu.memory_space<smem>>
    %688 = vector.broadcast %687 : f32 to vector<16x16xf32>
    %689 = arith.mulf %688, %670 : vector<16x16xf32>
    %690 = arith.addf %686, %689 : vector<16x16xf32>
    %c111 = arith.constant 111 : index
    %691 = memref.load %arg2[%c111] : memref<144xf32, #tpu.memory_space<smem>>
    %692 = vector.broadcast %691 : f32 to vector<16x16xf32>
    %693 = arith.mulf %692, %671 : vector<16x16xf32>
    %694 = arith.addf %690, %693 : vector<16x16xf32>
    %c112 = arith.constant 112 : index
    %695 = memref.load %arg2[%c112] : memref<144xf32, #tpu.memory_space<smem>>
    %696 = vector.broadcast %695 : f32 to vector<16x16xf32>
    %697 = arith.mulf %696, %672 : vector<16x16xf32>
    %698 = arith.addf %694, %697 : vector<16x16xf32>
    %c113 = arith.constant 113 : index
    %699 = memref.load %arg2[%c113] : memref<144xf32, #tpu.memory_space<smem>>
    %700 = vector.broadcast %699 : f32 to vector<16x16xf32>
    %701 = arith.mulf %700, %673 : vector<16x16xf32>
    %702 = arith.addf %698, %701 : vector<16x16xf32>
    %c114 = arith.constant 114 : index
    %703 = memref.load %arg2[%c114] : memref<144xf32, #tpu.memory_space<smem>>
    %704 = vector.broadcast %703 : f32 to vector<16x16xf32>
    %705 = arith.mulf %704, %674 : vector<16x16xf32>
    %706 = arith.addf %702, %705 : vector<16x16xf32>
    %c115 = arith.constant 115 : index
    %707 = memref.load %arg2[%c115] : memref<144xf32, #tpu.memory_space<smem>>
    %708 = vector.broadcast %707 : f32 to vector<16x16xf32>
    %709 = arith.mulf %708, %675 : vector<16x16xf32>
    %710 = arith.addf %706, %709 : vector<16x16xf32>
    %c116 = arith.constant 116 : index
    %711 = memref.load %arg2[%c116] : memref<144xf32, #tpu.memory_space<smem>>
    %712 = vector.broadcast %711 : f32 to vector<16x16xf32>
    %713 = arith.mulf %712, %676 : vector<16x16xf32>
    %714 = arith.addf %710, %713 : vector<16x16xf32>
    %cst_124 = arith.constant 5.000000e-01 : f32
    %715 = vector.broadcast %cst_124 : f32 to vector<16x16xf32>
    %716 = arith.mulf %715, %714 : vector<16x16xf32>
    %cst_125 = arith.constant 0.707106769 : f32
    %717 = vector.broadcast %cst_125 : f32 to vector<16x16xf32>
    %718 = arith.mulf %714, %717 : vector<16x16xf32>
    %719 = math.erf %718 : vector<16x16xf32>
    %cst_126 = arith.constant 1.000000e+00 : f32
    %720 = vector.broadcast %cst_126 : f32 to vector<16x16xf32>
    %721 = arith.addf %720, %719 : vector<16x16xf32>
    %722 = arith.mulf %716, %721 : vector<16x16xf32>
    %723 = arith.mulf %714, %722 : vector<16x16xf32>
    %c0_127 = arith.constant 0 : index
    %c12_128 = arith.constant 12 : index
    %c0_129 = arith.constant 0 : index
    %c0_130 = arith.constant 0 : index
    %724 = vector.load %arg4[%c0_127, %c12_128, %c0_129, %c0_130] : memref<1x16x16x16xf32, #tpu.memory_space<vmem>>, vector<1x1x16x16xf32>
    %725 = vector.shape_cast %724 : vector<1x1x16x16xf32> to vector<16x16xf32>
    %726 = vector.shape_cast %723 : vector<16x16xf32> to vector<1x1x16x16xf32>
    tpu.vector_store %arg4[%c0_127, %c12_128, %c0_129, %c0_130], %726 {strides = array<i32>} : memref<1x16x16x16xf32, #tpu.memory_space<vmem>>, vector<1x1x16x16xf32>,
    %c13_131 = arith.constant 13 : index
    %727 = memref.load %arg3[%c13_131] : memref<16xf32, #tpu.memory_space<smem>>
    %c117 = arith.constant 117 : index
    %728 = memref.load %arg2[%c117] : memref<144xf32, #tpu.memory_space<smem>>
    %729 = vector.broadcast %728 : f32 to vector<16x16xf32>
    %730 = arith.mulf %729, %668 : vector<16x16xf32>
    %731 = vector.broadcast %727 : f32 to vector<16x16xf32>
    %732 = arith.addf %731, %730 : vector<16x16xf32>
    %c118 = arith.constant 118 : index
    %733 = memref.load %arg2[%c118] : memref<144xf32, #tpu.memory_space<smem>>
    %734 = vector.broadcast %733 : f32 to vector<16x16xf32>
    %735 = arith.mulf %734, %669 : vector<16x16xf32>
    %736 = arith.addf %732, %735 : vector<16x16xf32>
    %c119 = arith.constant 119 : index
    %737 = memref.load %arg2[%c119] : memref<144xf32, #tpu.memory_space<smem>>
    %738 = vector.broadcast %737 : f32 to vector<16x16xf32>
    %739 = arith.mulf %738, %670 : vector<16x16xf32>
    %740 = arith.addf %736, %739 : vector<16x16xf32>
    %c120 = arith.constant 120 : index
    %741 = memref.load %arg2[%c120] : memref<144xf32, #tpu.memory_space<smem>>
    %742 = vector.broadcast %741 : f32 to vector<16x16xf32>
    %743 = arith.mulf %742, %671 : vector<16x16xf32>
    %744 = arith.addf %740, %743 : vector<16x16xf32>
    %c121 = arith.constant 121 : index
    %745 = memref.load %arg2[%c121] : memref<144xf32, #tpu.memory_space<smem>>
    %746 = vector.broadcast %745 : f32 to vector<16x16xf32>
    %747 = arith.mulf %746, %672 : vector<16x16xf32>
    %748 = arith.addf %744, %747 : vector<16x16xf32>
    %c122 = arith.constant 122 : index
    %749 = memref.load %arg2[%c122] : memref<144xf32, #tpu.memory_space<smem>>
    %750 = vector.broadcast %749 : f32 to vector<16x16xf32>
    %751 = arith.mulf %750, %673 : vector<16x16xf32>
    %752 = arith.addf %748, %751 : vector<16x16xf32>
    %c123 = arith.constant 123 : index
    %753 = memref.load %arg2[%c123] : memref<144xf32, #tpu.memory_space<smem>>
    %754 = vector.broadcast %753 : f32 to vector<16x16xf32>
    %755 = arith.mulf %754, %674 : vector<16x16xf32>
    %756 = arith.addf %752, %755 : vector<16x16xf32>
    %c124 = arith.constant 124 : index
    %757 = memref.load %arg2[%c124] : memref<144xf32, #tpu.memory_space<smem>>
    %758 = vector.broadcast %757 : f32 to vector<16x16xf32>
    %759 = arith.mulf %758, %675 : vector<16x16xf32>
    %760 = arith.addf %756, %759 : vector<16x16xf32>
    %c125 = arith.constant 125 : index
    %761 = memref.load %arg2[%c125] : memref<144xf32, #tpu.memory_space<smem>>
    %762 = vector.broadcast %761 : f32 to vector<16x16xf32>
    %763 = arith.mulf %762, %676 : vector<16x16xf32>
    %764 = arith.addf %760, %763 : vector<16x16xf32>
    %cst_132 = arith.constant 5.000000e-01 : f32
    %765 = vector.broadcast %cst_132 : f32 to vector<16x16xf32>
    %766 = arith.mulf %765, %764 : vector<16x16xf32>
    %cst_133 = arith.constant 0.707106769 : f32
    %767 = vector.broadcast %cst_133 : f32 to vector<16x16xf32>
    %768 = arith.mulf %764, %767 : vector<16x16xf32>
    %769 = math.erf %768 : vector<16x16xf32>
    %cst_134 = arith.constant 1.000000e+00 : f32
    %770 = vector.broadcast %cst_134 : f32 to vector<16x16xf32>
    %771 = arith.addf %770, %769 : vector<16x16xf32>
    %772 = arith.mulf %766, %771 : vector<16x16xf32>
    %773 = arith.mulf %764, %772 : vector<16x16xf32>
    %c0_135 = arith.constant 0 : index
    %c13_136 = arith.constant 13 : index
    %c0_137 = arith.constant 0 : index
    %c0_138 = arith.constant 0 : index
    %774 = vector.load %arg4[%c0_135, %c13_136, %c0_137, %c0_138] : memref<1x16x16x16xf32, #tpu.memory_space<vmem>>, vector<1x1x16x16xf32>
    %775 = vector.shape_cast %774 : vector<1x1x16x16xf32> to vector<16x16xf32>
    %776 = vector.shape_cast %773 : vector<16x16xf32> to vector<1x1x16x16xf32>
    tpu.vector_store %arg4[%c0_135, %c13_136, %c0_137, %c0_138], %776 {strides = array<i32>} : memref<1x16x16x16xf32, #tpu.memory_space<vmem>>, vector<1x1x16x16xf32>,
    %c0_139 = arith.constant 0 : index
    %c7_140 = arith.constant 7 : index
    %c0_141 = arith.constant 0 : index
    %c0_142 = arith.constant 0 : index
    %777 = vector.load %arg1[%c0_139, %c7_140, %c0_141, %c0_142] : memref<1x8x20x20xf32, #tpu.memory_space<vmem>>, vector<1x1x20x20xf32>
    %778 = vector.shape_cast %777 : vector<1x1x20x20xf32> to vector<20x20xf32>
    %779 = vector.extract_strided_slice %778 {offsets = [0, 0], sizes = [16, 16], strides = [1, 1]} : vector<20x20xf32> to vector<16x16xf32>
    %780 = vector.extract_strided_slice %778 {offsets = [0, 2], sizes = [16, 16], strides = [1, 1]} : vector<20x20xf32> to vector<16x16xf32>
    %781 = vector.extract_strided_slice %778 {offsets = [0, 4], sizes = [16, 16], strides = [1, 1]} : vector<20x20xf32> to vector<16x16xf32>
    %782 = vector.extract_strided_slice %778 {offsets = [2, 0], sizes = [16, 16], strides = [1, 1]} : vector<20x20xf32> to vector<16x16xf32>
    %783 = vector.extract_strided_slice %778 {offsets = [2, 2], sizes = [16, 16], strides = [1, 1]} : vector<20x20xf32> to vector<16x16xf32>
    %784 = vector.extract_strided_slice %778 {offsets = [2, 4], sizes = [16, 16], strides = [1, 1]} : vector<20x20xf32> to vector<16x16xf32>
    %785 = vector.extract_strided_slice %778 {offsets = [4, 0], sizes = [16, 16], strides = [1, 1]} : vector<20x20xf32> to vector<16x16xf32>
    %786 = vector.extract_strided_slice %778 {offsets = [4, 2], sizes = [16, 16], strides = [1, 1]} : vector<20x20xf32> to vector<16x16xf32>
    %787 = vector.extract_strided_slice %778 {offsets = [4, 4], sizes = [16, 16], strides = [1, 1]} : vector<20x20xf32> to vector<16x16xf32>
    %c14_143 = arith.constant 14 : index
    %788 = memref.load %arg3[%c14_143] : memref<16xf32, #tpu.memory_space<smem>>
    %c126 = arith.constant 126 : index
    %789 = memref.load %arg2[%c126] : memref<144xf32, #tpu.memory_space<smem>>
    %790 = vector.broadcast %789 : f32 to vector<16x16xf32>
    %791 = arith.mulf %790, %779 : vector<16x16xf32>
    %792 = vector.broadcast %788 : f32 to vector<16x16xf32>
    %793 = arith.addf %792, %791 : vector<16x16xf32>
    %c127 = arith.constant 127 : index
    %794 = memref.load %arg2[%c127] : memref<144xf32, #tpu.memory_space<smem>>
    %795 = vector.broadcast %794 : f32 to vector<16x16xf32>
    %796 = arith.mulf %795, %780 : vector<16x16xf32>
    %797 = arith.addf %793, %796 : vector<16x16xf32>
    %c128 = arith.constant 128 : index
    %798 = memref.load %arg2[%c128] : memref<144xf32, #tpu.memory_space<smem>>
    %799 = vector.broadcast %798 : f32 to vector<16x16xf32>
    %800 = arith.mulf %799, %781 : vector<16x16xf32>
    %801 = arith.addf %797, %800 : vector<16x16xf32>
    %c129 = arith.constant 129 : index
    %802 = memref.load %arg2[%c129] : memref<144xf32, #tpu.memory_space<smem>>
    %803 = vector.broadcast %802 : f32 to vector<16x16xf32>
    %804 = arith.mulf %803, %782 : vector<16x16xf32>
    %805 = arith.addf %801, %804 : vector<16x16xf32>
    %c130 = arith.constant 130 : index
    %806 = memref.load %arg2[%c130] : memref<144xf32, #tpu.memory_space<smem>>
    %807 = vector.broadcast %806 : f32 to vector<16x16xf32>
    %808 = arith.mulf %807, %783 : vector<16x16xf32>
    %809 = arith.addf %805, %808 : vector<16x16xf32>
    %c131 = arith.constant 131 : index
    %810 = memref.load %arg2[%c131] : memref<144xf32, #tpu.memory_space<smem>>
    %811 = vector.broadcast %810 : f32 to vector<16x16xf32>
    %812 = arith.mulf %811, %784 : vector<16x16xf32>
    %813 = arith.addf %809, %812 : vector<16x16xf32>
    %c132 = arith.constant 132 : index
    %814 = memref.load %arg2[%c132] : memref<144xf32, #tpu.memory_space<smem>>
    %815 = vector.broadcast %814 : f32 to vector<16x16xf32>
    %816 = arith.mulf %815, %785 : vector<16x16xf32>
    %817 = arith.addf %813, %816 : vector<16x16xf32>
    %c133 = arith.constant 133 : index
    %818 = memref.load %arg2[%c133] : memref<144xf32, #tpu.memory_space<smem>>
    %819 = vector.broadcast %818 : f32 to vector<16x16xf32>
    %820 = arith.mulf %819, %786 : vector<16x16xf32>
    %821 = arith.addf %817, %820 : vector<16x16xf32>
    %c134 = arith.constant 134 : index
    %822 = memref.load %arg2[%c134] : memref<144xf32, #tpu.memory_space<smem>>
    %823 = vector.broadcast %822 : f32 to vector<16x16xf32>
    %824 = arith.mulf %823, %787 : vector<16x16xf32>
    %825 = arith.addf %821, %824 : vector<16x16xf32>
    %cst_144 = arith.constant 5.000000e-01 : f32
    %826 = vector.broadcast %cst_144 : f32 to vector<16x16xf32>
    %827 = arith.mulf %826, %825 : vector<16x16xf32>
    %cst_145 = arith.constant 0.707106769 : f32
    %828 = vector.broadcast %cst_145 : f32 to vector<16x16xf32>
    %829 = arith.mulf %825, %828 : vector<16x16xf32>
    %830 = math.erf %829 : vector<16x16xf32>
    %cst_146 = arith.constant 1.000000e+00 : f32
    %831 = vector.broadcast %cst_146 : f32 to vector<16x16xf32>
    %832 = arith.addf %831, %830 : vector<16x16xf32>
    %833 = arith.mulf %827, %832 : vector<16x16xf32>
    %834 = arith.mulf %825, %833 : vector<16x16xf32>
    %c0_147 = arith.constant 0 : index
    %c14_148 = arith.constant 14 : index
    %c0_149 = arith.constant 0 : index
    %c0_150 = arith.constant 0 : index
    %835 = vector.load %arg4[%c0_147, %c14_148, %c0_149, %c0_150] : memref<1x16x16x16xf32, #tpu.memory_space<vmem>>, vector<1x1x16x16xf32>
    %836 = vector.shape_cast %835 : vector<1x1x16x16xf32> to vector<16x16xf32>
    %837 = vector.shape_cast %834 : vector<16x16xf32> to vector<1x1x16x16xf32>
    tpu.vector_store %arg4[%c0_147, %c14_148, %c0_149, %c0_150], %837 {strides = array<i32>} : memref<1x16x16x16xf32, #tpu.memory_space<vmem>>, vector<1x1x16x16xf32>,
    %c15_151 = arith.constant 15 : index
    %838 = memref.load %arg3[%c15_151] : memref<16xf32, #tpu.memory_space<smem>>
    %c135 = arith.constant 135 : index
    %839 = memref.load %arg2[%c135] : memref<144xf32, #tpu.memory_space<smem>>
    %840 = vector.broadcast %839 : f32 to vector<16x16xf32>
    %841 = arith.mulf %840, %779 : vector<16x16xf32>
    %842 = vector.broadcast %838 : f32 to vector<16x16xf32>
    %843 = arith.addf %842, %841 : vector<16x16xf32>
    %c136 = arith.constant 136 : index
    %844 = memref.load %arg2[%c136] : memref<144xf32, #tpu.memory_space<smem>>
    %845 = vector.broadcast %844 : f32 to vector<16x16xf32>
    %846 = arith.mulf %845, %780 : vector<16x16xf32>
    %847 = arith.addf %843, %846 : vector<16x16xf32>
    %c137 = arith.constant 137 : index
    %848 = memref.load %arg2[%c137] : memref<144xf32, #tpu.memory_space<smem>>
    %849 = vector.broadcast %848 : f32 to vector<16x16xf32>
    %850 = arith.mulf %849, %781 : vector<16x16xf32>
    %851 = arith.addf %847, %850 : vector<16x16xf32>
    %c138 = arith.constant 138 : index
    %852 = memref.load %arg2[%c138] : memref<144xf32, #tpu.memory_space<smem>>
    %853 = vector.broadcast %852 : f32 to vector<16x16xf32>
    %854 = arith.mulf %853, %782 : vector<16x16xf32>
    %855 = arith.addf %851, %854 : vector<16x16xf32>
    %c139 = arith.constant 139 : index
    %856 = memref.load %arg2[%c139] : memref<144xf32, #tpu.memory_space<smem>>
    %857 = vector.broadcast %856 : f32 to vector<16x16xf32>
    %858 = arith.mulf %857, %783 : vector<16x16xf32>
    %859 = arith.addf %855, %858 : vector<16x16xf32>
    %c140 = arith.constant 140 : index
    %860 = memref.load %arg2[%c140] : memref<144xf32, #tpu.memory_space<smem>>
    %861 = vector.broadcast %860 : f32 to vector<16x16xf32>
    %862 = arith.mulf %861, %784 : vector<16x16xf32>
    %863 = arith.addf %859, %862 : vector<16x16xf32>
    %c141 = arith.constant 141 : index
    %864 = memref.load %arg2[%c141] : memref<144xf32, #tpu.memory_space<smem>>
    %865 = vector.broadcast %864 : f32 to vector<16x16xf32>
    %866 = arith.mulf %865, %785 : vector<16x16xf32>
    %867 = arith.addf %863, %866 : vector<16x16xf32>
    %c142 = arith.constant 142 : index
    %868 = memref.load %arg2[%c142] : memref<144xf32, #tpu.memory_space<smem>>
    %869 = vector.broadcast %868 : f32 to vector<16x16xf32>
    %870 = arith.mulf %869, %786 : vector<16x16xf32>
    %871 = arith.addf %867, %870 : vector<16x16xf32>
    %c143 = arith.constant 143 : index
    %872 = memref.load %arg2[%c143] : memref<144xf32, #tpu.memory_space<smem>>
    %873 = vector.broadcast %872 : f32 to vector<16x16xf32>
    %874 = arith.mulf %873, %787 : vector<16x16xf32>
    %875 = arith.addf %871, %874 : vector<16x16xf32>
    %cst_152 = arith.constant 5.000000e-01 : f32
    %876 = vector.broadcast %cst_152 : f32 to vector<16x16xf32>
    %877 = arith.mulf %876, %875 : vector<16x16xf32>
    %cst_153 = arith.constant 0.707106769 : f32
    %878 = vector.broadcast %cst_153 : f32 to vector<16x16xf32>
    %879 = arith.mulf %875, %878 : vector<16x16xf32>
    %880 = math.erf %879 : vector<16x16xf32>
    %cst_154 = arith.constant 1.000000e+00 : f32
    %881 = vector.broadcast %cst_154 : f32 to vector<16x16xf32>
    %882 = arith.addf %881, %880 : vector<16x16xf32>
    %883 = arith.mulf %877, %882 : vector<16x16xf32>
    %884 = arith.mulf %875, %883 : vector<16x16xf32>
    %c0_155 = arith.constant 0 : index
    %c15_156 = arith.constant 15 : index
    %c0_157 = arith.constant 0 : index
    %c0_158 = arith.constant 0 : index
    %885 = vector.load %arg4[%c0_155, %c15_156, %c0_157, %c0_158] : memref<1x16x16x16xf32, #tpu.memory_space<vmem>>, vector<1x1x16x16xf32>
    %886 = vector.shape_cast %885 : vector<1x1x16x16xf32> to vector<16x16xf32>
    %887 = vector.shape_cast %884 : vector<16x16xf32> to vector<1x1x16x16xf32>
    tpu.vector_store %arg4[%c0_155, %c15_156, %c0_157, %c0_158], %887 {strides = array<i32>} : memref<1x16x16x16xf32, #tpu.memory_space<vmem>>, vector<1x1x16x16xf32>,
    return
  }
  func.func @transform_0(%arg0: i32) -> (i32, i32, i32, i32) {
    %c0_i32 = arith.constant 0 : i32
    %c0_i32_0 = arith.constant 0 : i32
    %c0_i32_1 = arith.constant 0 : i32
    %c0_i32_2 = arith.constant 0 : i32
    return %arg0, %c0_i32, %c0_i32_0, %c0_i32_1 : i32, i32, i32, i32
  }
  func.func @transform_1(%arg0: i32) -> i32 {
    %c0_i32 = arith.constant 0 : i32
    %c0_i32_0 = arith.constant 0 : i32
    return %c0_i32 : i32
  }
  func.func @transform_2(%arg0: i32) -> i32 {
    %c0_i32 = arith.constant 0 : i32
    %c0_i32_0 = arith.constant 0 : i32
    return %c0_i32 : i32
  }
  func.func @transform_3(%arg0: i32) -> (i32, i32, i32, i32) {
    %c0_i32 = arith.constant 0 : i32
    %c0_i32_0 = arith.constant 0 : i32
    %c0_i32_1 = arith.constant 0 : i32
    %c0_i32_2 = arith.constant 0 : i32
    return %arg0, %c0_i32, %c0_i32_0, %c0_i32_1 : i32, i32, i32, i32
  }
}

</mosaic_0001>

<bundles_post_ra>
// kernel: conv_gelu_mul.1
= control target key start
LH: loop header
LB: loop body
LE: loop exit
PB: predicated region body
PF: predicated region fallthrough
CT: control target
= control target key end

     0   :  { %8 = vsyncpa [#allocation4], 0  ;;  %s5332_s0 = inlined_call_operand.vmem [shape: f32[2,8,20,20], index: 0, kind: input, shape index: {}]   ;;  %s5333_s1 = inlined_call_operand.vmem [shape: f32[144], index: 1, kind: input, shape index: {}]   ;;  %s5334_s2 = inlined_call_operand.vmem [shape: f32[16], index: 2, kind: input, shape index: {}]   ;;  %s5335_s3 = inlined_call_operand.hbm [shape: f32[2,16,16,16], index: 3, kind: output, shape index: {}]  }
   0x1   :  { %9 = vsyncpa [#allocation6], 0 }
   0x2   :  { %10 = vsyncpa [#allocation3], 0 }
   0x3   :  { %12 = vsyncpa [#allocation3 + $0x1], 0  ;;  %s3533_s12 = smov 0   ;;  %s3535_s13 = smov 0  }
   0x4   :  { %s3537_s14 = smov 0   ;;  %s3539_s15 = smov 0  }
   0x5 LB: > { %s3554_s16 = sadd.s32 4294967295, %s3504_s15   ;;  %s3031_s17 = sadd.s32 4294967294, %s3504_s15   ;;  %s3504_s15 = sphi %s3539_s15, %s5373_s15   ;;  %s3500_s14 = sphi %s3537_s14, %s5372_s14   ;;  %s3496_s13 = sphi %s3535_s13, %s5371_s13   ;;  %s3492_s12 = sphi %s3533_s12, %s5370_s12  }
   0x6   : > { %s3558_s18 = sadd.s32 1, %s3504_s15   ;;  %s93_s19 = sadd.s32 1, %s3500_s14 }
   0x7   : > { %s90_s20 = ssub.s32 %s3504_s15, %s3558_s18  ;;  %p103_p0 = scmp.ne.s32.totalorder %s3500_s14, %s3496_s13 }
   0x8   : > { %p91_p1 = scmp.eq.s32.totalorder %s90_s20, 0  ;;  %p104_p2 = scmp.eq.s32.totalorder %s3554_s16, 1 }
   0x9   : > { %p109_p3 = scmp.ne.s32.totalorder %s3496_s13, %s3492_s12  ;;  %p110_p4 = scmp.eq.s32.totalorder %s3031_s17, 1 }
   0xa   : > { %s3569_s21 = scalar_select %p91_p1, %s3500_s14, %s93_s19  }
   0xb   : > { %p3571_p5 = por %p104_p2, %p103_p0  ;;  %p3575_p6 = por %p110_p4, %p109_p3 }
   0xc   : > { %p3032_p7 = scmp.ge.s32.totalorder %s3504_s15, 1  ;;  %p117_p8 = scmp.lt.s32.totalorder %s3504_s15, 3 }
   0xd   : > { %s5339_s22 = scalar_select %p3571_p5, 1, 0 }
   0xe   : > { %s5340_s23 = scalar_select %p3575_p6, 1, 0 }
   0xf   : > { %p5336_p9 = scmp.eq.s32.totalorder %s3554_s16, 0  ;;  %p3582_p10 = pnand %p3032_p7, %p117_p8 }
  0x10   : > { %s130_s27 = sshll.u32 %s5333_s1, 4  ;;  %s141_s30 = sshll.u32 %s5334_s2, 4  ;;  %s131_s27 = int_to_ptr.vmem [resolvable:$true] %s130_s27  ;;  %s142_s30 = int_to_ptr.vmem [resolvable:$true] %s141_s30 }
  0x11   : > { %s5341_s24 = scalar_select %p3582_p10, 1, 0 }
  0x12   : > { %p3267_p11 = pneg %p3582_p10  ;;  %s3406_s5 = scalar_lea.vmem %s131_s27, 32 }
  0x13   : > { %p3407_p13 = scmp.ne.s32.totalorder %s131_s27, %s3406_s5  ;;  %p3414_p3 = scmp.lt.s32.totalorder %s131_s27, %s131_s27 }
  0x14   : > { %p3596_p12 = pnand %p5336_p9, %p3267_p11  ;;  %p3415_p4 = scmp.lt.s32.totalorder %s3406_s5, %s3406_s5 }
  0x16   : > { %p3408_p0 = pneg %p3596_p12  ;;  %p3416_p7 = por %p3415_p4, %p3414_p3 }
  0x18   : > { %p3409_p1 = pnand %p3408_p0, %p3407_p13 }
  0x1a   : > { %p3410_p2 = pneg %p3409_p1 }
  0x1c   : > { %p3417_p8 = pnand %p3416_p7, %p3410_p2 }
  0x1e   : > { %3420 = shalt.err (!%p3417_p8)
}
  0x1f   : > { %s3506_s6 = smov [#allocation2]   ;;  %s3421_s7 = scalar_lea.vmem %s142_s30, 16 }
  0x20   : > { %3270 = dma.vmem_to_smem (!%p3596_p12), %s131_s27, 32, %s3506_s6, [#allocation4]  }
  0x21   : > { %p3422_p11 = scmp.ne.s32.totalorder %s142_s30, %s3421_s7  ;;  %p3429_p5 = scmp.lt.s32.totalorder %s142_s30, %s142_s30 }
  0x22   : > { %p3430_p10 = scmp.lt.s32.totalorder %s3421_s7, %s3421_s7 }
  0x23   : > { %p3424_p9 = pnand %p3422_p11, %p3408_p0 }
  0x24   : > { %p3431_p13 = por %p3430_p10, %p3429_p5 }
  0x25   : > { %p3425_p6 = pneg %p3424_p9 }
  0x27   : > { %p3432_p1 = pnand %p3431_p13, %p3425_p6 }
  0x29   : > { %3435 = shalt.err (!%p3432_p1)
}
  0x2a   : > { %s3507_s8 = smov [#allocation5]   ;;  %p5343_p2 = scmp.ne.s32.totalorder %s5341_s24, 0 }
  0x2b   : > { %3273 = dma.vmem_to_smem (!%p3596_p12), %s142_s30, 16, %s3507_s8, [#allocation6]  }
  0x2c   : > { %162 = sbr.rel (%p5343_p2) target bundleno = 602 (0x25a), region = 32 }
  0x31   : > { %p5344_p3 = scmp.eq.s32.totalorder %s3554_s16, 0 }
  0x33   : > { %3479 = dma.done.wait (%p5344_p3), [#allocation4], 32   ;;  %p5345_p4 = pmov %p5344_p3 }
  0x34   : > { %p5346_p9 = pmov %p5344_p3 }
  0x35   : > { %3481 = vsyncadd (%p5345_p4), [#allocation4], 4294967264 }
  0x36   : > { %3483 = dma.done.wait (%p5346_p9), [#allocation6], 16   ;;  %p5347_p5 = pmov %p5344_p3 }
  0x38   : > { %3485 = vsyncadd (%p5347_p5), [#allocation6], 4294967280 }
  0x39   : > { %172 = sfence }
  0x3a   : > { %p191_p6 = scmp.lt.s32.totalorder %s3554_s16, 1  ;;  %s3042_s9 = sld [smem:[#allocation2 + $0x2]]  ;;  %vm243_vm0 = vcmask 1045504   ;;  %vm303_vm1 = vcmask 1043456   ;;  %vm367_vm2 = vcmask 130048  }
  0x3b   : > { %s3041_s10 = sld [smem:[#allocation2 + $0x1]]  ;;  %s3508_s29 = smov 124  }
  0x3c   : > { %s192_s11 = scalar_select %p191_p6, %s3554_s16, 1 }
  0x3d   : > { %s3044_s17 = sld [smem:[#allocation2 + $0x4]]  ;;  %s3509_s30 = smov 126  }
  0x3e   : > { %s3256_s19 = smul.u32 192, %s192_s11  ;;  %s3045_s20 = sld [smem:[#allocation2 + $0x5]] }
  0x3f   : > { %s3047_s24 = sld [smem:[#allocation2 + $0x7]]  ;;  %p5368_p12 = scmp.ne.s32.totalorder %s5339_s22, 0 }
  0x40   : > { %s3621_s27 = scalar_lea.vmem %s5332_s0, %s3256_s19  ;;  %v222_v0 = vstv %s3042_s9  ;;  %s3048_s28 = sld [smem:[#allocation2 + $0x8]] }
  0x41   : > { %v3624_v1 = vld [vmem:[%s3621_s27] sm:$0xff]  ;;  %v3627_v2 = vld [vmem:[%s3621_s27 + $0x8] sm:$0xff]  ;;  %v208_v3 = vstv %s3041_s10  ;;  %v3630_v4 = vld [vmem:[%s3621_s27 + $0x10] sm:$0xf]  ;;  %s3051_s4 = sld [smem:[#allocation2 + $0xa]] }
  0x42   : > { %v223_v5 = vmul.f32 %v222_v0, %v3624_v1  ;;  %v209_v6 = vmul.f32 %v208_v3, %v3624_v1  ;;  %v224_v7 = vmul.f32 %v222_v0, %v3627_v2  ;;  %v210_v8 = vmul.f32 %v208_v3, %v3627_v2  ;;  %s3054_s5 = sld [smem:[#allocation2 + $0xd]] }
  0x43   : > { %v254_v9 = vstv %s3044_s17  ;;  %s3052_s6 = sld [smem:[#allocation2 + $0xb]] }
  0x44   : > { %227 = vrot.lane.b32.xlu1 %v223_v5, %s3508_s29  ;;  %213 = vrot.lane.b32.xlu0 %v209_v6, %s3509_s30  ;;  %v256_v10 = vmul.f32 %v254_v9, %v3627_v2  ;;  %v257_v11 = vmul.f32 %v254_v9, %v3630_v4  ;;  %v255_v12 = vmul.f32 %v254_v9, %v3624_v1  ;;  %v275_v13 = vstv %s3045_s20  ;;  %s3055_s7 = sld [smem:[#allocation2 + $0xe]] }
  0x45   : > { %v277_v14 = vmul.f32 %v275_v13, %v3627_v2  ;;  %v278_v15 = vmul.f32 %v275_v13, %v3630_v4  ;;  %v276_v16 = vmul.f32 %v275_v13, %v3624_v1  ;;  %v314_v17 = vstv %s3047_s24  ;;  %s3057_s8 = sld [smem:[#allocation2 + $0x10]] }
  0x46   : > { %v262_v18 = vrot.slane %v256_v10, 2  ;;  %v264_v19 = vrot.slane %v257_v11, 2  ;;  %v261_v20 = vrot.slane %v255_v12, 2  ;;  %v316_v21 = vmul.f32 %v314_v17, %v3627_v2  ;;  %s3058_s9 = sld [smem:[#allocation2 + $0x11]] }
  0x47   : > { %v283_v22 = vrot.slane %v277_v14, 2  ;;  %v285_v23 = vrot.slane %v278_v15, 2  ;;  %v282_v24 = vrot.slane %v276_v16, 2  ;;  %v317_v25 = vmul.f32 %v314_v17, %v3630_v4  ;;  %s3066_s10 = sld [smem:[#allocation2 + $0x13]] }
  0x48   : > { %229 = vrot.lane.b32.xlu1 %v224_v7, %s3508_s29  ;;  %215 = vrot.lane.b32.xlu0 %v210_v8, %s3509_s30  ;;  %v265_v26 = vsel %vm243_vm0, %v262_v18, %v264_v19  ;;  %v263_v27 = vsel %vm243_vm0, %v261_v20, %v262_v18  ;;  %v315_v28 = vmul.f32 %v314_v17, %v3624_v1  ;;  %v335_v29 = vstv %s3048_s28  ;;  %s3069_s11 = sld [smem:[#allocation2 + $0x16]] }
  0x49   : > { %v286_v30 = vsel %vm243_vm0, %v283_v22, %v285_v23  ;;  %v284_v31 = vsel %vm243_vm0, %v282_v24, %v283_v22  ;;  %v322_v32 = vrot.slane %v316_v21, 4  ;;  %v324_v33 = vrot.slane %v317_v25, 4  ;;  %s3067_s17 = sld [smem:[#allocation2 + $0x14]] }
  0x4a   : > { %v321_v34 = vrot.slane %v315_v28, 4  ;;  %v337_v35 = vmul.f32 %v335_v29, %v3627_v2  ;;  %v338_v36 = vmul.f32 %v335_v29, %v3630_v4  ;;  %v336_v37 = vmul.f32 %v335_v29, %v3624_v1  ;;  %s3070_s19 = sld [smem:[#allocation2 + $0x17]]  ;;  %v3706_v28 = vld [vmem:[%s3621_s27 + $0x18] sm:$0xff]  ;;  %v3709_v29 = vld [vmem:[%s3621_s27 + $0x28] sm:$0xf] }
  0x4b   : > { %v325_v38 = vsel %vm303_vm1, %v322_v32, %v324_v33  ;;  %v379_v45 = vstv %s3051_s4  ;;  %v424_v46 = vstv %s3054_s5  ;;  %v393_v49 = vstv %s3052_s6  ;;  %s3072_s20 = sld [smem:[#allocation2 + $0x19]] }
  0x4c   : > { %268 = vrot.lane.b32.xlu1 %v265_v26, %s3509_s30  ;;  %266 = vrot.lane.b32.xlu0 %v263_v27, %s3509_s30  ;;  %v323_v39 = vsel %vm303_vm1, %v321_v34, %v322_v32  ;;  %v343_v40 = vrot.slane %v337_v35, 4  ;;  %v345_v41 = vrot.slane %v338_v36, 4  ;;  %v342_v42 = vrot.slane %v336_v37, 4  ;;  %v3703_v26 = vld [vmem:[%s3621_s27 + $0x20] sm:$0xff]  ;;  %s3073_s24 = sld [smem:[#allocation2 + $0x1a]] }
  0x4d   : > { %v381_v47 = vmul.f32 %v379_v45, %v3627_v2  ;;  %v380_v48 = vmul.f32 %v379_v45, %v3624_v1  ;;  %v426_v50 = vmul.f32 %v424_v46, %v3627_v2  ;;  %v427_v51 = vmul.f32 %v424_v46, %v3630_v4  ;;  %s3078_s25 = sld [smem:[#allocation2 + $0x1c]] }
  0x4e   : > { %v346_v43 = vsel %vm303_vm1, %v343_v40, %v345_v41  ;;  %v344_v44 = vsel %vm303_vm1, %v342_v42, %v343_v40  ;;  %v425_v52 = vmul.f32 %v424_v46, %v3624_v1  ;;  %v445_v53 = vstv %s3055_s7  ;;  %s3081_s26 = sld [smem:[#allocation2 + $0x1f]] }
  0x4f   : > { %v395_v54 = vmul.f32 %v393_v49, %v3627_v2  ;;  %v394_v55 = vmul.f32 %v393_v49, %v3624_v1  ;;  %v447_v56 = vmul.f32 %v445_v53, %v3627_v2  ;;  %v448_v57 = vmul.f32 %v445_v53, %v3630_v4  ;;  %s3079_s28 = sld [smem:[#allocation2 + $0x1d]] }
  0x50   : > { %289 = vrot.lane.b32.xlu1 %v286_v30, %s3508_s29  ;;  %287 = vrot.lane.b32.xlu0 %v284_v31, %s3508_s29  ;;  %v483_v58 = vstv %s3057_s8  ;;  %v432_v59 = vrot.slane %v426_v50, 2  ;;  %v434_v60 = vrot.slane %v427_v51, 2  ;;  %v431_v61 = vrot.slane %v425_v52, 2  ;;  %s3082_s4 = sld [smem:[#allocation2 + $0x20]] }
  0x51   : > { %v446_v62 = vmul.f32 %v445_v53, %v3624_v1  ;;  %v485_v63 = vmul.f32 %v483_v58, %v3627_v2  ;;  %v453_v0 = vrot.slane %v447_v56, 2  ;;  %v455_v3 = vrot.slane %v448_v57, 2  ;;  %s3084_s5 = sld [smem:[#allocation2 + $0x22]] }
  0x52   : > { %v486_v5 = vmul.f32 %v483_v58, %v3630_v4  ;;  %v484_v6 = vmul.f32 %v483_v58, %v3624_v1  ;;  %v435_v7 = vsel %vm243_vm0, %v432_v59, %v434_v60  ;;  %v433_v8 = vsel %vm243_vm0, %v431_v61, %v432_v59  ;;  %s3085_s6 = sld [smem:[#allocation2 + $0x23]] }
  0x53   : > { %v452_v9 = vrot.slane %v446_v62, 2  ;;  %v504_v10 = vstv %s3058_s9  ;;  %v456_v11 = vsel %vm243_vm0, %v453_v0, %v455_v3  ;;  %v491_v12 = vrot.slane %v485_v63, 4  ;;  %s3093_s7 = sld [smem:[#allocation2 + $0x25]] }
  0x54   : > { %328 = vrot.lane.b32.xlu1 %v325_v38, %s3509_s30  ;;  %326 = vrot.lane.b32.xlu0 %v323_v39, %s3509_s30  ;;  %v493_v13 = vrot.slane %v486_v5, 4  ;;  %v490_v14 = vrot.slane %v484_v6, 4  ;;  %v506_v16 = vmul.f32 %v504_v10, %v3627_v2  ;;  %v507_v17 = vmul.f32 %v504_v10, %v3630_v4  ;;  %s3096_s8 = sld [smem:[#allocation2 + $0x28]] }
  0x55   : > { %v454_v15 = vsel %vm243_vm0, %v452_v9, %v453_v0  ;;  %v505_v18 = vmul.f32 %v504_v10, %v3624_v1  ;;  %v552_v27 = vstv %s3066_s10  ;;  %v597_v30 = vstv %s3069_s11  ;;  %s3097_s9 = sld [smem:[#allocation2 + $0x29]] }
  0x56   : > { %v494_v19 = vsel %vm303_vm1, %v491_v12, %v493_v13  ;;  %v492_v20 = vsel %vm303_vm1, %v490_v14, %v491_v12  ;;  %v512_v21 = vrot.slane %v506_v16, 4  ;;  %v514_v22 = vrot.slane %v507_v17, 4  ;;  %s3094_s10 = sld [smem:[#allocation2 + $0x26]] }
  0x57   : > { %v511_v23 = vrot.slane %v505_v18, 4  ;;  %v554_v31 = vmul.f32 %v3703_v26, %v552_v27  ;;  %v553_v32 = vmul.f32 %v3706_v28, %v552_v27  ;;  %v566_v33 = vstv %s3067_s17  ;;  %s3099_s11 = sld [smem:[#allocation2 + $0x2b]] }
  0x58   : > { %349 = vrot.lane.b32.xlu1 %v346_v43, %s3508_s29  ;;  %347 = vrot.lane.b32.xlu0 %v344_v44, %s3508_s29  ;;  %v515_v24 = vsel %vm303_vm1, %v512_v21, %v514_v22  ;;  %v599_v34 = vmul.f32 %v3703_v26, %v597_v30  ;;  %v600_v35 = vmul.f32 %v3709_v29, %v597_v30  ;;  %v618_v37 = vstv %s3070_s19  ;;  %s3100_s17 = sld [smem:[#allocation2 + $0x2c]] }
  0x59   : > { %v513_v25 = vsel %vm303_vm1, %v511_v23, %v512_v21  ;;  %v598_v36 = vmul.f32 %v3706_v28, %v597_v30  ;;  %v568_v38 = vmul.f32 %v3703_v26, %v566_v33  ;;  %v567_v39 = vmul.f32 %v3706_v28, %v566_v33  ;;  %s3806_s19 = sld [smem:[#allocation2]] }
  0x5a   : > { %v620_v40 = vmul.f32 %v3703_v26, %v618_v37  ;;  %v621_v41 = vmul.f32 %v3709_v29, %v618_v37  ;;  %v619_v42 = vmul.f32 %v3706_v28, %v618_v37  ;;  %v656_v43 = vstv %s3072_s20  ;;  %s3808_s20 = sld [smem:[#allocation5]] }
  0x5b   : > { %v605_v44 = vrot.slane %v599_v34, 2  ;;  %v607_v45 = vrot.slane %v600_v35, 2  ;;  %v604_v46 = vrot.slane %v598_v36, 2  ;;  %v659_v51 = vmul.f32 %v3709_v29, %v656_v43 }
  0x5c   : > { %386 = vrot.lane.b32.xlu1 %v381_v47, %s3509_s30  ;;  %384 = vrot.lane.b32.xlu0 %v380_v48, %s3509_s30  ;;  %v658_v47 = vmul.f32 %v3703_v26, %v656_v43  ;;  %v626_v48 = vrot.slane %v620_v40, 2  ;;  %v628_v49 = vrot.slane %v621_v41, 2  ;;  %v625_v50 = vrot.slane %v619_v42, 2 }
  0x5d   : > { %v608_v52 = vsel %vm243_vm0, %v605_v44, %v607_v45  ;;  %v606_v53 = vsel %vm243_vm0, %v604_v46, %v605_v44  ;;  %v666_v59 = vrot.slane %v659_v51, 4  ;;  %v721_v10 = vstv %s3078_s25  ;;  %s3814_s25 = sld [smem:[#allocation2 + $0x2e]] }
  0x5e   : > { %v629_v56 = vsel %vm243_vm0, %v626_v48, %v628_v49  ;;  %v627_v57 = vsel %vm243_vm0, %v625_v50, %v626_v48  ;;  %v664_v58 = vrot.slane %v658_v47, 4  ;;  %v723_v12 = vmul.f32 %v3703_v26, %v721_v10 }
  0x5f   : > { %v722_v13 = vmul.f32 %v3706_v28, %v721_v10  ;;  %v735_v14 = vstv %s3079_s28  ;;  %v787_v18 = vstv %s3082_s4  ;;  %s3046_s28 = sld [smem:[#allocation2 + $0x6]] }
  0x60   : > { %400 = vrot.lane.b32.xlu1 %v395_v54, %s3508_s29  ;;  %398 = vrot.lane.b32.xlu0 %v394_v55, %s3508_s29  ;;  %v657_v54 = vmul.f32 %v3706_v28, %v656_v43  ;;  %v677_v55 = vstv %s3073_s24  ;;  %v667_v0 = vsel %vm303_vm1, %v664_v58, %v666_v59  ;;  %v789_v21 = vmul.f32 %v3703_v26, %v787_v18  ;;  %s3043_s24 = sld [smem:[#allocation2 + $0x3]] }
  0x61   : > { %v679_v61 = vmul.f32 %v3703_v26, %v677_v55  ;;  %v680_v62 = vmul.f32 %v3709_v29, %v677_v55  ;;  %v678_v63 = vmul.f32 %v3706_v28, %v677_v55  ;;  %v790_v22 = vmul.f32 %v3709_v29, %v787_v18  ;;  %v3784_v55 = vld [vmem:[%s3621_s27 + $0x38] sm:$0xff]  ;;  %s3827_s4 = sld [smem:[#allocation2 + $0x2f]] }
  0x62   : > { %v663_v60 = vrot.slane %v657_v54, 4  ;;  %v788_v23 = vmul.f32 %v3706_v28, %v787_v18  ;;  %v939_v59 = vstv %s3096_s8  ;;  %s3864_s8 = sld [smem:[#allocation2 + $0x35]] }
  0x63   : > { %v685_v5 = vrot.slane %v679_v61, 4  ;;  %v687_v6 = vrot.slane %v680_v62, 4  ;;  %v797_v33 = vrot.slane %v790_v22, 2  ;;  %v960_v62 = vstv %s3097_s9  ;;  %s3873_s9 = sld [smem:[#allocation5 + $0x1]] }
  0x64   : > { %438 = vrot.lane.b32.xlu1 %v435_v7, %s3509_s30  ;;  %436 = vrot.lane.b32.xlu0 %v433_v8, %s3509_s30  ;;  %v665_v3 = vsel %vm303_vm1, %v663_v60, %v664_v58  ;;  %v684_v7 = vrot.slane %v678_v63, 4  ;;  %v794_v34 = vrot.slane %v788_v23, 2  ;;  %v3790_v58 = vld [vmem:[%s3621_s27 + $0x40] sm:$0xf]  ;;  %v908_v63 = vstv %s3094_s10  ;;  %s3880_s10 = sld [smem:[#allocation2 + $0xc]] }
  0x65   : > { %v688_v8 = vsel %vm303_vm1, %v685_v5, %v687_v6  ;;  %v962_v6 = vmul.f32 %v3784_v55, %v960_v62  ;;  %v1019_v23 = vstv %s3100_s17  ;;  %s3890_s17 = sld [smem:[#allocation2 + $0x38]] }
  0x66   : > { %v686_v9 = vsel %vm303_vm1, %v684_v7, %v685_v5  ;;  %v963_v7 = vmul.f32 %v3790_v58, %v960_v62 }
  0x68   : > { %459 = vrot.lane.b32.xlu1 %v456_v11, %s3508_s29  ;;  %457 = vrot.lane.b32.xlu0 %v454_v15, %s3508_s29  ;;  %v766_v11 = vstv %s3081_s26  ;;  %s3108_s26 = sld [smem:[#allocation2 + $0x31]] }
  0x69   : > { %v768_v15 = vmul.f32 %v3703_v26, %v766_v11  ;;  %v769_v16 = vmul.f32 %v3709_v29, %v766_v11  ;;  %v767_v17 = vmul.f32 %v3706_v28, %v766_v11 }
  0x6b   : > { %v776_v27 = vrot.slane %v769_v16, 2  ;;  %v773_v30 = vrot.slane %v767_v17, 2  ;;  %v970_v16 = vrot.slane %v963_v7, 2 }
  0x6c   : > { %497 = vrot.lane.b32.xlu1 %v494_v19, %s3509_s30  ;;  %495 = vrot.lane.b32.xlu0 %v492_v20, %s3509_s30  ;;  %v737_v19 = vmul.f32 %v3703_v26, %v735_v14  ;;  %v736_v20 = vmul.f32 %v3706_v28, %v735_v14  ;;  %v998_v14 = vstv %s3099_s11  ;;  %s3887_s11 = sld [smem:[#allocation2 + $0x37]] }
  0x6d   : > { %v1000_v18 = vmul.f32 %v3784_v55, %v998_v14 }
  0x70   : > { %518 = vrot.lane.b32.xlu1 %v515_v24, %s3508_s29  ;;  %516 = vrot.lane.b32.xlu0 %v513_v25, %s3508_s29  ;;  %v825_v24 = vstv %s3084_s5  ;;  %v774_v25 = vrot.slane %v768_v15, 2  ;;  %v968_v15 = vrot.slane %v962_v6, 2  ;;  %s3830_s5 = sld [smem:[#allocation2 + $0x32]] }
  0x71   : > { %v828_v35 = vmul.f32 %v3709_v29, %v825_v24 }
  0x72   : > { %v777_v36 = vsel %vm243_vm0, %v774_v25, %v776_v27  ;;  %v775_v37 = vsel %vm243_vm0, %v773_v30, %v774_v25  ;;  %v1006_v27 = vrot.slane %v1000_v18, 4 }
  0x73   : > { %v835_v43 = vrot.slane %v828_v35, 4 }
  0x74   : > { %559 = vrot.lane.b32.xlu1 %v554_v31, %s3509_s30  ;;  %557 = vrot.lane.b32.xlu0 %v553_v32, %s3509_s30  ;;  %v827_v31 = vmul.f32 %v3703_v26, %v825_v24  ;;  %v795_v32 = vrot.slane %v789_v21, 2 }
  0x76   : > { %v798_v40 = vsel %vm243_vm0, %v795_v32, %v797_v33  ;;  %v796_v41 = vsel %vm243_vm0, %v794_v34, %v795_v32  ;;  %v833_v42 = vrot.slane %v827_v31, 4  ;;  %v201_v31 = vstv %s3806_s19  ;;  %s3895_s19 = sld [smem:[#allocation2 + $0x3a]] }
  0x77   : > { %v1021_v33 = vmul.f32 %v3784_v55, %v1019_v23  ;;  %v1022_v34 = vmul.f32 %v3790_v58, %v1019_v23 }
  0x78   : > { %573 = vrot.lane.b32.xlu1 %v568_v38, %s3508_s29  ;;  %571 = vrot.lane.b32.xlu0 %v567_v39, %s3508_s29  ;;  %v826_v38 = vmul.f32 %v3706_v28, %v825_v24  ;;  %v846_v39 = vstv %s3085_s6  ;;  %v836_v48 = vsel %vm303_vm1, %v833_v42, %v835_v43  ;;  %v971_v24 = vsel %vm243_vm0, %v968_v15, %v970_v16  ;;  %s3842_s6 = sld [smem:[#allocation2 + $0x34]] }
  0x79   : > { %v848_v45 = vmul.f32 %v3703_v26, %v846_v39  ;;  %v849_v46 = vmul.f32 %v3709_v29, %v846_v39  ;;  %v847_v47 = vmul.f32 %v3706_v28, %v846_v39  ;;  %v204_v39 = vstv %s3808_s20  ;;  %s3903_s20 = sld [smem:[#allocation2 + $0xf]] }
  0x7a   : > { %v832_v44 = vrot.slane %v826_v38, 4  ;;  %v1027_v43 = vrot.slane %v1021_v33, 4 }
  0x7b   : > { %v854_v50 = vrot.slane %v848_v45, 4  ;;  %v856_v51 = vrot.slane %v849_v46, 4 }
  0x7c   : > { %611 = vrot.lane.b32.xlu1 %v608_v52, %s3509_s30  ;;  %609 = vrot.lane.b32.xlu0 %v606_v53, %s3509_s30  ;;  %v834_v49 = vsel %vm303_vm1, %v832_v44, %v833_v42  ;;  %v853_v52 = vrot.slane %v847_v47, 4  ;;  %v1029_v44 = vrot.slane %v1022_v34, 4 }
  0x7d   : > { %v857_v53 = vsel %vm303_vm1, %v854_v50, %v856_v51 }
  0x7e   : > { %v855_v54 = vsel %vm303_vm1, %v853_v52, %v854_v50  ;;  %v1108_v52 = vstv %s3108_s26  ;;  %s3947_s26 = sld [smem:[#allocation2 + $0x12]] }
  0x7f   : > { %v1110_v6 = vmul.f32 %v3784_v55, %v1108_v52  ;;  %v1111_v7 = vmul.f32 %v3790_v58, %v1108_v52 }
  0x80   : > { %632 = vrot.lane.b32.xlu1 %v629_v56, %s3508_s29  ;;  %630 = vrot.lane.b32.xlu0 %v627_v57, %s3508_s29  ;;  %v894_v56 = vstv %s3093_s7  ;;  %v3787_v57 = vld [vmem:[%s3621_s27 + $0x30] sm:$0xff]  ;;  %s3854_s7 = sld [smem:[#allocation2 + $0x9]] }
  0x81   : > { %v896_v60 = vmul.f32 %v3784_v55, %v894_v56  ;;  %v895_v61 = vmul.f32 %v3787_v57, %v894_v56  ;;  %v940_v5 = vmul.f32 %v3787_v57, %v939_v59  ;;  %v961_v10 = vmul.f32 %v3787_v57, %v960_v62 }
  0x82   : > { %v999_v22 = vmul.f32 %v3787_v57, %v998_v14  ;;  %v1020_v35 = vmul.f32 %v3787_v57, %v1019_v23  ;;  %v1116_v23 = vrot.slane %v1110_v6, 2 }
  0x83   : > { %v967_v17 = vrot.slane %v961_v10, 2 }
  0x84   : > { %670 = vrot.lane.b32.xlu1 %v667_v0, %s3509_s30  ;;  %668 = vrot.lane.b32.xlu0 %v665_v3, %s3509_s30  ;;  %v941_v0 = vmul.f32 %v3784_v55, %v939_v59  ;;  %v942_v3 = vmul.f32 %v3790_v58, %v939_v59  ;;  %v1005_v32 = vrot.slane %v999_v22, 4  ;;  %v1026_v45 = vrot.slane %v1020_v35, 4 }
  0x85   : > { %v969_v25 = vsel %vm243_vm0, %v967_v17, %v968_v15  ;;  %v296_v59 = vstv %s3046_s28  ;;  %s3953_s28 = sld [smem:[#allocation5 + $0x2]] }
  0x86   : > { %v947_v11 = vrot.slane %v941_v0, 2  ;;  %v1007_v42 = vsel %vm303_vm1, %v1005_v32, %v1006_v27  ;;  %v298_v10 = vmul.f32 %v296_v59, %v3627_v2 }
  0x88   : > { %691 = vrot.lane.b32.xlu1 %v688_v8, %s3508_s29  ;;  %689 = vrot.lane.b32.xlu0 %v686_v9, %s3508_s29  ;;  %v910_v8 = vmul.f32 %v3784_v55, %v908_v63  ;;  %v909_v9 = vmul.f32 %v3787_v57, %v908_v63 }
  0x8c   : > { %728 = vrot.lane.b32.xlu1 %v723_v12, %s3509_s30  ;;  %726 = vrot.lane.b32.xlu0 %v722_v13, %s3509_s30  ;;  %v949_v12 = vrot.slane %v942_v3, 2  ;;  %v946_v13 = vrot.slane %v940_v5, 2  ;;  %v1077_v3 = vstv %s3827_s4  ;;  %s3960_s4 = sld [smem:[#allocation2 + $0x3e]] }
  0x8e   : > { %v948_v21 = vsel %vm243_vm0, %v946_v13, %v947_v11  ;;  %v1078_v13 = vmul.f32 %v3787_v57, %v1077_v3 }
  0x90   : > { %742 = vrot.lane.b32.xlu1 %v737_v19, %s3508_s29  ;;  %740 = vrot.lane.b32.xlu0 %v736_v20, %s3508_s29  ;;  %v1001_v19 = vmul.f32 %v3790_v58, %v998_v14  ;;  %v950_v20 = vsel %vm243_vm0, %v947_v11, %v949_v12  ;;  %v299_v11 = vmul.f32 %v296_v59, %v3630_v4 }
  0x91   : > { %v1079_v12 = vmul.f32 %v3784_v55, %v1077_v3  ;;  %v297_v14 = vmul.f32 %v296_v59, %v3624_v1  ;;  %v375_v3 = vstv %s3873_s9  ;;  %s3992_s9 = sld [smem:[#allocation2 + $0x43]] }
  0x92   : > { %v1008_v30 = vrot.slane %v1001_v19, 4 }
  0x93   : > { %v304_v33 = vrot.slane %v297_v14, 4  ;;  %v3912_v14 = vld [vmem:[%s3621_s27 + $0x50] sm:$0xff] }
  0x94   : > { %780 = vrot.lane.b32.xlu1 %v777_v36, %s3509_s30  ;;  %778 = vrot.lane.b32.xlu0 %v775_v37, %s3509_s30  ;;  %v202_v36 = vmul.f32 %v201_v31, %v3624_v1  ;;  %v236_v37 = vstv %s3043_s24  ;;  %v1009_v38 = vsel %vm303_vm1, %v1006_v27, %v1008_v30  ;;  %v305_v30 = vrot.slane %v298_v10, 4  ;;  %s3907_s24 = sld [smem:[#allocation2 + $0x3b]] }
  0x95   : > { %v238_v46 = vmul.f32 %v236_v37, %v3627_v2  ;;  %v239_v47 = vmul.f32 %v236_v37, %v3630_v4 }
  0x97   : > { %v245_v62 = vrot.slane %v238_v46, 2  ;;  %v247_v63 = vrot.slane %v239_v47, 2 }
  0x98   : > { %801 = vrot.lane.b32.xlu1 %v798_v40, %s3508_s29  ;;  %799 = vrot.lane.b32.xlu0 %v796_v41, %s3508_s29  ;;  %v203_v40 = vmul.f32 %v201_v31, %v3627_v2  ;;  %v1063_v41 = vstv %s3814_s25  ;;  %v307_v31 = vrot.slane %v299_v11, 4  ;;  %s3935_s25 = sld [smem:[#allocation2 + $0x3d]] }
  0x99   : > { %v1065_v51 = vmul.f32 %v3784_v55, %v1063_v41  ;;  %v1064_v56 = vmul.f32 %v3787_v57, %v1063_v41  ;;  %v248_v17 = vsel %vm243_vm0, %v245_v62, %v247_v63 }
  0x9a   : > { %v206_v50 = vadd.f32 %v204_v39, %v203_v40  ;;  %v308_v47 = vsel %vm303_vm1, %v305_v30, %v307_v31 }
  0x9c   : > { %839 = vrot.lane.b32.xlu1 %v836_v48, %s3509_s30  ;;  %837 = vrot.lane.b32.xlu0 %v834_v49, %s3509_s30  ;;  %v237_v48 = vmul.f32 %v236_v37, %v3624_v1  ;;  %v205_v49 = vadd.f32 %v204_v39, %v202_v36 }
  0x9e   : > { %v244_v0 = vrot.slane %v237_v48, 2 }
  0xa0   : > { %860 = vrot.lane.b32.xlu1 %v857_v53, %s3508_s29  ;;  %858 = vrot.lane.b32.xlu0 %v855_v54, %s3508_s29  ;;  %v1030_v53 = vsel %vm303_vm1, %v1027_v43, %v1029_v44  ;;  %v1028_v54 = vsel %vm303_vm1, %v1026_v45, %v1027_v43  ;;  %v246_v18 = vsel %vm243_vm0, %v244_v0, %v245_v62  ;;  %v372_v44 = vstv %s3854_s7  ;;  %s3988_s7 = sld [smem:[#allocation2 + $0x41]] }
  0xa1   : > { %v373_v11 = vmul.f32 %v372_v44, %v3624_v1 }
  0xa4   : > { %901 = vrot.lane.b32.xlu1 %v896_v60, %s3509_s30  ;;  %899 = vrot.lane.b32.xlu0 %v895_v61, %s3509_s30 }
  0xa8   : > { %915 = vrot.lane.b32.xlu1 %v910_v8, %s3508_s29  ;;  %913 = vrot.lane.b32.xlu0 %v909_v9, %s3508_s29  ;;  %v1129_v8 = vstv %s3830_s5  ;;  %v1109_v9 = vmul.f32 %v3787_v57, %v1108_v52  ;;  %s3969_s5 = sld [smem:[#allocation2 + $0x15]] }
  0xa9   : > { %v1131_v19 = vmul.f32 %v3784_v55, %v1129_v8  ;;  %v1130_v34 = vmul.f32 %v3787_v57, %v1129_v8 }
  0xaa   : > { %v1115_v27 = vrot.slane %v1109_v9, 2 }
  0xab   : > { %v1137_v37 = vrot.slane %v1131_v19, 2  ;;  %v1236_v19 = vstv %s3887_s11 }
  0xac   : > { %953 = vrot.lane.b32.xlu1 %v950_v20, %s3509_s30  ;;  %951 = vrot.lane.b32.xlu0 %v948_v21, %s3509_s30  ;;  %v1132_v20 = vmul.f32 %v3790_v58, %v1129_v8  ;;  %v1117_v46 = vsel %vm243_vm0, %v1115_v27, %v1116_v23 }
  0xb0   : > { %974 = vrot.lane.b32.xlu1 %v971_v24, %s3508_s29  ;;  %972 = vrot.lane.b32.xlu0 %v969_v25, %s3508_s29  ;;  %v1167_v24 = vstv %s3842_s6  ;;  %v1118_v25 = vrot.slane %v1111_v7, 2  ;;  %s3975_s6 = sld [smem:[#allocation2 + $0x40]] }
  0xb1   : > { %v1169_v39 = vmul.f32 %v3784_v55, %v1167_v24  ;;  %v1170_v40 = vmul.f32 %v3790_v58, %v1167_v24  ;;  %v1168_v43 = vmul.f32 %v3787_v57, %v1167_v24  ;;  %v1250_v24 = vstv %s3890_s17  ;;  %s4017_s17 = sld [smem:[#allocation2 + $0x44]] }
  0xb2   : > { %v1119_v45 = vsel %vm243_vm0, %v1116_v23, %v1118_v25  ;;  %v376_v23 = vadd.f32 %v375_v3, %v373_v11  ;;  %v1340_v11 = vstv %s3935_s25  ;;  %s4066_s25 = sld [smem:[#allocation2 + $0x47]] }
  0xb3   : > { %v1175_v59 = vrot.slane %v1169_v39, 4  ;;  %v1177_v63 = vrot.slane %v1170_v40, 4  ;;  %v1174_v0 = vrot.slane %v1168_v43, 4 }
  0xb4   : > { %1012 = vrot.lane.b32.xlu1 %v1009_v38, %s3509_s30  ;;  %1010 = vrot.lane.b32.xlu0 %v1007_v42, %s3509_s30  ;;  %v1139_v38 = vrot.slane %v1132_v20, 2  ;;  %v3919_v20 = vld [vmem:[%s3621_s27 + $0x48] sm:$0xff] }
  0xb6   : > { %v228_v60 = vpop.permute.xlu1 %227  ;;  %v214_v61 = vpop.permute.xlu0 %213 }
  0xb7   : > { %v219_v5 = vadd.f32 %v214_v61, %v205_v49 }
  0xb8   : > { %1033 = vrot.lane.b32.xlu1 %v1030_v53, %s3508_s29  ;;  %1031 = vrot.lane.b32.xlu0 %v1028_v54, %s3508_s29  ;;  %v306_v54 = vsel %vm303_vm1, %v304_v33, %v305_v30  ;;  %v1281_v33 = vstv %s3895_s19  ;;  %s4021_s19 = sld [smem:[#allocation2 + $0x46]] }
  0xb9   : > { %v233_v21 = vadd.f32 %v228_v60, %v219_v5  ;;  %v374_v60 = vmul.f32 %v372_v44, %v3627_v2 }
  0xba   : > { %v230_v15 = vpop.permute.xlu1 %229  ;;  %v216_v16 = vpop.permute.xlu0 %215 }
  0xbb   : > { %v220_v22 = vadd.f32 %v216_v16, %v206_v50  ;;  %v251_v42 = vadd.f32 %v246_v18, %v233_v21  ;;  %v1136_v50 = vrot.slane %v1130_v34, 2 }
  0xbc   : > { %1070 = vrot.lane.b32.xlu1 %v1065_v51, %s3509_s30  ;;  %1068 = vrot.lane.b32.xlu0 %v1064_v56, %s3509_s30  ;;  %v1188_v51 = vstv %s3864_s8  ;;  %v1140_v56 = vsel %vm243_vm0, %v1137_v37, %v1139_v38  ;;  %v3933_v38 = vld [vmem:[%s3621_s27 + $0x58] sm:$0xf]  ;;  %s188_s8 = sand.u32 1, %s3496_s13  }
  0xbd   : > { %v234_v32 = vadd.f32 %v230_v15, %v220_v22  ;;  %v1190_v5 = vmul.f32 %v3784_v55, %v1188_v51  ;;  %v1191_v6 = vmul.f32 %v3790_v58, %v1188_v51  ;;  %v1189_v7 = vmul.f32 %v3787_v57, %v1188_v51  ;;  %s4008_s11 = sshll.u32 %s188_s8, 8 }
  0xbe   : > { %v269_v35 = vpop.permute.xlu1 %268  ;;  %v267_v36 = vpop.permute.xlu0 %266  ;;  %v1138_v10 = vsel %vm243_vm0, %v1136_v50, %v1137_v37  ;;  %v1178_v55 = vsel %vm303_vm1, %v1175_v59, %v1177_v63  ;;  %v1176_v58 = vsel %vm303_vm1, %v1174_v0, %v1175_v59  ;;  %v377_v57 = vadd.f32 %v375_v3, %v374_v60 }
  0xbf   : > { %v252_v41 = vadd.f32 %v248_v17, %v234_v32  ;;  %v272_v49 = vadd.f32 %v267_v36, %v251_v42  ;;  %v407_v15 = vstv %s3880_s10  ;;  %v1196_v16 = vrot.slane %v1190_v5, 4  ;;  %s4004_s10 = sld [smem:[#allocation2 + $0x18]] }
  0xc0   : > { %1084 = vrot.lane.b32.xlu1 %v1079_v12, %s3508_s29  ;;  %1082 = vrot.lane.b32.xlu0 %v1078_v13, %s3508_s29  ;;  %v1198_v17 = vrot.slane %v1191_v6, 4  ;;  %v1195_v18 = vrot.slane %v1189_v7, 4  ;;  %v409_v30 = vmul.f32 %v407_v15, %v3627_v2  ;;  %v410_v31 = vmul.f32 %v407_v15, %v3630_v4 }
  0xc1   : > { %v273_v48 = vadd.f32 %v269_v35, %v252_v41  ;;  %v408_v32 = vmul.f32 %v407_v15, %v3624_v1  ;;  %v1238_v36 = vmul.f32 %v3912_v14, %v1236_v19  ;;  %v1237_v37 = vmul.f32 %v3919_v20, %v1236_v19 }
  0xc2   : > { %v290_v52 = vpop.permute.xlu1 %289  ;;  %v288_v53 = vpop.permute.xlu0 %287  ;;  %v1199_v39 = vsel %vm303_vm1, %v1196_v16, %v1198_v17  ;;  %v1197_v40 = vsel %vm303_vm1, %v1195_v18, %v1196_v16  ;;  %v1252_v41 = vmul.f32 %v3912_v14, %v1250_v24  ;;  %v466_v42 = vstv %s3903_s20  ;;  %s4030_s20 = scalar_lea.vmem [#allocation7], %s4008_s11  ;;  %s4170_s11 = sld [smem:[#allocation2 + $0x24]] }
  0xc3   : > { %v294_v61 = vadd.f32 %v290_v52, %v273_v48  ;;  %v293_v62 = vadd.f32 %v288_v53, %v272_v49  ;;  %v415_v49 = vrot.slane %v409_v30, 2  ;;  %v417_v50 = vrot.slane %v410_v31, 2 }
  0xc4   : > { %1122 = vrot.lane.b32.xlu1 %v1119_v45, %s3509_s30  ;;  %1120 = vrot.lane.b32.xlu0 %v1117_v46, %s3509_s30  ;;  %v1283_v45 = vmul.f32 %v3912_v14, %v1281_v33  ;;  %v1302_v46 = vstv %s3907_s24  ;;  %v414_v51 = vrot.slane %v408_v32, 2  ;;  %v1284_v52 = vmul.f32 %v3933_v38, %v1281_v33  ;;  %s4056_s24 = sld [smem:[#allocation2 + $0x1b]] }
  0xc5   : > { %v312_v8 = vadd.f32 %v308_v47, %v294_v61  ;;  %v311_v9 = vadd.f32 %v306_v54, %v293_v62  ;;  %v1251_v53 = vmul.f32 %v3919_v20, %v1250_v24  ;;  %v1282_v54 = vmul.f32 %v3919_v20, %v1281_v33 }
  0xc6   : > { %v329_v12 = vpop.permute.xlu1 %328  ;;  %v327_v13 = vpop.permute.xlu0 %326  ;;  %v469_v59 = vmul.f32 %v466_v42, %v3630_v4  ;;  %v467_v60 = vmul.f32 %v466_v42, %v3624_v1  ;;  %v1304_v61 = vmul.f32 %v3912_v14, %v1302_v46  ;;  %v1289_v0 = vrot.slane %v1283_v45, 2 }
  0xc7   : > { %v333_v21 = vadd.f32 %v329_v12, %v312_v8  ;;  %v332_v22 = vadd.f32 %v327_v13, %v311_v9  ;;  %v418_v6 = vsel %vm243_vm0, %v415_v49, %v417_v50  ;;  %v416_v7 = vsel %vm243_vm0, %v414_v51, %v415_v49 }
  0xc8   : > { %1143 = vrot.lane.b32.xlu1 %v1140_v56, %s3508_s29  ;;  %1141 = vrot.lane.b32.xlu0 %v1138_v10, %s3508_s29  ;;  %v468_v56 = vmul.f32 %v466_v42, %v3627_v2  ;;  %v1305_v2 = vmul.f32 %v3933_v38, %v1302_v46  ;;  %v1291_v8 = vrot.slane %v1284_v52, 2  ;;  %v1303_v1 = vmul.f32 %v3919_v20, %v1302_v46 }
  0xc9   : > { %v1288_v10 = vrot.slane %v1282_v54, 2  ;;  %v476_v13 = vrot.slane %v469_v59, 4  ;;  %v545_v17 = vstv %s3947_s26  ;;  %v1341_v24 = vmul.f32 %v3919_v20, %v1340_v11  ;;  %s4075_s26 = sld [smem:[#allocation2 + $0x1e]] }
  0xca   : > { %v350_v25 = vpop.permute.xlu1 %349  ;;  %v348_v27 = vpop.permute.xlu0 %347  ;;  %v474_v12 = vrot.slane %v468_v56, 4  ;;  %v1312_v16 = vrot.slane %v1305_v2, 2  ;;  %v548_v30 = vstv %s3953_s28  ;;  %v547_v32 = vmul.f32 %v3703_v26, %v545_v17  ;;  %s4079_s28 = sld [smem:[#allocation5 + $0x3]] }
  0xcb   : > { %v3926_v34 = vadd.f32 %v350_v25, %v333_v21  ;;  %v3928_v35 = vadd.f32 %v348_v27, %v332_v22  ;;  %v1309_v21 = vrot.slane %v1303_v1, 2  ;;  %v1342_v22 = vmul.f32 %v3912_v14, %v1340_v11 }
  0xcc   : > { %1181 = vrot.lane.b32.xlu1 %v1178_v55, %s3509_s30  ;;  %1179 = vrot.lane.b32.xlu0 %v1176_v58, %s3509_s30  ;;  %v473_v55 = vrot.slane %v467_v60, 4  ;;  %v1310_v58 = vrot.slane %v1304_v61, 2  ;;  %v1292_v25 = vsel %vm243_vm0, %v1289_v0, %v1291_v8  ;;  %v1290_v27 = vsel %vm243_vm0, %v1288_v10, %v1289_v0 }
  0xcd   : > { %v358_v43 = vmul.f32 0.70710677, %v3926_v34  ;;  %v357_v44 = vmul.f32 0.70710677, %v3928_v35  ;;  %v477_v31 = vsel %vm303_vm1, %v474_v12, %v476_v13  ;;  %v546_v33 = vmul.f32 %v3706_v28, %v545_v17 }
  0xce   : > { %v387_v47 = vpop.permute.xlu1 %386  ;;  %v385_v48 = vpop.permute.xlu0 %384  ;;  %v1313_v42 = vsel %vm243_vm0, %v1310_v58, %v1312_v16  ;;  %v1348_v45 = vrot.slane %v1342_v22, 4  ;;  %v580_v59 = vstv %s3969_s5  ;;  %v356_v61 = vmul.f32 0.5, %v3926_v34  ;;  %s4103_s5 = sld [smem:[#allocation2 + $0x4a]] }
  0xcf   : > { %3321 = verf.f32 %v358_v43  ;;  %v391_v62 = vadd.f32 %v387_v47, %v377_v57  ;;  %v390_v63 = vadd.f32 %v385_v48, %v376_v23  ;;  %v1343_v23 = vmul.f32 %v3933_v38, %v1340_v11 }
  0xd0   : > { %3323 = verf.f32 %v357_v44  ;;  %1202 = vrot.lane.b32.xlu1 %v1199_v39, %s3508_s29  ;;  %1200 = vrot.lane.b32.xlu0 %v1197_v40, %s3508_s29  ;;  %v475_v40 = vsel %vm303_vm1, %v473_v55, %v474_v12  ;;  %v1311_v44 = vsel %vm243_vm0, %v1309_v21, %v1310_v58  ;;  %v1347_v47 = vrot.slane %v1341_v24, 4 }
  0xd1   : > { %v1350_v46 = vrot.slane %v1343_v23, 4  ;;  %v4000_v54 = vadd.f32 %v548_v30, %v546_v33  ;;  %v355_v2 = vmul.f32 0.5, %v3928_v35  ;;  %v1405_v8 = vstv %s3975_s6  ;;  %s4107_s6 = sld [smem:[#allocation2 + $0x4c]] }
  0xd2   : > { %v401_v3 = vpop.permute.xlu1 %400  ;;  %v399_v5 = vpop.permute.xlu0 %398  ;;  %v583_v10 = vmul.f32 %v3709_v29, %v580_v59  ;;  %v581_v16 = vmul.f32 %v3706_v28, %v580_v59  ;;  %v1407_v21 = vmul.f32 %v3912_v14, %v1405_v8  ;;  %v1419_v22 = vstv %s3988_s7  ;;  %s4115_s7 = sld [smem:[#allocation2 + $0x21]] }
  0xd3   : > { %v405_v4 = vadd.f32 %v401_v3, %v391_v62  ;;  %v404_v9 = vadd.f32 %v399_v5, %v390_v63  ;;  %v1450_v23 = vstv %s3992_s9  ;;  %s4126_s9 = sld [smem:[#allocation2 + $0x4d]] }
  0xd4   : > { %1243 = vrot.lane.b32.xlu1 %v1238_v36, %s3509_s30  ;;  %1241 = vrot.lane.b32.xlu0 %v1237_v37, %s3509_s30  ;;  %v1361_v36 = vstv %s3960_s4  ;;  %s4085_s4 = sld [smem:[#allocation2 + $0x49]] }
  0xd5   : > { %v422_v57 = vadd.f32 %v418_v6, %v405_v4  ;;  %v421_v15 = vadd.f32 %v416_v7, %v404_v9  ;;  %v1363_v50 = vmul.f32 %v3912_v14, %v1361_v36  ;;  %v1364_v51 = vmul.f32 %v3933_v38, %v1361_v36 }
  0xd6   : > { %v439_v18 = vpop.permute.xlu1 %438  ;;  %v437_v19 = vpop.permute.xlu0 %436  ;;  %v1362_v56 = vmul.f32 %v3919_v20, %v1361_v36  ;;  %v1351_v7 = vsel %vm303_vm1, %v1348_v45, %v1350_v46  ;;  %v1349_v4 = vsel %vm303_vm1, %v1347_v47, %v1348_v45  ;;  %v582_v9 = vmul.f32 %v3703_v26, %v580_v59 }
  0xd7   : > { %v443_v37 = vadd.f32 %v439_v18, %v422_v57  ;;  %v442_v39 = vadd.f32 %v437_v19, %v421_v15  ;;  %v1369_v12 = vrot.slane %v1363_v50, 4  ;;  %v1371_v13 = vrot.slane %v1364_v51, 4 }
  0xd8   : > { %1257 = vrot.lane.b32.xlu1 %v1252_v41, %s3508_s29  ;;  %1255 = vrot.lane.b32.xlu0 %v1251_v53, %s3508_s29  ;;  %v3998_v53 = vadd.f32 %v548_v30, %v547_v32  ;;  %v1368_v55 = vrot.slane %v1362_v56, 4  ;;  %v639_v32 = vstv %s4004_s10  ;;  %v1451_v45 = vmul.f32 %v3919_v20, %v1450_v23  ;;  %s4131_s10 = sld [smem:[#allocation2 + $0x4f]] }
  0xd9   : > { %v641_v47 = vmul.f32 %v3703_v26, %v639_v32  ;;  %v640_v50 = vmul.f32 %v3706_v28, %v639_v32  ;;  %v1509_v51 = vstv %s4021_s19  ;;  %s4189_s19 = sld [smem:[#allocation5 + $0x4]] }
  0xda   : > { %v460_v43 = vpop.permute.xlu1 %459  ;;  %v458_v41 = vpop.permute.xlu0 %457  ;;  %v1370_v30 = vsel %vm303_vm1, %v1368_v55, %v1369_v12 }
  0xdb   : > { %v464_v48 = vadd.f32 %v460_v43, %v443_v37  ;;  %v463_v49 = vadd.f32 %v458_v41, %v442_v39  ;;  %v587_v37 = vrot.slane %v581_v16, 2  ;;  %v1452_v39 = vmul.f32 %v3912_v14, %v1450_v23 }
  0xdc   : > { %v3322_v52 = vpop.eup %3321  ;;  %1295 = vrot.lane.b32.xlu1 %v1292_v25, %s3509_s30  ;;  %1293 = vrot.lane.b32.xlu0 %v1290_v27, %s3509_s30  ;;  %v588_v25 = vrot.slane %v582_v9, 2  ;;  %v590_v27 = vrot.slane %v583_v10, 2  ;;  %v1421_v43 = vmul.f32 %v3912_v14, %v1419_v22  ;;  %v1420_v41 = vmul.f32 %v3919_v20, %v1419_v22 }
  0xdd   : > { %v3324_v60 = vpop.eup %3323  ;;  %v362_v62 = vadd.f32 1.0, %v3322_v52  ;;  %v481_v63 = vadd.f32 %v477_v31, %v464_v48  ;;  %v480_v0 = vadd.f32 %v475_v40, %v463_v49  ;;  %v1406_v31 = vmul.f32 %v3919_v20, %v1405_v8 }
  0xde   : > { %v361_v3 = vadd.f32 1.0, %v3324_v60  ;;  %v498_v5 = vpop.permute.xlu1 %497  ;;  %v496_v6 = vpop.permute.xlu0 %495  ;;  %v591_v46 = vsel %vm243_vm0, %v588_v25, %v590_v27  ;;  %v1471_v48 = vstv %s4017_s17  ;;  %v642_v49 = vmul.f32 %v3709_v29, %v639_v32  ;;  %s4177_s17 = sld [smem:[#allocation2 + $0x50]] }
  0xdf   : > { %v364_v1 = vmul.f32 %v362_v62, %v356_v61  ;;  %v502_v57 = vadd.f32 %v498_v5, %v481_v63  ;;  %v501_v15 = vadd.f32 %v496_v6, %v480_v0  ;;  %v589_v59 = vsel %vm243_vm0, %v587_v37, %v588_v25 }
  0xe0   : > { %v363_v11 = vmul.f32 %v361_v3, %v355_v2  ;;  %1316 = vrot.lane.b32.xlu1 %v1313_v42, %s3508_s29  ;;  %1314 = vrot.lane.b32.xlu0 %v1311_v44, %s3508_s29  ;;  %v1453_v44 = vmul.f32 %v3933_v38, %v1450_v23  ;;  %v1458_v26 = vrot.slane %v1452_v39, 2  ;;  %v1473_v63 = vmul.f32 %v3912_v14, %v1471_v48 }
  0xe1   : > { %v366_v58 = vmul.f32 %v364_v1, %v3926_v34  ;;  %v1474_v0 = vmul.f32 %v3933_v38, %v1471_v48  ;;  %v1472_v29 = vmul.f32 %v3919_v20, %v1471_v48  ;;  %v1457_v3 = vrot.slane %v1451_v45, 2 }
  0xe2   : > { %v365_v17 = vmul.f32 %v363_v11, %v3928_v35  ;;  %v519_v18 = vpop.permute.xlu1 %518  ;;  %v517_v19 = vpop.permute.xlu0 %516  ;;  %v1372_v35 = vsel %vm303_vm1, %v1369_v12, %v1371_v13  ;;  %v1460_v62 = vrot.slane %v1453_v44, 2  ;;  %v647_v5 = vrot.slane %v641_v47, 4 }
  0xe3   : > { %369 = vst.msk [vmem:[%s4030_s20 + $0x8] sm:$0xff] %vm367_vm2, %v366_v58  ;;  %v4034_v34 = vadd.f32 %v519_v18, %v502_v57  ;;  %v4036_v24 = vadd.f32 %v517_v19, %v501_v15  ;;  %v649_v6 = vrot.slane %v642_v49, 4  ;;  %v1479_v11 = vrot.slane %v1473_v63, 2 }
  0xe4   : > { %368 = vst.msk [vmem:[%s4030_s20] sm:$0xff] %vm367_vm2, %v365_v17  ;;  %1354 = vrot.lane.b32.xlu1 %v1351_v7, %s3509_s30  ;;  %1352 = vrot.lane.b32.xlu0 %v1349_v4, %s3509_s30  ;;  %v646_v7 = vrot.slane %v640_v50, 4  ;;  %v1510_v4 = vmul.f32 %v3919_v20, %v1509_v51  ;;  %v1481_v12 = vrot.slane %v1474_v0, 2  ;;  %v1478_v13 = vrot.slane %v1472_v29, 2 }
  0xe5   : > { %v527_v33 = vmul.f32 0.70710677, %v4034_v34  ;;  %v526_v36 = vmul.f32 0.70710677, %v4036_v24  ;;  %v1461_v55 = vsel %vm243_vm0, %v1458_v26, %v1460_v62  ;;  %v714_v15 = vstv %s4056_s24  ;;  %s4191_s24 = sld [smem:[#allocation2 + $0x27]] }
  0xe6   : > { %v560_v40 = vpop.permute.xlu1 %559  ;;  %v558_v42 = vpop.permute.xlu0 %557  ;;  %v1459_v16 = vsel %vm243_vm0, %v1457_v3, %v1458_v26  ;;  %v650_v17 = vsel %vm303_vm1, %v647_v5, %v649_v6  ;;  %v648_v18 = vsel %vm303_vm1, %v646_v7, %v647_v5  ;;  %v1516_v22 = vrot.slane %v1510_v4, 4  ;;  %v4135_v6 = vld [vmem:[%s3621_s27 + $0x68] sm:$0xff]  ;;  %v4138_v7 = vld [vmem:[%s3621_s27 + $0x60] sm:$0xff] }
  0xe7   : > { %3325 = verf.f32 %v527_v33  ;;  %v564_v52 = vadd.f32 %v560_v40, %v3998_v53  ;;  %v563_v56 = vadd.f32 %v558_v42, %v4000_v54  ;;  %v4072_v53 = vmul.f32 %v3912_v14, %v1509_v51  ;;  %v4100_v33 = vld [vmem:[%s3621_s27 + $0x18] sm:$0xff] }
  0xe8   : > { %3327 = verf.f32 %v526_v36  ;;  %1375 = vrot.lane.b32.xlu1 %v1372_v35, %s3508_s29  ;;  %1373 = vrot.lane.b32.xlu0 %v1370_v30, %s3508_s29  ;;  %v1512_v54 = vmul.f32 %v3933_v38, %v1509_v51  ;;  %v1530_v23 = vstv %s4066_s25  ;;  %v1482_v35 = vsel %vm243_vm0, %v1479_v11, %v1481_v12  ;;  %s4193_s25 = sld [smem:[#allocation2 + $0x52]] }
  0xe9   : > { %v1517_v58 = vrot.slane %v4072_v53, 4  ;;  %v1480_v30 = vsel %vm243_vm0, %v1478_v13, %v1479_v11  ;;  %v715_v36 = vmul.f32 %v4100_v33, %v714_v15  ;;  %v749_v42 = vstv %s4075_s26  ;;  %s4201_s26 = sld [smem:[#allocation2 + $0x53]] }
  0xea   : > { %v574_v60 = vpop.permute.xlu1 %573  ;;  %v572_v61 = vpop.permute.xlu0 %571  ;;  %v1519_v57 = vrot.slane %v1512_v54, 4  ;;  %v1532_v44 = vmul.f32 %v3912_v14, %v1530_v23  ;;  %v1533_v45 = vmul.f32 %v3933_v38, %v1530_v23  ;;  %v525_v48 = vmul.f32 0.5, %v4034_v34 }
  0xeb   : > { %v578_v28 = vadd.f32 %v574_v60, %v564_v52  ;;  %v577_v2 = vadd.f32 %v572_v61, %v563_v56  ;;  %v524_v52 = vmul.f32 0.5, %v4036_v24  ;;  %v4121_v60 = vld [vmem:[%s3621_s27 + $0x28] sm:$0xf]  ;;  %v1518_v61 = vsel %vm303_vm1, %v1516_v22, %v1517_v58 }
  0xec   : > { %1412 = vrot.lane.b32.xlu1 %v1407_v21, %s3509_s30  ;;  %1410 = vrot.lane.b32.xlu0 %v1406_v31, %s3509_s30  ;;  %v4096_v31 = vld [vmem:[%s3621_s27 + $0x20] sm:$0xff]  ;;  %v1520_v40 = vsel %vm303_vm1, %v1517_v58, %v1519_v57  ;;  %v1578_v63 = vstv %s4085_s4  ;;  %v1538_v29 = vrot.slane %v1532_v44, 4  ;;  %s4226_s4 = sld [smem:[#allocation2 + $0x2a]] }
  0xed   : > { %v595_v8 = vadd.f32 %v591_v46, %v578_v28  ;;  %v594_v1 = vadd.f32 %v589_v59, %v577_v2  ;;  %v716_v32 = vmul.f32 %v4096_v31, %v714_v15  ;;  %v1531_v46 = vmul.f32 %v3919_v20, %v1530_v23  ;;  %v4156_v15 = vld [vmem:[%s3621_s27 + $0x70] sm:$0xf] }
  0xee   : > { %v612_v9 = vpop.permute.xlu1 %611  ;;  %v610_v10 = vpop.permute.xlu0 %609  ;;  %v751_v14 = vmul.f32 %v4096_v31, %v749_v42  ;;  %v752_v20 = vmul.f32 %v4121_v60, %v749_v42  ;;  %v1540_v28 = vrot.slane %v1533_v45, 4  ;;  %v750_v2 = vmul.f32 %v4100_v33, %v749_v42 }
  0xef   : > { %v616_v19 = vadd.f32 %v612_v9, %v595_v8  ;;  %v615_v21 = vadd.f32 %v610_v10, %v594_v1  ;;  %v1537_v5 = vrot.slane %v1531_v46, 4  ;;  %v1592_v13 = vstv %s4103_s5  ;;  %s4231_s5 = sld [smem:[#allocation2 + $0x56]] }
  0xf0   : > { %1426 = vrot.lane.b32.xlu1 %v1421_v43, %s3508_s29  ;;  %1424 = vrot.lane.b32.xlu0 %v1420_v41, %s3508_s29  ;;  %v717_v41 = vstv %s4079_s28  ;;  %v757_v10 = vrot.slane %v751_v14, 2  ;;  %v759_v11 = vrot.slane %v752_v20, 2  ;;  %v1579_v58 = vmul.f32 %v4138_v7, %v1578_v63  ;;  %s4217_s28 = sld [smem:[#allocation2 + $0x55]] }
  0xf1   : > { %v719_v62 = vadd.f32 %v717_v41, %v716_v32  ;;  %v718_v9 = vadd.f32 %v717_v41, %v715_v36  ;;  %v756_v57 = vrot.slane %v750_v2, 2  ;;  %v1682_v42 = vstv %s4131_s10  ;;  %s4284_s10 = sld [smem:[#allocation5 + $0x5]] }
  0xf2   : > { %v633_v25 = vpop.permute.xlu1 %632  ;;  %v631_v27 = vpop.permute.xlu0 %630 }
  0xf3   : > { %v637_v37 = vadd.f32 %v633_v25, %v616_v19  ;;  %v636_v39 = vadd.f32 %v631_v27, %v615_v21  ;;  %v1541_v19 = vsel %vm303_vm1, %v1538_v29, %v1540_v28  ;;  %v1539_v21 = vsel %vm303_vm1, %v1537_v5, %v1538_v29 }
  0xf4   : > { %v3326_v43 = vpop.eup %3325  ;;  %1464 = vrot.lane.b32.xlu1 %v1461_v55, %s3509_s30  ;;  %1462 = vrot.lane.b32.xlu0 %v1459_v16, %s3509_s30  ;;  %v1623_v55 = vstv %s4107_s6  ;;  %v808_v16 = vstv %s4115_s7  ;;  %v760_v25 = vsel %vm243_vm0, %v757_v10, %v759_v11  ;;  %v1594_v27 = vmul.f32 %v4135_v6, %v1592_v13  ;;  %s4253_s6 = sld [smem:[#allocation2 + $0x58]] }
  0xf5   : > { %v3328_v47 = vpop.eup %3327  ;;  %v531_v49 = vadd.f32 1.0, %v3326_v43  ;;  %v654_v50 = vadd.f32 %v650_v17, %v637_v37  ;;  %v653_v51 = vadd.f32 %v648_v18, %v636_v39  ;;  %v1626_v32 = vmul.f32 %v4156_v15, %v1623_v55  ;;  %s4275_s7 = sld [smem:[#allocation2 + $0x59]] }
  0xf6   : > { %v530_v56 = vadd.f32 1.0, %v3328_v47  ;;  %v671_v59 = vpop.permute.xlu1 %670  ;;  %v669_v26 = vpop.permute.xlu0 %668  ;;  %v1624_v36 = vmul.f32 %v4138_v7, %v1623_v55  ;;  %v1644_v37 = vstv %s4126_s9  ;;  %v758_v39 = vsel %vm243_vm0, %v756_v57, %v757_v10  ;;  %s4279_s9 = sld [smem:[#allocation2 + $0x2d]] }
  0xf7   : > { %v533_v38 = vmul.f32 %v531_v49, %v525_v48  ;;  %v675_v54 = vadd.f32 %v671_v59, %v654_v50  ;;  %v674_v3 = vadd.f32 %v669_v26, %v653_v51  ;;  %v811_v44 = vmul.f32 %v4121_v60, %v808_v16 }
  0xf8   : > { %v532_v0 = vmul.f32 %v530_v56, %v524_v52  ;;  %1485 = vrot.lane.b32.xlu1 %v1482_v35, %s3508_s29  ;;  %1483 = vrot.lane.b32.xlu0 %v1480_v30, %s3508_s29  ;;  %v1593_v35 = vmul.f32 %v4138_v7, %v1592_v13  ;;  %v1625_v30 = vmul.f32 %v4135_v6, %v1623_v55  ;;  %v1630_v26 = vrot.slane %v1624_v36, 2 }
  0xf9   : > { %v535_v53 = vmul.f32 %v533_v38, %v4034_v34  ;;  %v809_v45 = vmul.f32 %v4100_v33, %v808_v16  ;;  %v1646_v49 = vmul.f32 %v4135_v6, %v1644_v37  ;;  %v1647_v50 = vmul.f32 %v4156_v15, %v1644_v37 }
  0xfa   : > { %v534_v8 = vmul.f32 %v532_v0, %v4036_v24  ;;  %v692_v1 = vpop.permute.xlu1 %691  ;;  %v690_v4 = vpop.permute.xlu0 %689  ;;  %v1580_v24 = vmul.f32 %v4135_v6, %v1578_v63  ;;  %v1631_v48 = vrot.slane %v1625_v30, 2  ;;  %v1645_v51 = vmul.f32 %v4138_v7, %v1644_v37 }
  0xfb   : > { %3060 = vst.msk [vmem:[%s4030_s20 + $0x18] sm:$0xff] %vm367_vm2, %v535_v53  ;;  %v4143_v34 = vadd.f32 %v692_v1, %v675_v54  ;;  %v4145_v12 = vadd.f32 %v690_v4, %v674_v3  ;;  %v1684_v56 = vmul.f32 %v4135_v6, %v1682_v42  ;;  %v1685_v59 = vmul.f32 %v4156_v15, %v1682_v42 }
  0xfc   : > { %3059 = vst.msk [vmem:[%s4030_s20 + $0x10] sm:$0xff] %vm367_vm2, %v534_v8  ;;  %1523 = vrot.lane.b32.xlu1 %v1520_v40, %s3509_s30  ;;  %1521 = vrot.lane.b32.xlu0 %v1518_v61, %s3509_s30  ;;  %v810_v40 = vmul.f32 %v4096_v31, %v808_v16  ;;  %v1633_v33 = vrot.slane %v1626_v32, 2  ;;  %v1683_v60 = vmul.f32 %v4138_v7, %v1682_v42  ;;  %v818_v61 = vrot.slane %v811_v44, 4  ;;  %v4208_v16 = vld [vmem:[%s3621_s27 + $0x38] sm:$0xff] }
  0xfd   : > { %v700_v17 = vmul.f32 0.70710677, %v4143_v34  ;;  %v699_v18 = vmul.f32 0.70710677, %v4145_v12  ;;  %v1652_v29 = vrot.slane %v1646_v49, 2  ;;  %v1654_v28 = vrot.slane %v1647_v50, 2 }
  0xfe   : > { %v729_v22 = vpop.permute.xlu1 %728  ;;  %v727_v23 = vpop.permute.xlu0 %726  ;;  %v816_v14 = vrot.slane %v810_v40, 4  ;;  %v1651_v2 = vrot.slane %v1645_v51, 2  ;;  %v1690_v53 = vrot.slane %v1684_v56, 4  ;;  %v1692_v54 = vrot.slane %v1685_v59, 4 }
  0xff   : > { %3329 = verf.f32 %v700_v17  ;;  %v733_v43 = vadd.f32 %v729_v22, %v719_v62  ;;  %v732_v41 = vadd.f32 %v727_v23, %v718_v9  ;;  %v815_v62 = vrot.slane %v809_v45, 4 }
 0x100   : > { %3331 = verf.f32 %v699_v18  ;;  %1544 = vrot.lane.b32.xlu1 %v1541_v19, %s3508_s29  ;;  %1542 = vrot.lane.b32.xlu0 %v1539_v21, %s3508_s29  ;;  %v887_v3 = vstv %s4170_s11  ;;  %v1634_v5 = vsel %vm243_vm0, %v1631_v48, %v1633_v33  ;;  %v1632_v8 = vsel %vm243_vm0, %v1630_v26, %v1631_v48  ;;  %v4212_v18 = vld [vmem:[%s3621_s27 + $0x30] sm:$0xff]  ;;  %s4289_s11 = sld [smem:[#allocation2 + $0x30]] }
 0x101   : > { %v1689_v1 = vrot.slane %v1683_v60, 4  ;;  %v1703_v4 = vstv %s4177_s17  ;;  %v819_v11 = vsel %vm303_vm1, %v816_v14, %v818_v61  ;;  %v817_v13 = vsel %vm303_vm1, %v815_v62, %v816_v14  ;;  %s4295_s17 = sld [smem:[#allocation2 + $0x5b]] }
 0x102   : > { %v743_v46 = vpop.permute.xlu1 %742  ;;  %v741_v47 = vpop.permute.xlu0 %740  ;;  %v1653_v57 = vsel %vm243_vm0, %v1651_v2, %v1652_v29  ;;  %v889_v17 = vmul.f32 %v4208_v16, %v887_v3  ;;  %v888_v19 = vmul.f32 %v4212_v18, %v887_v3  ;;  %v1693_v23 = vsel %vm303_vm1, %v1690_v53, %v1692_v54 }
 0x103   : > { %v747_v52 = vadd.f32 %v743_v46, %v733_v43  ;;  %v746_v31 = vadd.f32 %v741_v47, %v732_v41  ;;  %v890_v30 = vstv %s4189_s19  ;;  %v1706_v32 = vmul.f32 %v4156_v15, %v1703_v4  ;;  %s4308_s19 = sld [smem:[#allocation2 + $0x5c]] }
 0x104   : > { %1585 = vrot.lane.b32.xlu1 %v1580_v24, %s3509_s30  ;;  %1583 = vrot.lane.b32.xlu0 %v1579_v58, %s3509_s30  ;;  %v1655_v58 = vsel %vm243_vm0, %v1652_v29, %v1654_v28  ;;  %v1704_v36 = vmul.f32 %v4138_v7, %v1703_v4  ;;  %v697_v41 = vmul.f32 0.5, %v4145_v12  ;;  %v1747_v47 = vstv %s4193_s25  ;;  %s4319_s25 = sld [smem:[#allocation2 + $0x33]] }
 0x105   : > { %v764_v20 = vadd.f32 %v760_v25, %v747_v52  ;;  %v763_v38 = vadd.f32 %v758_v39, %v746_v31  ;;  %v1705_v25 = vmul.f32 %v4135_v6, %v1703_v4  ;;  %v698_v39 = vmul.f32 0.5, %v4143_v34 }
 0x106   : > { %v781_v63 = vpop.permute.xlu1 %780  ;;  %v779_v0 = vpop.permute.xlu0 %778  ;;  %v922_v48 = vstv %s4191_s24  ;;  %v892_v50 = vadd.f32 %v890_v30, %v889_v17  ;;  %v891_v51 = vadd.f32 %v890_v30, %v888_v19  ;;  %v1713_v56 = vrot.slane %v1706_v32, 4  ;;  %s4316_s24 = sld [smem:[#allocation2 + $0x5e]] }
 0x107   : > { %v785_v9 = vadd.f32 %v781_v63, %v764_v20  ;;  %v784_v10 = vadd.f32 %v779_v0, %v763_v38  ;;  %v1711_v52 = vrot.slane %v1705_v25, 4  ;;  %v1710_v59 = vrot.slane %v1704_v36, 4  ;;  %v4241_v0 = vld [vmem:[%s3621_s27 + $0x40] sm:$0xf] }
 0x108   : > { %1599 = vrot.lane.b32.xlu1 %v1594_v27, %s3508_s29  ;;  %1597 = vrot.lane.b32.xlu0 %v1593_v35, %s3508_s29  ;;  %v1691_v35 = vsel %vm303_vm1, %v1689_v1, %v1690_v53  ;;  %v1761_v33 = vstv %s4201_s26  ;;  %v924_v20 = vmul.f32 %v4208_v16, %v922_v48  ;;  %v1749_v63 = vmul.f32 %v4135_v6, %v1747_v47  ;;  %s4326_s26 = sld [smem:[#allocation2 + $0x5f]] }
 0x109   : > { %v925_v29 = vmul.f32 %v4241_v0, %v922_v48  ;;  %v923_v28 = vmul.f32 %v4212_v18, %v922_v48  ;;  %v1748_v53 = vmul.f32 %v4138_v7, %v1747_v47  ;;  %v1714_v54 = vsel %vm303_vm1, %v1711_v52, %v1713_v56 }
 0x10a   : > { %v802_v55 = vpop.permute.xlu1 %801  ;;  %v800_v24 = vpop.permute.xlu0 %799  ;;  %v1712_v3 = vsel %vm303_vm1, %v1710_v59, %v1711_v52  ;;  %v930_v4 = vrot.slane %v924_v20, 2 }
 0x10b   : > { %v806_v21 = vadd.f32 %v802_v55, %v785_v9  ;;  %v805_v22 = vadd.f32 %v800_v24, %v784_v10  ;;  %v981_v9 = vstv %s4226_s4  ;;  %v929_v55 = vrot.slane %v923_v28, 2  ;;  %s4375_s4 = sld [smem:[#allocation2 + $0x36]] }
 0x10c   : > { %v3330_v27 = vpop.eup %3329  ;;  %1637 = vrot.lane.b32.xlu1 %v1634_v5, %s3509_s30  ;;  %1635 = vrot.lane.b32.xlu0 %v1632_v8, %s3509_s30  ;;  %v1763_v5 = vmul.f32 %v4135_v6, %v1761_v33 }
 0x10d   : > { %v3332_v37 = vpop.eup %3331  ;;  %v704_v40 = vadd.f32 1.0, %v3330_v27  ;;  %v823_v42 = vadd.f32 %v819_v11, %v806_v21  ;;  %v822_v43 = vadd.f32 %v817_v13, %v805_v22  ;;  %v932_v13 = vrot.slane %v925_v29, 2 }
 0x10e   : > { %v703_v44 = vadd.f32 1.0, %v3332_v37  ;;  %v840_v45 = vpop.permute.xlu1 %839  ;;  %v838_v46 = vpop.permute.xlu0 %837  ;;  %v983_v21 = vmul.f32 %v4208_v16, %v981_v9  ;;  %v984_v22 = vmul.f32 %v4241_v0, %v981_v9 }
 0x10f   : > { %v706_v49 = vmul.f32 %v704_v40, %v698_v39  ;;  %v844_v14 = vadd.f32 %v840_v45, %v823_v42  ;;  %v843_v60 = vadd.f32 %v838_v46, %v822_v43  ;;  %v933_v37 = vsel %vm243_vm0, %v930_v4, %v932_v13 }
 0x110   : > { %v705_v31 = vmul.f32 %v703_v44, %v697_v41  ;;  %1658 = vrot.lane.b32.xlu1 %v1655_v58, %s3508_s29  ;;  %1656 = vrot.lane.b32.xlu0 %v1653_v57, %s3508_s29  ;;  %v1813_v58 = vstv %s4231_s5  ;;  %v1762_v57 = vmul.f32 %v4138_v7, %v1761_v33  ;;  %v931_v39 = vsel %vm243_vm0, %v929_v55, %v930_v4  ;;  %s4379_s5 = sld [smem:[#allocation2 + $0x62]] }
 0x111   : > { %v708_v26 = vmul.f32 %v706_v49, %v4143_v34  ;;  %v1816_v30 = vmul.f32 %v4156_v15, %v1813_v58  ;;  %v1814_v42 = vmul.f32 %v4138_v7, %v1813_v58  ;;  %v1851_v45 = vstv %s4253_s6  ;;  %s4385_s6 = sld [smem:[#allocation5 + $0x6]] }
 0x112   : > { %v707_v38 = vmul.f32 %v705_v31, %v4145_v12  ;;  %v861_v61 = vpop.permute.xlu1 %860  ;;  %v859_v62 = vpop.permute.xlu0 %858  ;;  %v1792_v12 = vstv %s4217_s28  ;;  %v989_v47 = vrot.slane %v983_v21, 4  ;;  %v991_v48 = vrot.slane %v984_v22, 4  ;;  %s4349_s28 = sld [smem:[#allocation2 + $0x61]] }
 0x113   : > { %3075 = vst.msk [vmem:[%s4030_s20 + $0x28] sm:$0xff] %vm367_vm2, %v708_v26  ;;  %v4247_v34 = vadd.f32 %v861_v61, %v844_v14  ;;  %v4249_v2 = vadd.f32 %v859_v62, %v843_v60  ;;  %v1794_v24 = vmul.f32 %v4135_v6, %v1792_v12  ;;  %v1795_v17 = vmul.f32 %v4156_v15, %v1792_v12 }
 0x114   : > { %3074 = vst.msk [vmem:[%s4030_s20 + $0x20] sm:$0xff] %vm367_vm2, %v707_v38  ;;  %1696 = vrot.lane.b32.xlu1 %v1693_v23, %s3509_s30  ;;  %1694 = vrot.lane.b32.xlu0 %v1691_v35, %s3509_s30  ;;  %v1793_v19 = vmul.f32 %v4138_v7, %v1792_v12  ;;  %v982_v23 = vmul.f32 %v4212_v18, %v981_v9  ;;  %v1823_v31 = vrot.slane %v1816_v30, 2  ;;  %v1820_v33 = vrot.slane %v1814_v42, 2 }
 0x115   : > { %v869_v8 = vmul.f32 0.70710677, %v4247_v34  ;;  %v868_v1 = vmul.f32 0.70710677, %v4249_v2  ;;  %v1815_v35 = vmul.f32 %v4135_v6, %v1813_v58  ;;  %v1800_v40 = vrot.slane %v1794_v24, 2 }
 0x116   : > { %v902_v10 = vpop.permute.xlu1 %901  ;;  %v900_v11 = vpop.permute.xlu0 %899  ;;  %v1802_v44 = vrot.slane %v1795_v17, 2  ;;  %v1799_v46 = vrot.slane %v1793_v19, 2  ;;  %v988_v49 = vrot.slane %v982_v23, 4  ;;  %v1853_v26 = vmul.f32 %v4135_v6, %v1851_v45 }
 0x117   : > { %3333 = verf.f32 %v869_v8  ;;  %v906_v25 = vadd.f32 %v902_v10, %v892_v50  ;;  %v905_v27 = vadd.f32 %v900_v11, %v891_v51  ;;  %v1821_v52 = vrot.slane %v1815_v35, 2 }
 0x118   : > { %3335 = verf.f32 %v868_v1  ;;  %1717 = vrot.lane.b32.xlu1 %v1714_v54, %s3508_s29  ;;  %1715 = vrot.lane.b32.xlu0 %v1712_v3, %s3508_s29  ;;  %v1854_v14 = vmul.f32 %v4156_v15, %v1851_v45  ;;  %v1803_v60 = vsel %vm243_vm0, %v1800_v40, %v1802_v44  ;;  %v1852_v20 = vmul.f32 %v4138_v7, %v1851_v45 }
 0x119   : > { %v1801_v38 = vsel %vm243_vm0, %v1799_v46, %v1800_v40  ;;  %v992_v61 = vsel %vm303_vm1, %v989_v47, %v991_v48  ;;  %v990_v62 = vsel %vm303_vm1, %v988_v49, %v989_v47  ;;  %v1056_v12 = vstv %s4279_s9  ;;  %s4406_s9 = sld [smem:[#allocation2 + $0x64]] }
 0x11a   : > { %v916_v32 = vpop.permute.xlu1 %915  ;;  %v914_v36 = vpop.permute.xlu0 %913  ;;  %v1822_v8 = vsel %vm243_vm0, %v1820_v33, %v1821_v52  ;;  %v1861_v1 = vrot.slane %v1854_v14, 4  ;;  %v1059_v4 = vstv %s4284_s10  ;;  %v1858_v11 = vrot.slane %v1852_v20, 4  ;;  %s4414_s10 = sld [smem:[#allocation2 + $0x65]] }
 0x11b   : > { %v920_v43 = vadd.f32 %v916_v32, %v906_v25  ;;  %v919_v41 = vadd.f32 %v914_v36, %v905_v27  ;;  %v1058_v24 = vmul.f32 %v4208_v16, %v1056_v12  ;;  %v1091_v17 = vstv %s4289_s11  ;;  %s4417_s11 = sld [smem:[#allocation2 + $0x67]] }
 0x11c   : > { %1754 = vrot.lane.b32.xlu1 %v1749_v63, %s3509_s30  ;;  %1752 = vrot.lane.b32.xlu0 %v1748_v53, %s3509_s30  ;;  %v1872_v63 = vstv %s4275_s7  ;;  %v1824_v53 = vsel %vm243_vm0, %v1821_v52, %v1823_v31  ;;  %v866_v25 = vmul.f32 0.5, %v4249_v2  ;;  %v1057_v30 = vmul.f32 %v4212_v18, %v1056_v12  ;;  %s4390_s7 = sld [smem:[#allocation2 + $0x39]] }
 0x11d   : > { %v937_v50 = vadd.f32 %v933_v37, %v920_v43  ;;  %v936_v51 = vadd.f32 %v931_v39, %v919_v41  ;;  %v1874_v13 = vmul.f32 %v4135_v6, %v1872_v63  ;;  %v1875_v58 = vmul.f32 %v4156_v15, %v1872_v63  ;;  %v4331_v41 = vld [vmem:[%s3621_s27 + $0x80] sm:$0xff] }
 0x11e   : > { %v954_v56 = vpop.permute.xlu1 %953  ;;  %v952_v59 = vpop.permute.xlu0 %951  ;;  %v867_v6 = vmul.f32 0.5, %v4247_v34  ;;  %v1920_v39 = vstv %s4295_s17  ;;  %v1093_v44 = vmul.f32 %v4208_v16, %v1091_v17  ;;  %v1094_v48 = vmul.f32 %v4241_v0, %v1091_v17  ;;  %s4428_s17 = sld [smem:[#allocation2 + $0x3c]] }
 0x11f   : > { %v958_v29 = vadd.f32 %v954_v56, %v937_v50  ;;  %v957_v28 = vadd.f32 %v952_v59, %v936_v51  ;;  %v1880_v37 = vrot.slane %v1874_v13, 4  ;;  %v1882_v42 = vrot.slane %v1875_v58, 4 }
 0x120   : > { %1768 = vrot.lane.b32.xlu1 %v1763_v5, %s3508_s29  ;;  %1766 = vrot.lane.b32.xlu0 %v1762_v57, %s3508_s29  ;;  %v1859_v5 = vrot.slane %v1853_v26, 4  ;;  %v1873_v57 = vmul.f32 %v4138_v7, %v1872_v63  ;;  %v1061_v52 = vadd.f32 %v1059_v4, %v1058_v24  ;;  %v1060_v31 = vadd.f32 %v1059_v4, %v1057_v30  ;;  %v4346_v26 = vld [vmem:[%s3621_s27 + $0x78] sm:$0xff] }
 0x121   : > { %v1092_v56 = vmul.f32 %v4212_v18, %v1091_v17  ;;  %v1922_v33 = vmul.f32 %v4331_v41, %v1920_v39  ;;  %v1883_v14 = vsel %vm303_vm1, %v1880_v37, %v1882_v42  ;;  %v1099_v20 = vrot.slane %v1093_v44, 2 }
 0x122   : > { %v975_v54 = vpop.permute.xlu1 %974  ;;  %v973_v3 = vpop.permute.xlu0 %972  ;;  %v1862_v7 = vsel %vm303_vm1, %v1859_v5, %v1861_v1  ;;  %v1860_v36 = vsel %vm303_vm1, %v1858_v11, %v1859_v5  ;;  %v1879_v43 = vrot.slane %v1873_v57, 4 }
 0x123   : > { %v979_v9 = vadd.f32 %v975_v54, %v958_v29  ;;  %v978_v10 = vadd.f32 %v973_v3, %v957_v28  ;;  %v1101_v29 = vrot.slane %v1094_v48, 2  ;;  %v1150_v28 = vstv %s4319_s25  ;;  %s4474_s25 = sld [smem:[#allocation2 + $0x3f]] }
 0x124   : > { %v3334_v55 = vpop.eup %3333  ;;  %1806 = vrot.lane.b32.xlu1 %v1803_v60, %s3509_s30  ;;  %1804 = vrot.lane.b32.xlu0 %v1801_v38, %s3509_s30  ;;  %v1881_v60 = vsel %vm303_vm1, %v1879_v43, %v1880_v37  ;;  %v4358_v38 = vld [vmem:[%s3621_s27 + $0x88] sm:$0xf]  ;;  %v1921_v54 = vmul.f32 %v4346_v26, %v1920_v39  ;;  %v1098_v3 = vrot.slane %v1092_v56, 2  ;;  %v1152_v11 = vmul.f32 %v4208_v16, %v1150_v28 }
 0x125   : > { %v3336_v19 = vpop.eup %3335  ;;  %v873_v21 = vadd.f32 1.0, %v3334_v55  ;;  %v996_v22 = vadd.f32 %v992_v61, %v979_v9  ;;  %v995_v23 = vadd.f32 %v990_v62, %v978_v10  ;;  %v1965_v61 = vstv %s4316_s24  ;;  %s4451_s24 = sld [smem:[#allocation2 + $0x6a]] }
 0x126   : > { %v872_v27 = vadd.f32 1.0, %v3336_v19  ;;  %v1013_v35 = vpop.permute.xlu1 %1012  ;;  %v1011_v15 = vpop.permute.xlu0 %1010  ;;  %v1967_v1 = vmul.f32 %v4331_v41, %v1965_v61  ;;  %v1968_v4 = vmul.f32 %v4358_v38, %v1965_v61  ;;  %v1986_v9 = vstv %s4326_s26  ;;  %s4478_s26 = sld [smem:[#allocation2 + $0x6b]] }
 0x127   : > { %v875_v32 = vmul.f32 %v873_v21, %v867_v6  ;;  %v1017_v46 = vadd.f32 %v1013_v35, %v996_v22  ;;  %v1016_v47 = vadd.f32 %v1011_v15, %v995_v23  ;;  %v1966_v10 = vmul.f32 %v4346_v26, %v1965_v61 }
 0x128   : > { %v874_v40 = vmul.f32 %v872_v27, %v866_v25  ;;  %1827 = vrot.lane.b32.xlu1 %v1824_v53, %s3508_s29  ;;  %1825 = vrot.lane.b32.xlu0 %v1822_v8, %s3508_s29  ;;  %v1153_v13 = vmul.f32 %v4241_v0, %v1150_v28  ;;  %v1102_v58 = vsel %vm243_vm0, %v1099_v20, %v1101_v29  ;;  %v1973_v25 = vrot.slane %v1967_v1, 2 }
 0x129   : > { %v877_v45 = vmul.f32 %v875_v32, %v4247_v34  ;;  %v1151_v57 = vmul.f32 %v4212_v18, %v1150_v28  ;;  %v1100_v6 = vsel %vm243_vm0, %v1098_v3, %v1099_v20  ;;  %v1988_v21 = vmul.f32 %v4331_v41, %v1986_v9 }
 0x12a   : > { %v876_v49 = vmul.f32 %v874_v40, %v4249_v2  ;;  %v1034_v50 = vpop.permute.xlu1 %1033  ;;  %v1032_v51 = vpop.permute.xlu0 %1031  ;;  %v1934_v2 = vstv %s4308_s19  ;;  %v1989_v16 = vmul.f32 %v4358_v38, %v1986_v9  ;;  %v1987_v0 = vmul.f32 %v4346_v26, %v1986_v9  ;;  %s4436_s19 = sld [smem:[#allocation2 + $0x68]] }
 0x12b   : > { %3087 = vst.msk [vmem:[%s4030_s20 + $0x38] sm:$0xff] %vm367_vm2, %v877_v45  ;;  %v4340_v59 = vadd.f32 %v1034_v50, %v1017_v46  ;;  %v4342_v34 = vadd.f32 %v1032_v51, %v1016_v47  ;;  %v1936_v8 = vmul.f32 %v4331_v41, %v1934_v2  ;;  %v1935_v5 = vmul.f32 %v4346_v26, %v1934_v2 }
 0x12c   : > { %3086 = vst.msk [vmem:[%s4030_s20 + $0x30] sm:$0xff] %vm367_vm2, %v876_v49  ;;  %1865 = vrot.lane.b32.xlu1 %v1862_v7, %s3509_s30  ;;  %1863 = vrot.lane.b32.xlu0 %v1860_v36, %s3509_s30  ;;  %v2024_v27 = vstv %s4349_s28  ;;  %v1975_v18 = vrot.slane %v1968_v4, 2  ;;  %v1972_v35 = vrot.slane %v1966_v10, 2  ;;  %v1158_v15 = vrot.slane %v1152_v11, 4  ;;  %s4490_s28 = sld [smem:[#allocation5 + $0x7]] }
 0x12d   : > { %v1042_v62 = vmul.f32 0.70710677, %v4340_v59  ;;  %v1041_v63 = vmul.f32 0.70710677, %v4342_v34  ;;  %v1160_v7 = vrot.slane %v1153_v13, 4  ;;  %v1157_v36 = vrot.slane %v1151_v57, 4 }
 0x12e   : > { %v1071_v53 = vpop.permute.xlu1 %1070  ;;  %v1069_v12 = vpop.permute.xlu0 %1068  ;;  %v1994_v40 = vrot.slane %v1988_v21, 2  ;;  %v1996_v42 = vrot.slane %v1989_v16, 2  ;;  %v1993_v43 = vrot.slane %v1987_v0, 2  ;;  %v2026_v44 = vmul.f32 %v4331_v41, %v2024_v27  ;;  %v4433_v0 = vld [vmem:[%s3621_s27 + $0x58] sm:$0xf] }
 0x12f   : > { %3337 = verf.f32 %v1042_v62  ;;  %v1075_v55 = vadd.f32 %v1071_v53, %v1061_v52  ;;  %v1074_v24 = vadd.f32 %v1069_v12, %v1060_v31  ;;  %v2027_v45 = vmul.f32 %v4358_v38, %v2024_v27 }
 0x130   : > { %3339 = verf.f32 %v1041_v63  ;;  %1886 = vrot.lane.b32.xlu1 %v1883_v14, %s3508_s29  ;;  %1884 = vrot.lane.b32.xlu0 %v1881_v60, %s3508_s29  ;;  %v2025_v46 = vmul.f32 %v4346_v26, %v2024_v27  ;;  %v1976_v47 = vsel %vm243_vm0, %v1973_v25, %v1975_v18  ;;  %v1974_v48 = vsel %vm243_vm0, %v1972_v35, %v1973_v25 }
 0x131   : > { %v1161_v49 = vsel %vm303_vm1, %v1158_v15, %v1160_v7  ;;  %v1229_v50 = vstv %s4375_s4  ;;  %v1159_v31 = vsel %vm303_vm1, %v1157_v36, %v1158_v15  ;;  %v2045_v56 = vstv %s4379_s5  ;;  %s4493_s4 = sld [smem:[#allocation2 + $0x42]] }
 0x132   : > { %v1085_v17 = vpop.permute.xlu1 %1084  ;;  %v1083_v19 = vpop.permute.xlu0 %1082  ;;  %v1997_v14 = vsel %vm243_vm0, %v1994_v40, %v1996_v42  ;;  %v1995_v60 = vsel %vm243_vm0, %v1993_v43, %v1994_v40  ;;  %v2032_v20 = vrot.slane %v2026_v44, 4  ;;  %v1232_v61 = vstv %s4385_s6  ;;  %s4511_s5 = sld [smem:[#allocation2 + $0x6d]] }
 0x133   : > { %v1089_v22 = vadd.f32 %v1085_v17, %v1075_v55  ;;  %v1088_v23 = vadd.f32 %v1083_v19, %v1074_v24  ;;  %v2034_v29 = vrot.slane %v2027_v45, 4  ;;  %v2031_v28 = vrot.slane %v2025_v46, 4  ;;  %v4425_v17 = vld [vmem:[%s3621_s27 + $0x48] sm:$0xff]  ;;  %s4514_s6 = sld [smem:[#allocation2 + $0x45]] }
 0x134   : > { %1927 = vrot.lane.b32.xlu1 %v1922_v33, %s3509_s30  ;;  %1925 = vrot.lane.b32.xlu0 %v1921_v54, %s3509_s30  ;;  %v2047_v12 = vmul.f32 %v4331_v41, %v2045_v56  ;;  %v2048_v54 = vmul.f32 %v4358_v38, %v2045_v56  ;;  %v2046_v3 = vmul.f32 %v4346_v26, %v2045_v56  ;;  %v1040_v1 = vmul.f32 0.5, %v4340_v59 }
 0x135   : > { %v1106_v30 = vadd.f32 %v1102_v58, %v1089_v22  ;;  %v1105_v32 = vadd.f32 %v1100_v6, %v1088_v23  ;;  %v1039_v11 = vmul.f32 0.5, %v4342_v34  ;;  %v4421_v58 = vld [vmem:[%s3621_s27 + $0x50] sm:$0xff]  ;;  %v1230_v19 = vmul.f32 %v4425_v17, %v1229_v50 }
 0x136   : > { %v1123_v37 = vpop.permute.xlu1 %1122  ;;  %v1121_v39 = vpop.permute.xlu0 %1120  ;;  %v1231_v57 = vmul.f32 %v4421_v58, %v1229_v50  ;;  %v2035_v21 = vsel %vm303_vm1, %v2032_v20, %v2034_v29  ;;  %v2033_v25 = vsel %vm303_vm1, %v2031_v28, %v2032_v20  ;;  %v2053_v27 = vrot.slane %v2047_v12, 4 }
 0x137   : > { %v1127_v51 = vadd.f32 %v1123_v37, %v1106_v30  ;;  %v1126_v52 = vadd.f32 %v1121_v39, %v1105_v32  ;;  %v2055_v18 = vrot.slane %v2048_v54, 4  ;;  %v2052_v30 = vrot.slane %v2046_v3, 4 }
 0x138   : > { %1941 = vrot.lane.b32.xlu1 %v1936_v8, %s3508_s29  ;;  %1939 = vrot.lane.b32.xlu0 %v1935_v5, %s3508_s29  ;;  %v1264_v8 = vstv %s4390_s7  ;;  %v2089_v39 = vstv %s4406_s9  ;;  %v1233_v45 = vadd.f32 %v1232_v61, %v1230_v19  ;;  %s4519_s7 = sld [smem:[#allocation2 + $0x76]] }
 0x139   : > { %v1266_v16 = vmul.f32 %v4421_v58, %v1264_v8  ;;  %v1267_v22 = vmul.f32 %v4433_v0, %v1264_v8  ;;  %v1265_v40 = vmul.f32 %v4425_v17, %v1264_v8  ;;  %v2056_v46 = vsel %vm303_vm1, %v2053_v27, %v2055_v18  ;;  %s4524_s9 = sld [smem:[#allocation2 + $0x7f]] }
 0x13a   : > { %v1144_v33 = vpop.permute.xlu1 %1143  ;;  %v1142_v2 = vpop.permute.xlu0 %1141  ;;  %v2054_v50 = vsel %vm303_vm1, %v2052_v30, %v2053_v27  ;;  %v2091_v56 = vmul.f32 %v4331_v41, %v2089_v39 }
 0x13b   : > { %v1148_v62 = vadd.f32 %v1144_v33, %v1127_v51  ;;  %v1147_v63 = vadd.f32 %v1142_v2, %v1126_v52  ;;  %v1272_v44 = vrot.slane %v1266_v16, 2  ;;  %v2134_v51 = vstv %s4417_s11  ;;  %s4545_s11 = sld [smem:[#allocation2 + $0x88]] }
 0x13c   : > { %v3338_v53 = vpop.eup %3337  ;;  %1979 = vrot.lane.b32.xlu1 %v1976_v47, %s3509_s30  ;;  %1977 = vrot.lane.b32.xlu0 %v1974_v48, %s3509_s30  ;;  %v2103_v47 = vstv %s4414_s10  ;;  %v2090_v33 = vmul.f32 %v4346_v26, %v2089_v39  ;;  %v1271_v2 = vrot.slane %v1265_v40, 2  ;;  %v2135_v29 = vmul.f32 %v4346_v26, %v2134_v51  ;;  %s4534_s10 = sld [smem:[#allocation2 + $0x48]] }
 0x13d   : > { %v3340_v5 = vpop.eup %3339  ;;  %v1046_v4 = vadd.f32 1.0, %v3338_v53  ;;  %v1165_v9 = vadd.f32 %v1161_v49, %v1148_v62  ;;  %v1164_v10 = vadd.f32 %v1159_v31, %v1147_v63  ;;  %v2105_v20 = vmul.f32 %v4331_v41, %v2103_v47 }
 0x13e   : > { %v1045_v13 = vadd.f32 1.0, %v3340_v5  ;;  %v1182_v55 = vpop.permute.xlu1 %1181  ;;  %v1180_v24 = vpop.permute.xlu0 %1179  ;;  %v2136_v62 = vmul.f32 %v4331_v41, %v2134_v51  ;;  %v2137_v63 = vmul.f32 %v4358_v38, %v2134_v51  ;;  %v1273_v5 = vsel %vm243_vm0, %v1271_v2, %v1272_v44 }
 0x13f   : > { %v1048_v6 = vmul.f32 %v1046_v4, %v1040_v1  ;;  %v1186_v15 = vadd.f32 %v1182_v55, %v1165_v9  ;;  %v1185_v7 = vadd.f32 %v1180_v24, %v1164_v10  ;;  %v2193_v55 = vstv %s4451_s24  ;;  %s4565_s24 = sld [smem:[#allocation5 + $0x8]] }
 0x140   : > { %v1047_v23 = vmul.f32 %v1045_v13, %v1039_v11  ;;  %2000 = vrot.lane.b32.xlu1 %v1997_v14, %s3508_s29  ;;  %1998 = vrot.lane.b32.xlu0 %v1995_v60, %s3508_s29  ;;  %v1323_v14 = vstv %s4428_s17  ;;  %v2104_v24 = vmul.f32 %v4346_v26, %v2103_v47  ;;  %v2144_v19 = vrot.slane %v2137_v63, 2  ;;  %s4556_s17 = sld [smem:[#allocation2 + $0x6e]] }
 0x141   : > { %v1050_v35 = vmul.f32 %v1048_v6, %v4340_v59  ;;  %v1274_v59 = vrot.slane %v1267_v22, 2  ;;  %v1325_v12 = vmul.f32 %v4421_v58, %v1323_v14  ;;  %v1326_v54 = vmul.f32 %v4433_v0, %v1323_v14 }
 0x142   : > { %v1049_v32 = vmul.f32 %v1047_v23, %v4342_v34  ;;  %v1203_v36 = vpop.permute.xlu1 %1202  ;;  %v1201_v37 = vpop.permute.xlu0 %1200  ;;  %v1234_v34 = vadd.f32 %v1232_v61, %v1231_v57  ;;  %v2155_v61 = vstv %s4436_s19  ;;  %v1324_v1 = vmul.f32 %v4425_v17, %v1323_v14  ;;  %s4562_s19 = sld [smem:[#allocation2 + $0x4b]] }
 0x143   : > { %3102 = vst.msk [vmem:[%s4030_s20 + $0x48] sm:$0xff] %vm367_vm2, %v1050_v35  ;;  %v4447_v42 = vadd.f32 %v1203_v36, %v1186_v15  ;;  %v4449_v43 = vadd.f32 %v1201_v37, %v1185_v7  ;;  %v1275_v60 = vsel %vm243_vm0, %v1272_v44, %v1274_v59  ;;  %v2157_v4 = vmul.f32 %v4331_v41, %v2155_v61 }
 0x144   : > { %3101 = vst.msk [vmem:[%s4030_s20 + $0x40] sm:$0xff] %vm367_vm2, %v1049_v32  ;;  %2038 = vrot.lane.b32.xlu1 %v2035_v21, %s3509_s30  ;;  %2036 = vrot.lane.b32.xlu0 %v2033_v25, %s3509_s30  ;;  %v2158_v9 = vmul.f32 %v4358_v38, %v2155_v61  ;;  %v2156_v13 = vmul.f32 %v4346_v26, %v2155_v61  ;;  %v2142_v57 = vrot.slane %v2136_v62, 2  ;;  %v2141_v6 = vrot.slane %v2135_v29, 2 }
 0x145   : > { %v1211_v48 = vmul.f32 0.70710677, %v4447_v42  ;;  %v1210_v49 = vmul.f32 0.70710677, %v4449_v43  ;;  %v1331_v22 = vrot.slane %v1325_v12, 4  ;;  %v1333_v23 = vrot.slane %v1326_v54, 4 }
 0x146   : > { %v1244_v52 = vpop.permute.xlu1 %1243  ;;  %v1242_v31 = vpop.permute.xlu0 %1241  ;;  %v1330_v18 = vrot.slane %v1324_v1, 4  ;;  %v2163_v35 = vrot.slane %v2157_v4, 2  ;;  %v2165_v15 = vrot.slane %v2158_v9, 2  ;;  %v2195_v7 = vmul.f32 %v4331_v41, %v2193_v55 }
 0x147   : > { %3341 = verf.f32 %v1211_v48  ;;  %v1248_v28 = vadd.f32 %v1244_v52, %v1234_v34  ;;  %v1247_v53 = vadd.f32 %v1242_v31, %v1233_v45  ;;  %v2162_v30 = vrot.slane %v2156_v13, 2 }
 0x148   : > { %3343 = verf.f32 %v1210_v49  ;;  %2059 = vrot.lane.b32.xlu1 %v2056_v46, %s3508_s29  ;;  %2057 = vrot.lane.b32.xlu0 %v2054_v50, %s3508_s29  ;;  %v2196_v32 = vmul.f32 %v4358_v38, %v2193_v55  ;;  %v2145_v36 = vsel %vm243_vm0, %v2142_v57, %v2144_v19  ;;  %v2194_v37 = vmul.f32 %v4346_v26, %v2193_v55 }
 0x149   : > { %v1398_v39 = vstv %s4474_s25  ;;  %v2143_v59 = vsel %vm243_vm0, %v2141_v6, %v2142_v57  ;;  %v2214_v34 = vstv %s4478_s26  ;;  %v1334_v47 = vsel %vm303_vm1, %v1331_v22, %v1333_v23  ;;  %s4570_s25 = sld [smem:[#allocation2 + $0x77]] }
 0x14a   : > { %v1258_v3 = vpop.permute.xlu1 %1257  ;;  %v1256_v8 = vpop.permute.xlu0 %1255  ;;  %v1332_v48 = vsel %vm303_vm1, %v1330_v18, %v1331_v22  ;;  %v2166_v49 = vsel %vm243_vm0, %v2163_v35, %v2165_v15  ;;  %v2201_v50 = vrot.slane %v2195_v7, 4  ;;  %v2164_v31 = vsel %vm243_vm0, %v2162_v30, %v2163_v35  ;;  %v4554_v7 = vld [vmem:[%s3621_s27 + $0x90] sm:$0xff]  ;;  %s4580_s26 = sld [smem:[#allocation2 + $0x80]] }
 0x14b   : > { %v1262_v10 = vadd.f32 %v1258_v3, %v1248_v28  ;;  %v1261_v11 = vadd.f32 %v1256_v8, %v1247_v53  ;;  %v2200_v2 = vrot.slane %v2194_v37, 4  ;;  %v2216_v14 = vmul.f32 %v4331_v41, %v2214_v34 }
 0x14c   : > { %2096 = vrot.lane.b32.xlu1 %v2091_v56, %s3509_s30  ;;  %2094 = vrot.lane.b32.xlu0 %v2090_v33, %s3509_s30  ;;  %v2203_v56 = vrot.slane %v2196_v32, 4  ;;  %v1209_v62 = vmul.f32 0.5, %v4447_v42  ;;  %v1208_v53 = vmul.f32 0.5, %v4449_v43  ;;  %v1401_v3 = vstv %s4490_s28  ;;  %s4583_s28 = sld [smem:[#allocation2 + $0x70]] }
 0x14d   : > { %v1279_v21 = vadd.f32 %v1275_v60, %v1262_v10  ;;  %v1278_v16 = vadd.f32 %v1273_v5, %v1261_v11  ;;  %v2217_v60 = vmul.f32 %v4358_v38, %v2214_v34  ;;  %v1400_v38 = vmul.f32 %v4421_v58, %v1398_v39 }
 0x14e   : > { %v1296_v25 = vpop.permute.xlu1 %1295  ;;  %v1294_v27 = vpop.permute.xlu0 %1293  ;;  %v2204_v8 = vsel %vm303_vm1, %v2201_v50, %v2203_v56  ;;  %v1399_v5 = vmul.f32 %v4425_v17, %v1398_v39  ;;  %v1433_v1 = vstv %s4493_s4  ;;  %v2202_v9 = vsel %vm303_vm1, %v2200_v2, %v2201_v50  ;;  %s4597_s4 = sld [smem:[#allocation2 + $0x89]] }
 0x14f   : > { %v1300_v40 = vadd.f32 %v1296_v25, %v1279_v21  ;;  %v1299_v44 = vadd.f32 %v1294_v27, %v1278_v16  ;;  %v2222_v10 = vrot.slane %v2216_v14, 4  ;;  %v2224_v11 = vrot.slane %v2217_v60, 4 }
 0x150   : > { %2110 = vrot.lane.b32.xlu1 %v2105_v20, %s3508_s29  ;;  %2108 = vrot.lane.b32.xlu0 %v2104_v24, %s3508_s29  ;;  %v2215_v20 = vmul.f32 %v4346_v26, %v2214_v34  ;;  %v1435_v16 = vmul.f32 %v4421_v58, %v1433_v1  ;;  %v1436_v22 = vmul.f32 %v4433_v0, %v1433_v1  ;;  %v2262_v15 = vstv %s4511_s5  ;;  %s4619_s5 = sld [smem:[#allocation2 + $0x4e]] }
 0x151   : > { %v1434_v23 = vmul.f32 %v4425_v17, %v1433_v1  ;;  %v1403_v27 = vadd.f32 %v1401_v3, %v1400_v38  ;;  %v1402_v18 = vadd.f32 %v1401_v3, %v1399_v5  ;;  %v2225_v35 = vsel %vm303_vm1, %v2222_v10, %v2224_v11  ;;  %v4600_v3 = vld [vmem:[%s3621_s27 + $0x68] sm:$0xff]  ;;  %v4608_v11 = vld [vmem:[%s3621_s27 + $0x60] sm:$0xff] }
 0x152   : > { %v1317_v45 = vpop.permute.xlu1 %1316  ;;  %v1315_v46 = vpop.permute.xlu0 %1314  ;;  %v2221_v57 = vrot.slane %v2215_v20, 4  ;;  %v1492_v37 = vstv %s4514_s6  ;;  %s4629_s6 = sld [smem:[#allocation2 + $0x79]] }
 0x153   : > { %v1321_v51 = vadd.f32 %v1317_v45, %v1300_v40  ;;  %v1320_v52 = vadd.f32 %v1315_v46, %v1299_v44  ;;  %v1441_v44 = vrot.slane %v1435_v16, 2  ;;  %v1440_v34 = vrot.slane %v1434_v23, 2 }
 0x154   : > { %v3342_v33 = vpop.eup %3341  ;;  %2148 = vrot.lane.b32.xlu1 %v2145_v36, %s3509_s30  ;;  %2146 = vrot.lane.b32.xlu0 %v2143_v59, %s3509_s30  ;;  %v2223_v36 = vsel %vm303_vm1, %v2221_v57, %v2222_v10  ;;  %v1443_v59 = vrot.slane %v1436_v22, 2  ;;  %v2431_v45 = vstv %s4519_s7  ;;  %v1494_v50 = vmul.f32 %v4421_v58, %v1492_v37  ;;  %s4655_s7 = sld [smem:[#allocation2 + $0x82]] }
 0x155   : > { %v3344_v61 = vpop.eup %3343  ;;  %v1215_v63 = vadd.f32 1.0, %v3342_v33  ;;  %v1338_v29 = vadd.f32 %v1334_v47, %v1321_v51  ;;  %v1337_v28 = vadd.f32 %v1332_v48, %v1320_v52  ;;  %v2263_v47 = vmul.f32 %v4554_v7, %v2262_v15 }
 0x156   : > { %v1214_v12 = vadd.f32 1.0, %v3344_v61  ;;  %v1355_v54 = vpop.permute.xlu1 %1354  ;;  %v1353_v41 = vpop.permute.xlu0 %1352  ;;  %v2604_v48 = vstv %s4524_s9  ;;  %v1495_v51 = vmul.f32 %v4433_v0, %v1492_v37  ;;  %v1493_v52 = vmul.f32 %v4425_v17, %v1492_v37  ;;  %s4668_s9 = sld [smem:[#allocation2 + $0x51]] }
 0x157   : > { %v1217_v26 = vmul.f32 %v1215_v63, %v1209_v62  ;;  %v1359_v55 = vadd.f32 %v1355_v54, %v1338_v29  ;;  %v1358_v24 = vadd.f32 %v1353_v41, %v1337_v28  ;;  %v1444_v60 = vsel %vm243_vm0, %v1441_v44, %v1443_v59  ;;  %v4591_v63 = vld [vmem:[%s3621_s27 + $0xa8] sm:$0xff] }
 0x158   : > { %v1216_v4 = vmul.f32 %v1214_v12, %v1208_v53  ;;  %2169 = vrot.lane.b32.xlu1 %v2166_v49, %s3508_s29  ;;  %2167 = vrot.lane.b32.xlu0 %v2164_v31, %s3508_s29  ;;  %v4575_v49 = vld [vmem:[%s3621_s27 + $0xb0] sm:$0xff]  ;;  %v1442_v58 = vsel %vm243_vm0, %v1440_v34, %v1441_v44  ;;  %v2432_v0 = vmul.f32 %v4554_v7, %v2431_v45  ;;  %v1571_v17 = vstv %s4534_s10  ;;  %s4677_s10 = sld [smem:[#allocation2 + $0x8b]] }
 0x159   : > { %v1219_v13 = vmul.f32 %v1217_v26, %v4447_v42  ;;  %v2606_v62 = vmul.f32 %v4575_v49, %v2604_v48  ;;  %v2773_v29 = vstv %s4545_s11  ;;  %v1500_v28 = vrot.slane %v1494_v50, 4  ;;  %s4700_s11 = sld [smem:[#allocation2 + $0x71]] }
 0x15a   : > { %v1218_v19 = vmul.f32 %v1216_v4, %v4449_v43  ;;  %v1376_v6 = vpop.permute.xlu1 %1375  ;;  %v1374_v21 = vpop.permute.xlu0 %1373  ;;  %v4543_v43 = vld [vmem:[%s3621_s27 + $0x98] sm:$0xff]  ;;  %v1502_v53 = vrot.slane %v1495_v51, 4  ;;  %v1499_v12 = vrot.slane %v1493_v52, 4  ;;  %v2276_v54 = vstv %s4556_s17  ;;  %s4715_s17 = sld [smem:[#allocation5 + $0x9]] }
 0x15b   : > { %3114 = vst.msk [vmem:[%s4030_s20 + $0x58] sm:$0xff] %vm367_vm2, %v1219_v13  ;;  %v4538_v42 = vadd.f32 %v1376_v6, %v1359_v55  ;;  %v4540_v25 = vadd.f32 %v1374_v21, %v1358_v24  ;;  %v2264_v46 = vmul.f32 %v4543_v43, %v2262_v15  ;;  %v2433_v33 = vmul.f32 %v4543_v43, %v2431_v45 }
 0x15c   : > { %3113 = vst.msk [vmem:[%s4030_s20 + $0x50] sm:$0xff] %vm367_vm2, %v1218_v19  ;;  %2207 = vrot.lane.b32.xlu1 %v2204_v8, %s3509_s30  ;;  %2205 = vrot.lane.b32.xlu0 %v2202_v9, %s3509_s30  ;;  %v1573_v26 = vmul.f32 %v4600_v3, %v1571_v17  ;;  %v1606_v8 = vstv %s4562_s19  ;;  %v2605_v4 = vmul.f32 %v4591_v63, %v2604_v48  ;;  %s4734_s19 = sld [smem:[#allocation2 + $0x54]] }
 0x15d   : > { %v1384_v30 = vmul.f32 0.70710677, %v4538_v42  ;;  %v1383_v32 = vmul.f32 0.70710677, %v4540_v25  ;;  %v2775_v9 = vmul.f32 %v4575_v49, %v2773_v29  ;;  %v1574_v10 = vstv %s4565_s24  ;;  %s4738_s24 = sld [smem:[#allocation2 + $0x7a]] }
 0x15e   : > { %v1413_v39 = vpop.permute.xlu1 %1412  ;;  %v1411_v40 = vpop.permute.xlu0 %1410  ;;  %v1572_v13 = vmul.f32 %v4608_v11, %v1571_v17  ;;  %v2774_v55 = vmul.f32 %v4591_v63, %v2773_v29  ;;  %v4613_v24 = vmul.f32 %v4543_v43, %v2276_v54  ;;  %v4616_v57 = vmul.f32 %v4554_v7, %v2276_v54 }
 0x15f   : > { %3345 = verf.f32 %v1384_v30  ;;  %v1417_v31 = vadd.f32 %v1413_v39, %v1403_v27  ;;  %v1416_v56 = vadd.f32 %v1411_v40, %v1402_v18  ;;  %v2445_v19 = vstv %s4570_s25  ;;  %v4643_v39 = vld [vmem:[%s3621_s27 + $0x70] sm:$0xf]  ;;  %s4762_s25 = sld [smem:[#allocation2 + $0x83]] }
 0x160   : > { %3347 = verf.f32 %v1383_v32  ;;  %2228 = vrot.lane.b32.xlu1 %v2225_v35, %s3508_s29  ;;  %2226 = vrot.lane.b32.xlu0 %v2223_v36, %s3508_s29  ;;  %v1503_v6 = vsel %vm303_vm1, %v1500_v28, %v1502_v53  ;;  %v1501_v21 = vsel %vm303_vm1, %v1499_v12, %v1500_v28  ;;  %v2618_v16 = vstv %s4580_s26  ;;  %s4788_s26 = sld [smem:[#allocation2 + $0x57]] }
 0x161   : > { %v4627_v22 = vmul.f32 %v4600_v3, %v1606_v8  ;;  %v4631_v18 = vadd.f32 %v1574_v10, %v1573_v26  ;;  %v2307_v35 = vstv %s4583_s28  ;;  %v4634_v32 = vadd.f32 %v1574_v10, %v1572_v13  ;;  %s4797_s28 = sld [smem:[#allocation2 + $0x8c]] }
 0x162   : > { %v1427_v2 = vpop.permute.xlu1 %1426  ;;  %v1425_v14 = vpop.permute.xlu0 %1424  ;;  %v4637_v36 = vmul.f32 %v4543_v43, %v2445_v19  ;;  %v4640_v37 = vmul.f32 %v4554_v7, %v2445_v19  ;;  %v1609_v40 = vmul.f32 %v4643_v39, %v1606_v8  ;;  %v4647_v34 = vmul.f32 %v4575_v49, %v2618_v16 }
 0x163   : > { %v1431_v20 = vadd.f32 %v1427_v2, %v1417_v31  ;;  %v1430_v61 = vadd.f32 %v1425_v14, %v1416_v56  ;;  %v4650_v45 = vmul.f32 %v4591_v63, %v2618_v16  ;;  %v1614_v48 = vrot.slane %v4627_v22, 2 }
 0x164   : > { %2269 = vrot.lane.b32.xlu1 %v2264_v46, %s3509_s30  ;;  %2267 = vrot.lane.b32.xlu0 %v2263_v47, %s3509_s30  ;;  %v4653_v46 = vld [vmem:[%s3621_s27 + $0xa0] sm:$0xf]  ;;  %v1607_v50 = vmul.f32 %v4608_v11, %v1606_v8  ;;  %v2787_v51 = vstv %s4597_s4  ;;  %v4663_v52 = vmul.f32 %v4543_v43, %v2307_v35  ;;  %v1382_v56 = vmul.f32 0.5, %v4538_v42  ;;  %s4801_s4 = sld [smem:[#allocation2 + $0x73]] }
 0x165   : > { %v1448_v41 = vadd.f32 %v1444_v60, %v1431_v20  ;;  %v1447_v38 = vadd.f32 %v1442_v58, %v1430_v61  ;;  %v1381_v60 = vmul.f32 0.5, %v4540_v25  ;;  %v1616_v20 = vrot.slane %v1609_v40, 2 }
 0x166   : > { %v1465_v5 = vpop.permute.xlu1 %1464  ;;  %v1463_v1 = vpop.permute.xlu0 %1462  ;;  %v2310_v61 = vmul.f32 %v4653_v46, %v2307_v35  ;;  %v4671_v29 = vmul.f32 %v4575_v49, %v2787_v51  ;;  %v4674_v28 = vmul.f32 %v4591_v63, %v2787_v51  ;;  %v1665_v53 = vstv %s4619_s5  ;;  %s4808_s5 = sld [smem:[#allocation2 + $0x5a]] }
 0x167   : > { %v1469_v23 = vadd.f32 %v1465_v5, %v1448_v41  ;;  %v1468_v27 = vadd.f32 %v1463_v1, %v1447_v38  ;;  %v1613_v54 = vrot.slane %v1607_v50, 2  ;;  %v4682_v41 = vmul.f32 %v4554_v7, %v2307_v35  ;;  %v4713_v35 = vld [vmem:[%s3621_s27 + $0xb8] sm:$0xf] }
 0x168   : > { %2438 = vrot.lane.b32.xlu1 %v2433_v33, %s3509_s30  ;;  %2436 = vrot.lane.b32.xlu0 %v2432_v0, %s3509_s30  ;;  %v2476_v38 = vstv %s4629_s6  ;;  %v2315_v1 = vrot.slane %v4663_v52, 2  ;;  %v1668_v19 = vmul.f32 %v4643_v39, %v1665_v53  ;;  %v2649_v16 = vstv %s4655_s7  ;;  %s4836_s6 = sld [smem:[#allocation2 + $0x7c]] }
 0x169   : > { %v2314_v22 = vrot.slane %v4682_v41, 2  ;;  %v2651_v50 = vmul.f32 %v4575_v49, %v2649_v16  ;;  %v2652_v51 = vmul.f32 %v4713_v35, %v2649_v16  ;;  %v1740_v52 = vstv %s4668_s9  ;;  %s4842_s7 = sld [smem:[#allocation5 + $0xa]] }
 0x16a   : > { %v1486_v15 = vpop.permute.xlu1 %1485  ;;  %v1484_v30 = vpop.permute.xlu0 %1483  ;;  %s4853_s9 = sld [smem:[#allocation2 + $0x85]] }
 0x16b   : > { %v1490_v44 = vadd.f32 %v1486_v15, %v1469_v23  ;;  %v1489_v59 = vadd.f32 %v1484_v30, %v1468_v27  ;;  %v1666_v23 = vmul.f32 %v4608_v11, %v1665_v53  ;;  %v2478_v27 = vmul.f32 %v4543_v43, %v2476_v38 }
 0x16c   : > { %v3346_v47 = vpop.eup %3345  ;;  %2611 = vrot.lane.b32.xlu1 %v2606_v62, %s3509_s30  ;;  %2609 = vrot.lane.b32.xlu0 %v2605_v4, %s3509_s30  ;;  %v2477_v30 = vmul.f32 %v4554_v7, %v2476_v38 }
 0x16d   : > { %v3348_v31 = vpop.eup %3347  ;;  %v1388_v33 = vadd.f32 1.0, %v3346_v47  ;;  %v1507_v2 = vadd.f32 %v1503_v6, %v1490_v44  ;;  %v1506_v14 = vadd.f32 %v1501_v21, %v1489_v59  ;;  %v1617_v21 = vsel %vm243_vm0, %v1614_v48, %v1616_v20 }
 0x16e   : > { %v1387_v58 = vadd.f32 1.0, %v3348_v31  ;;  %v1524_v0 = vpop.permute.xlu1 %1523  ;;  %v1522_v17 = vpop.permute.xlu0 %1521  ;;  %v2818_v31 = vstv %s4677_s10  ;;  %v2657_v20 = vrot.slane %v2651_v50, 2  ;;  %s4858_s10 = sld [smem:[#allocation2 + $0x5d]] }
 0x16f   : > { %v1390_v62 = vmul.f32 %v1388_v33, %v1382_v56  ;;  %v1528_v8 = vadd.f32 %v1524_v0, %v1507_v2  ;;  %v1527_v5 = vadd.f32 %v1522_v17, %v1506_v14  ;;  %v1672_v56 = vrot.slane %v1666_v23, 4 }
 0x170   : > { %v1389_v12 = vmul.f32 %v1387_v58, %v1381_v60  ;;  %2780 = vrot.lane.b32.xlu1 %v2775_v9, %s3509_s30  ;;  %2778 = vrot.lane.b32.xlu0 %v2774_v55, %s3509_s30  ;;  %v2317_v9 = vrot.slane %v2310_v61, 2  ;;  %v4689_v55 = vmul.f32 %v4600_v3, %v1665_v53  ;;  %v2484_v33 = vrot.slane %v2478_v27, 2 }
 0x171   : > { %v1392_v26 = vmul.f32 %v1390_v62, %v4538_v42  ;;  %v2650_v2 = vmul.f32 %v4591_v63, %v2649_v16  ;;  %v2483_v0 = vrot.slane %v2477_v30, 2  ;;  %v2821_v61 = vmul.f32 %v4713_v35, %v2818_v31 }
 0x172   : > { %v1391_v4 = vmul.f32 %v1389_v12, %v4540_v25  ;;  %v1545_v10 = vpop.permute.xlu1 %1544  ;;  %v1543_v13 = vpop.permute.xlu0 %1542  ;;  %v1615_v25 = vsel %vm243_vm0, %v1613_v54, %v1614_v48  ;;  %v4722_v59 = vsel %vm243_vm0, %v2315_v1, %v2317_v9  ;;  %v1673_v47 = vrot.slane %v4689_v55, 4 }
 0x173   : > { %3129 = vst.msk [vmem:[%s4030_s20 + $0x68] sm:$0xff] %vm367_vm2, %v1392_v26  ;;  %v4694_v6 = vadd.f32 %v1545_v10, %v1528_v8  ;;  %v4696_v42 = vadd.f32 %v1543_v13, %v1527_v5  ;;  %v1675_v48 = vrot.slane %v1668_v19, 4  ;;  %v2819_v62 = vmul.f32 %v4591_v63, %v2818_v31 }
 0x174   : > { %3128 = vst.msk [vmem:[%s4030_s20 + $0x60] sm:$0xff] %vm367_vm2, %v1391_v4  ;;  %2283 = vrot.lane.b32.xlu1 %v4613_v24, %s3508_s29  ;;  %2281 = vrot.lane.b32.xlu0 %v4616_v57, %s3508_s29  ;;  %v2479_v57 = vmul.f32 %v4653_v46, %v2476_v38  ;;  %v2659_v54 = vrot.slane %v2652_v51, 2  ;;  %v2656_v41 = vrot.slane %v2650_v2, 2  ;;  %v1742_v38 = vmul.f32 %v4600_v3, %v1740_v52 }
 0x175   : > { %v1553_v15 = vmul.f32 0.70710677, %v4694_v6  ;;  %v1552_v24 = vmul.f32 0.70710677, %v4696_v42  ;;  %v1743_v26 = vstv %s4715_s17  ;;  %v1676_v4 = vsel %vm303_vm1, %v1673_v47, %v1675_v48  ;;  %s4911_s17 = sld [smem:[#allocation2 + $0x74]] }
 0x176   : > { %v1586_v40 = vpop.permute.xlu1 %1585  ;;  %v1584_v44 = vpop.permute.xlu0 %1583  ;;  %v2486_v58 = vrot.slane %v2479_v57, 2  ;;  %v1741_v10 = vmul.f32 %v4608_v11, %v1740_v52  ;;  %v2825_v19 = vrot.slane %v2819_v62, 2  ;;  %v4771_v23 = vadd.f32 %v1743_v26, %v1742_v38 }
 0x177   : > { %3349 = verf.f32 %v1553_v15  ;;  %v1590_v14 = vadd.f32 %v1586_v40, %v4631_v18  ;;  %v1589_v60 = vadd.f32 %v1584_v44, %v4634_v32  ;;  %v2328_v18 = vstv %s4700_s11  ;;  %s4881_s11 = sld [smem:[#allocation2 + $0x8e]] }
 0x178   : > { %3351 = verf.f32 %v1552_v24  ;;  %2452 = vrot.lane.b32.xlu1 %v4637_v36, %s3508_s29  ;;  %2450 = vrot.lane.b32.xlu0 %v4640_v37, %s3508_s29  ;;  %v2820_v37 = vmul.f32 %v4575_v49, %v2818_v31  ;;  %v2316_v32 = vsel %vm243_vm0, %v2314_v22, %v2315_v1  ;;  %v1674_v1 = vsel %vm303_vm1, %v1672_v56, %v1673_v47 }
 0x179   : > { %v2487_v16 = vsel %vm243_vm0, %v2484_v33, %v2486_v58  ;;  %v4769_v22 = vsel %vm243_vm0, %v2656_v41, %v2657_v20  ;;  %v2331_v27 = vmul.f32 %v4653_v46, %v2328_v18  ;;  %v1775_v15 = vstv %s4734_s19  ;;  %s4914_s19 = sld [smem:[#allocation2 + $0x60]] }
 0x17a   : > { %v1600_v36 = vpop.permute.xlu1 %1599  ;;  %v1598_v17 = vpop.permute.xlu0 %1597  ;;  %v2826_v55 = vrot.slane %v2820_v37, 2  ;;  %v4775_v30 = vadd.f32 %v1743_v26, %v1741_v10  ;;  %v2497_v40 = vstv %s4738_s24  ;;  %v2329_v50 = vmul.f32 %v4554_v7, %v2328_v18  ;;  %s4919_s24 = sld [smem:[#allocation2 + $0x7d]] }
 0x17b   : > { %v1604_v53 = vadd.f32 %v1600_v36, %v1590_v14  ;;  %v1603_v12 = vadd.f32 %v1598_v17, %v1589_v60  ;;  %v1777_v31 = vmul.f32 %v4600_v3, %v1775_v15  ;;  %v1778_v56 = vmul.f32 %v4643_v39, %v1775_v15 }
 0x17c   : > { %2625 = vrot.lane.b32.xlu1 %v4647_v34, %s3508_s29  ;;  %2623 = vrot.lane.b32.xlu0 %v4650_v45, %s3508_s29  ;;  %v2828_v34 = vrot.slane %v2821_v61, 2  ;;  %v4754_v45 = vmul.f32 %v4543_v43, %v2328_v18  ;;  %v2338_v2 = vrot.slane %v2331_v27, 2  ;;  %v1776_v14 = vmul.f32 %v4608_v11, %v1775_v15 }
 0x17d   : > { %v1621_v8 = vadd.f32 %v1617_v21, %v1604_v53  ;;  %v1620_v5 = vadd.f32 %v1615_v25, %v1603_v12  ;;  %v2485_v21 = vsel %vm243_vm0, %v2483_v0, %v2484_v33  ;;  %v4760_v25 = vsel %vm243_vm0, %v2657_v20, %v2659_v54 }
 0x17e   : > { %v1638_v13 = vpop.permute.xlu1 %1637  ;;  %v1636_v9 = vpop.permute.xlu0 %1635  ;;  %v2336_v48 = vrot.slane %v4754_v45, 2  ;;  %v2499_v60 = vmul.f32 %v4543_v43, %v2497_v40  ;;  %v2500_v58 = vmul.f32 %v4653_v46, %v2497_v40  ;;  %v1551_v36 = vmul.f32 0.5, %v4694_v6 }
 0x17f   : > { %v1642_v24 = vadd.f32 %v1638_v13, %v1621_v8  ;;  %v1641_v57 = vadd.f32 %v1636_v9, %v1620_v5  ;;  %v2335_v12 = vrot.slane %v2329_v50, 2  ;;  %v2498_v54 = vmul.f32 %v4554_v7, %v2497_v40 }
 0x180   : > { %2794 = vrot.lane.b32.xlu1 %v4671_v29, %s3508_s29  ;;  %2792 = vrot.lane.b32.xlu0 %v4674_v28, %s3508_s29  ;;  %v4779_v29 = vsel %vm243_vm0, %v2826_v55, %v2828_v34  ;;  %v4782_v28 = vsel %vm243_vm0, %v2825_v19, %v2826_v55  ;;  %v1785_v41 = vrot.slane %v1778_v56, 2  ;;  %v2670_v38 = vstv %s4762_s25  ;;  %s4939_s25 = sld [smem:[#allocation2 + $0x86]] }
 0x181   : > { %v1782_v8 = vrot.slane %v1776_v14, 2  ;;  %v2505_v5 = vrot.slane %v2499_v60, 2  ;;  %v2339_v55 = vsel %vm243_vm0, %v2336_v48, %v2338_v2  ;;  %v2673_v15 = vmul.f32 %v4713_v35, %v2670_v38 }
 0x182   : > { %v1659_v44 = vpop.permute.xlu1 %1658  ;;  %v1657_v47 = vpop.permute.xlu0 %1656  ;;  %v2839_v50 = vstv %s4797_s28  ;;  %v2366_v56 = vstv %s4801_s4  ;;  %s4966_s28 = sld [smem:[#allocation2 + $0x8f]] }
 0x183   : > { %v1663_v51 = vadd.f32 %v1659_v44, %v1642_v24  ;;  %v1662_v52 = vadd.f32 %v1657_v47, %v1641_v57  ;;  %v1834_v24 = vstv %s4788_s26  ;;  %v2841_v60 = vmul.f32 %v4575_v49, %v2839_v50  ;;  %s4959_s26 = sld [smem:[#allocation2 + $0x63]] }
 0x184   : > { %v3350_v33 = vpop.eup %3349  ;;  %2321 = vrot.lane.b32.xlu1 %v4722_v59, %s3509_s30  ;;  %2319 = vrot.lane.b32.xlu0 %v2316_v32, %s3509_s30  ;;  %v1550_v59 = vmul.f32 0.5, %v4696_v42  ;;  %v1783_v32 = vrot.slane %v1777_v31, 2  ;;  %v1836_v31 = vmul.f32 %v4600_v3, %v1834_v24  ;;  %v1837_v2 = vmul.f32 %v4643_v39, %v1834_v24  ;;  %s4970_s4 = sld [smem:[#allocation5 + $0xb]] }
 0x185   : > { %v3352_v0 = vpop.eup %3351  ;;  %v1557_v17 = vadd.f32 1.0, %v3350_v33  ;;  %v1680_v20 = vadd.f32 %v1676_v4, %v1663_v51  ;;  %v1679_v37 = vadd.f32 %v1674_v1, %v1662_v52  ;;  %v2507_v4 = vrot.slane %v2500_v58, 2 }
 0x186   : > { %v1556_v61 = vadd.f32 1.0, %v3352_v0  ;;  %v1697_v62 = vpop.permute.xlu1 %1696  ;;  %v1695_v53 = vpop.permute.xlu0 %1694  ;;  %v2337_v1 = vsel %vm243_vm0, %v2335_v12, %v2336_v48  ;;  %v1784_v57 = vsel %vm243_vm0, %v1782_v8, %v1783_v32  ;;  %v2671_v48 = vmul.f32 %v4591_v63, %v2670_v38 }
 0x187   : > { %v1559_v18 = vmul.f32 %v1557_v17, %v1551_v36  ;;  %v1701_v13 = vadd.f32 %v1697_v62, %v1680_v20  ;;  %v1700_v9 = vadd.f32 %v1695_v53, %v1679_v37  ;;  %v2508_v40 = vsel %vm243_vm0, %v2505_v5, %v2507_v4 }
 0x188   : > { %v1558_v26 = vmul.f32 %v1556_v61, %v1550_v59  ;;  %2490 = vrot.lane.b32.xlu1 %v2487_v16, %s3509_s30  ;;  %2488 = vrot.lane.b32.xlu0 %v2485_v21, %s3509_s30  ;;  %v2504_v16 = vrot.slane %v2498_v54, 2  ;;  %v4813_v21 = vmul.f32 %v4575_v49, %v2670_v38  ;;  %v2680_v33 = vrot.slane %v2673_v15, 2  ;;  %v4867_v38 = vld [vmem:[%s3621_s27 + $0x80] sm:$0xff] }
 0x189   : > { %v1561_v10 = vmul.f32 %v1559_v18, %v4694_v6  ;;  %v1835_v14 = vmul.f32 %v4608_v11, %v1834_v24  ;;  %v2842_v3 = vmul.f32 %v4713_v35, %v2839_v50  ;;  %v2840_v58 = vmul.f32 %v4591_v63, %v2839_v50 }
 0x18a   : > { %v1560_v34 = vmul.f32 %v1558_v26, %v4696_v42  ;;  %v1718_v19 = vpop.permute.xlu1 %1717  ;;  %v1716_v45 = vpop.permute.xlu0 %1715  ;;  %v1786_v42 = vsel %vm243_vm0, %v1783_v32, %v1785_v41  ;;  %v2506_v52 = vsel %vm243_vm0, %v2504_v16, %v2505_v5  ;;  %v2677_v11 = vrot.slane %v2671_v48, 2 }
 0x18b   : > { %3141 = vst.msk [vmem:[%s4030_s20 + $0x78] sm:$0xff] %vm367_vm2, %v1561_v10  ;;  %v4817_v6 = vadd.f32 %v1718_v19, %v1701_v13  ;;  %v4819_v27 = vadd.f32 %v1716_v45, %v1700_v9  ;;  %v1913_v36 = vstv %s4808_s5  ;;  %v1842_v20 = vrot.slane %v1836_v31, 4  ;;  %s4979_s5 = sld [smem:[#allocation2 + $0x66]] }
 0x18c   : > { %3140 = vst.msk [vmem:[%s4030_s20 + $0x70] sm:$0xff] %vm367_vm2, %v1560_v34  ;;  %2663 = vrot.lane.b32.xlu1 %v4760_v25, %s3509_s30  ;;  %2661 = vrot.lane.b32.xlu0 %v4769_v22, %s3509_s30  ;;  %v2678_v22 = vrot.slane %v4813_v21, 2  ;;  %v2369_v37 = vmul.f32 %v4653_v46, %v2366_v56  ;;  %v2367_v59 = vmul.f32 %v4554_v7, %v2366_v56  ;;  %v1841_v53 = vrot.slane %v1835_v14, 4 }
 0x18d   : > { %v1726_v44 = vmul.f32 0.70710677, %v4817_v6  ;;  %v1725_v47 = vmul.f32 0.70710677, %v4819_v27  ;;  %v2847_v12 = vrot.slane %v2841_v60, 2  ;;  %v2849_v54 = vrot.slane %v2842_v3, 2 }
 0x18e   : > { %v1755_v51 = vpop.permute.xlu1 %1754  ;;  %v1753_v25 = vpop.permute.xlu0 %1752  ;;  %v2846_v18 = vrot.slane %v2840_v58, 2  ;;  %v1915_v26 = vmul.f32 %v4867_v38, %v1913_v36  ;;  %v2535_v8 = vstv %s4836_s6  ;;  %v2376_v13 = vrot.slane %v2369_v37, 4  ;;  %s5079_s6 = sld [smem:[#allocation5 + $0xc]] }
 0x18f   : > { %3353 = verf.f32 %v1726_v44  ;;  %v1759_v0 = vadd.f32 %v1755_v51, %v4771_v23  ;;  %v1758_v39 = vadd.f32 %v1753_v25, %v4775_v30  ;;  %v1844_v23 = vrot.slane %v1837_v2, 4 }
 0x190   : > { %3355 = verf.f32 %v1725_v47  ;;  %2832 = vrot.lane.b32.xlu1 %v4779_v29, %s3509_s30  ;;  %2830 = vrot.lane.b32.xlu0 %v4782_v28, %s3509_s30  ;;  %v2368_v28 = vmul.f32 %v4543_v43, %v2366_v56  ;;  %v2681_v30 = vsel %vm243_vm0, %v2678_v22, %v2680_v33  ;;  %v2373_v9 = vrot.slane %v2367_v59, 4 }
 0x191   : > { %v2679_v34 = vsel %vm243_vm0, %v2677_v11, %v2678_v22  ;;  %v1845_v19 = vsel %vm303_vm1, %v1842_v20, %v1844_v23  ;;  %v1843_v45 = vsel %vm303_vm1, %v1841_v53, %v1842_v20  ;;  %v2850_v21 = vsel %vm243_vm0, %v2847_v12, %v2849_v54 }
 0x192   : > { %v1769_v29 = vpop.permute.xlu1 %1768  ;;  %v1767_v17 = vpop.permute.xlu0 %1766  ;;  %v2374_v10 = vrot.slane %v2368_v28, 4  ;;  %v2848_v15 = vsel %vm243_vm0, %v2846_v18, %v2847_v12  ;;  %v4888_v24 = vmul.f32 %v4543_v43, %v2535_v8  ;;  %v1948_v48 = vstv %s4858_s10  ;;  %s5087_s10 = sld [smem:[#allocation2 + $0x7e]] }
 0x193   : > { %v1773_v61 = vadd.f32 %v1769_v29, %v1759_v0  ;;  %v1772_v62 = vadd.f32 %v1767_v17, %v1758_v39  ;;  %v2536_v22 = vmul.f32 %v4554_v7, %v2535_v8  ;;  %v1950_v58 = vmul.f32 %v4867_v38, %v1948_v48  ;;  %v4908_v0 = vld [vmem:[%s3621_s27 + $0x88] sm:$0xf] }
 0x194   : > { %2342 = vrot.lane.b32.xlu1 %v2339_v55, %s3508_s29  ;;  %2340 = vrot.lane.b32.xlu0 %v2337_v1, %s3508_s29  ;;  %v1916_v55 = vstv %s4842_s7  ;;  %v4876_v1 = vld [vmem:[%s3621_s27 + $0x78] sm:$0xff]  ;;  %v2375_v25 = vsel %vm303_vm1, %v2373_v9, %v2374_v10  ;;  %v2543_v60 = vrot.slane %v4888_v24, 4  ;;  %v1951_v39 = vmul.f32 %v4908_v0, %v1948_v48  ;;  %s3212_s7 = sld [smem:[#allocation2 + $0x75]] }
 0x195   : > { %v1790_v32 = vadd.f32 %v1786_v42, %v1773_v61  ;;  %v1789_v41 = vadd.f32 %v1784_v57, %v1772_v62  ;;  %v4879_v16 = vmul.f32 %v4876_v1, %v1913_v36  ;;  %v2708_v42 = vstv %s4853_s9  ;;  %s5085_s9 = sld [smem:[#allocation5 + $0xd]] }
 0x196   : > { %v1807_v5 = vpop.permute.xlu1 %1806  ;;  %v1805_v4 = vpop.permute.xlu0 %1804  ;;  %v4893_v47 = vadd.f32 %v1916_v55, %v1915_v26  ;;  %v2710_v33 = vmul.f32 %v4575_v49, %v2708_v42  ;;  %v2711_v2 = vmul.f32 %v4713_v35, %v2708_v42  ;;  %v2709_v3 = vmul.f32 %v4591_v63, %v2708_v42 }
 0x197   : > { %v1811_v57 = vadd.f32 %v1807_v5, %v1790_v32  ;;  %v1810_v44 = vadd.f32 %v1805_v4, %v1789_v41  ;;  %v1724_v36 = vmul.f32 0.5, %v4817_v6  ;;  %v1723_v28 = vmul.f32 0.5, %v4819_v27 }
 0x198   : > { %2511 = vrot.lane.b32.xlu1 %v2508_v40, %s3508_s29  ;;  %2509 = vrot.lane.b32.xlu0 %v2506_v52, %s3508_s29  ;;  %v2377_v40 = vsel %vm303_vm1, %v2374_v10, %v2376_v13  ;;  %v2538_v52 = vmul.f32 %v4653_v46, %v2535_v8  ;;  %v1949_v23 = vmul.f32 %v4876_v1, %v1948_v48  ;;  %v2716_v12 = vrot.slane %v2710_v33, 4 }
 0x199   : > { %v2877_v54 = vstv %s4881_s11  ;;  %v2718_v32 = vrot.slane %v2711_v2, 4  ;;  %v2715_v41 = vrot.slane %v2709_v3, 4  ;;  %v1956_v26 = vrot.slane %v1950_v58, 2  ;;  %s3203_s11 = sld [smem:[#allocation2 + $0x6f]] }
 0x19a   : > { %v1828_v50 = vpop.permute.xlu1 %1827  ;;  %v1826_v51 = vpop.permute.xlu0 %1825  ;;  %v2545_v62 = vrot.slane %v2538_v52, 4  ;;  %v1958_v10 = vrot.slane %v1951_v39, 2  ;;  %v1917_v24 = vadd.f32 %v1916_v55, %v4879_v16  ;;  %v2387_v48 = vstv %s4911_s17  ;;  %s3215_s17 = sld [smem:[#allocation2 + $0x78]] }
 0x19b   : > { %v1832_v31 = vadd.f32 %v1828_v50, %v1811_v57  ;;  %v1831_v56 = vadd.f32 %v1826_v51, %v1810_v44  ;;  %v2719_v57 = vsel %vm303_vm1, %v2716_v12, %v2718_v32  ;;  %v2717_v44 = vsel %vm303_vm1, %v2715_v41, %v2716_v12 }
 0x19c   : > { %v3354_v14 = vpop.eup %3353  ;;  %2684 = vrot.lane.b32.xlu1 %v2681_v30, %s3508_s29  ;;  %2682 = vrot.lane.b32.xlu0 %v2679_v34, %s3508_s29  ;;  %v2542_v30 = vrot.slane %v2536_v22, 4  ;;  %v2878_v50 = vmul.f32 %v4591_v63, %v2877_v54  ;;  %v2007_v51 = vstv %s4914_s19  ;;  %v2389_v33 = vmul.f32 %v4543_v43, %v2387_v48  ;;  %s5093_s19 = sld [smem:[#allocation5 + $0xe]] }
 0x19d   : > { %v3356_v11 = vpop.eup %3355  ;;  %v1730_v29 = vadd.f32 1.0, %v3354_v14  ;;  %v1849_v17 = vadd.f32 %v1845_v19, %v1832_v31  ;;  %v1848_v20 = vadd.f32 %v1843_v45, %v1831_v56  ;;  %v1955_v19 = vrot.slane %v1949_v23, 2 }
 0x19e   : > { %v1729_v37 = vadd.f32 1.0, %v3356_v11  ;;  %v1866_v59 = vpop.permute.xlu1 %1865  ;;  %v1864_v61 = vpop.permute.xlu0 %1863  ;;  %v4926_v45 = vmul.f32 %v4575_v49, %v2877_v54  ;;  %v2544_v42 = vsel %vm303_vm1, %v2542_v30, %v2543_v60  ;;  %v2390_v2 = vmul.f32 %v4653_v46, %v2387_v48 }
 0x19f   : > { %v1732_v53 = vmul.f32 %v1730_v29, %v1724_v36  ;;  %v1870_v5 = vadd.f32 %v1866_v59, %v1849_v17  ;;  %v1869_v4 = vadd.f32 %v1864_v61, %v1848_v20  ;;  %v2556_v14 = vstv %s4919_s24  ;;  %s5095_s24 = sld [smem:[#allocation2 + $0x87]] }
 0x1a0   : > { %v1731_v18 = vmul.f32 %v1729_v37, %v1723_v28  ;;  %2853 = vrot.lane.b32.xlu1 %v2850_v21, %s3508_s29  ;;  %2851 = vrot.lane.b32.xlu0 %v2848_v15, %s3508_s29  ;;  %v2880_v21 = vmul.f32 %v4713_v35, %v2877_v54  ;;  %v2885_v31 = vrot.slane %v4926_v45, 4  ;;  %v2009_v3 = vmul.f32 %v4867_v38, %v2007_v51 }
 0x1a1   : > { %v1734_v8 = vmul.f32 %v1732_v53, %v4817_v6  ;;  %v2010_v58 = vmul.f32 %v4908_v0, %v2007_v51  ;;  %v2884_v36 = vrot.slane %v2878_v50, 4  ;;  %v2008_v29 = vmul.f32 %v4876_v1, %v2007_v51 }
 0x1a2   : > { %v1733_v13 = vmul.f32 %v1731_v18, %v4819_v27  ;;  %v1887_v9 = vpop.permute.xlu1 %1886  ;;  %v1885_v34 = vpop.permute.xlu0 %1884  ;;  %v2546_v27 = vsel %vm303_vm1, %v2543_v60, %v2545_v62  ;;  %v2887_v56 = vrot.slane %v2880_v21, 4  ;;  %v2388_v60 = vmul.f32 %v4554_v7, %v2387_v48 }
 0x1a3   : > { %3156 = vst.msk [vmem:[%s4030_s20 + $0x88] sm:$0xff] %vm367_vm2, %v1734_v8  ;;  %v4931_v15 = vadd.f32 %v1887_v9, %v1870_v5  ;;  %v4933_v6 = vadd.f32 %v1885_v34, %v1869_v4  ;;  %v2558_v37 = vmul.f32 %v4543_v43, %v2556_v14  ;;  %v2559_v59 = vmul.f32 %v4653_v46, %v2556_v14 }
 0x1a4   : > { %3155 = vst.msk [vmem:[%s4030_s20 + $0x80] sm:$0xff] %vm367_vm2, %v1733_v13  ;;  %2380 = vrot.lane.b32.xlu1 %v2377_v40, %s3509_s30  ;;  %2378 = vrot.lane.b32.xlu0 %v2375_v25, %s3509_s30  ;;  %v1959_v40 = vsel %vm243_vm0, %v1956_v26, %v1958_v10  ;;  %v1957_v25 = vsel %vm243_vm0, %v1955_v19, %v1956_v26  ;;  %v2395_v53 = vrot.slane %v2389_v33, 4  ;;  %v2397_v30 = vrot.slane %v2390_v2, 4 }
 0x1a5   : > { %v1895_v55 = vmul.f32 0.70710677, %v4931_v15  ;;  %v1894_v16 = vmul.f32 0.70710677, %v4933_v6  ;;  %v2888_v28 = vsel %vm303_vm1, %v2885_v31, %v2887_v56  ;;  %v2557_v61 = vmul.f32 %v4554_v7, %v2556_v14 }
 0x1a6   : > { %v1928_v52 = vpop.permute.xlu1 %1927  ;;  %v1926_v22 = vpop.permute.xlu0 %1925  ;;  %v2394_v12 = vrot.slane %v2388_v60, 4  ;;  %v2015_v54 = vrot.slane %v2009_v3, 4  ;;  %v2017_v18 = vrot.slane %v2010_v58, 4  ;;  %v2886_v46 = vsel %vm303_vm1, %v2884_v36, %v2885_v31 }
 0x1a7   : > { %3357 = verf.f32 %v1895_v55  ;;  %v1932_v39 = vadd.f32 %v1928_v52, %v4893_v47  ;;  %v1931_v11 = vadd.f32 %v1926_v22, %v1917_v24  ;;  %v2729_v47 = vstv %s4939_s25  ;;  %s5101_s25 = sld [smem:[#allocation5 + $0xf]] }
 0x1a8   : > { %3359 = verf.f32 %v1894_v16  ;;  %2549 = vrot.lane.b32.xlu1 %v2546_v27, %s3509_s30  ;;  %2547 = vrot.lane.b32.xlu0 %v2544_v42, %s3509_s30  ;;  %v2014_v7 = vrot.slane %v2008_v29, 4  ;;  %v2564_v8 = vrot.slane %v2558_v37, 4  ;;  %v2566_v5 = vrot.slane %v2559_v59, 4 }
 0x1a9   : > { %v2563_v4 = vrot.slane %v2557_v61, 4  ;;  %v2731_v10 = vmul.f32 %v4575_v49, %v2729_v47  ;;  %v2732_v13 = vmul.f32 %v4713_v35, %v2729_v47  ;;  %v2730_v9 = vmul.f32 %v4591_v63, %v2729_v47 }
 0x1aa   : > { %v1942_v17 = vpop.permute.xlu1 %1941  ;;  %v1940_v20 = vpop.permute.xlu0 %1939  ;;  %v2398_v34 = vsel %vm303_vm1, %v2395_v53, %v2397_v30  ;;  %v2396_v19 = vsel %vm303_vm1, %v2394_v12, %v2395_v53  ;;  %v2018_v45 = vsel %vm303_vm1, %v2015_v54, %v2017_v18  ;;  %v2082_v21 = vstv %s4959_s26  ;;  %s5103_s26 = sld [smem:[#allocation2 + $0x81]] }
 0x1ab   : > { %v1946_v62 = vadd.f32 %v1942_v17, %v1932_v39  ;;  %v1945_v23 = vadd.f32 %v1940_v20, %v1931_v11  ;;  %v2085_v42 = vstv %s4970_s4  ;;  %v2016_v55 = vsel %vm303_vm1, %v2014_v7, %v2015_v54  ;;  %s5123_s4 = sld [smem:[#allocation2 + $0x72]] }
 0x1ac   : > { %2722 = vrot.lane.b32.xlu1 %v2719_v57, %s3509_s30  ;;  %2720 = vrot.lane.b32.xlu0 %v2717_v44, %s3509_s30  ;;  %v2898_v57 = vstv %s4966_s28  ;;  %v2567_v16 = vsel %vm303_vm1, %v2564_v8, %v2566_v5  ;;  %v2565_v50 = vsel %vm303_vm1, %v2563_v4, %v2564_v8  ;;  %v2737_v51 = vrot.slane %v2731_v10, 4  ;;  %s5106_s28 = sld [smem:[#allocation2 + $0x8a]] }
 0x1ad   : > { %v1963_v32 = vadd.f32 %v1959_v40, %v1946_v62  ;;  %v1962_v43 = vadd.f32 %v1957_v25, %v1945_v23  ;;  %v2739_v40 = vrot.slane %v2732_v13, 4  ;;  %v2736_v25 = vrot.slane %v2730_v9, 4 }
 0x1ae   : > { %v1980_v41 = vpop.permute.xlu1 %1979  ;;  %v1978_v26 = vpop.permute.xlu0 %1977  ;;  %v2900_v56 = vmul.f32 %v4575_v49, %v2898_v57  ;;  %v2901_v33 = vmul.f32 %v4713_v35, %v2898_v57  ;;  %v2899_v2 = vmul.f32 %v4591_v63, %v2898_v57  ;;  %v2117_v14 = vstv %s4979_s5  ;;  %s5135_s5 = sld [smem:[#allocation2 + $0x7b]] }
 0x1af   : > { %v1984_v24 = vadd.f32 %v1980_v41, %v1963_v32  ;;  %v1983_v27 = vadd.f32 %v1978_v26, %v1962_v43  ;;  %v1893_v3 = vmul.f32 0.5, %v4931_v15  ;;  %v1892_v36 = vmul.f32 0.5, %v4933_v6 }
 0x1b0   : > { %2891 = vrot.lane.b32.xlu1 %v2888_v28, %s3509_s30  ;;  %2889 = vrot.lane.b32.xlu0 %v2886_v46, %s3509_s30  ;;  %v2084_v28 = vmul.f32 %v4867_v38, %v2082_v21  ;;  %v2083_v49 = vmul.f32 %v4876_v1, %v2082_v21  ;;  %v2740_v35 = vsel %vm303_vm1, %v2737_v51, %v2739_v40  ;;  %s5009_s30 = sld [smem:[#allocation2 + $0x69]]  ;;  %v2906_v62 = vrot.slane %v2900_v56, 4 }
 0x1b1   : > { %v2738_v63 = vsel %vm303_vm1, %v2736_v25, %v2737_v51  ;;  %v2119_v59 = vmul.f32 %v4867_v38, %v2117_v14  ;;  %v2908_v23 = vrot.slane %v2901_v33, 4  ;;  %v2120_v53 = vmul.f32 %v4908_v0, %v2117_v14 }
 0x1b2   : > { %v2001_v44 = vpop.permute.xlu1 %2000  ;;  %v1999_v48 = vpop.permute.xlu0 %1998  ;;  %v2905_v54 = vrot.slane %v2899_v2, 4  ;;  %v2118_v46 = vmul.f32 %v4876_v1, %v2117_v14  ;;  %v2086_v26 = vadd.f32 %v2085_v42, %v2083_v49 }
 0x1b3   : > { %v2005_v52 = vadd.f32 %v2001_v44, %v1984_v24  ;;  %v2004_v22 = vadd.f32 %v1999_v48, %v1983_v27  ;;  %v2909_v8 = vsel %vm303_vm1, %v2906_v62, %v2908_v23  ;;  %v2127_v13 = vrot.slane %v2120_v53, 2 }
 0x1b4   : > { %v3358_v31 = vpop.eup %3357  ;;  %2401 = vrot.lane.b32.xlu1 %v2398_v34, %s3508_s29  ;;  %2399 = vrot.lane.b32.xlu0 %v2396_v19, %s3508_s29  ;;  %v2907_v10 = vsel %vm303_vm1, %v2905_v54, %v2906_v62  ;;  %v2124_v19 = vrot.slane %v2118_v46, 2 }
 0x1b5   : > { %v3360_v60 = vpop.eup %3359  ;;  %v1899_v58 = vadd.f32 1.0, %v3358_v31  ;;  %v2022_v39 = vadd.f32 %v2018_v45, %v2005_v52  ;;  %v2021_v11 = vadd.f32 %v2016_v55, %v2004_v22 }
 0x1b6   : > { %v1898_v29 = vadd.f32 1.0, %v3360_v60  ;;  %v2039_v17 = vpop.permute.xlu1 %2038  ;;  %v2037_v20 = vpop.permute.xlu0 %2036  ;;  %v2176_v45 = vstv %s5009_s30  ;;  %s5171_s30 = sld [smem:[#allocation2 + $0x84]] }
 0x1b7   : > { %v1901_v37 = vmul.f32 %v1899_v58, %v1893_v3  ;;  %v2043_v30 = vadd.f32 %v2039_v17, %v2022_v39  ;;  %v2042_v12 = vadd.f32 %v2037_v20, %v2021_v11  ;;  %v2178_v48 = vmul.f32 %v4867_v38, %v2176_v45 }
 0x1b8   : > { %v1900_v61 = vmul.f32 %v1898_v29, %v1892_v36  ;;  %2570 = vrot.lane.b32.xlu1 %v2567_v16, %s3508_s29  ;;  %2568 = vrot.lane.b32.xlu0 %v2565_v50, %s3508_s29  ;;  %v2179_v55 = vmul.f32 %v4908_v0, %v2176_v45  ;;  %v2177_v16 = vmul.f32 %v4876_v1, %v2176_v45 }
 0x1b9   : > { %v1903_v47 = vmul.f32 %v1901_v37, %v4931_v15  ;;  %v2087_v15 = vadd.f32 %v2085_v42, %v2084_v28  ;;  %v2184_v31 = vrot.slane %v2178_v48, 4 }
 0x1ba   : > { %v1902_v18 = vmul.f32 %v1900_v61, %v4933_v6  ;;  %v2060_v32 = vpop.permute.xlu1 %2059  ;;  %v2058_v43 = vpop.permute.xlu0 %2057  ;;  %v2125_v6 = vrot.slane %v2119_v59, 2  ;;  %v2186_v56 = vrot.slane %v2179_v55, 4  ;;  %v2183_v33 = vrot.slane %v2177_v16, 4 }
 0x1bb   : > { %3168 = vst.msk [vmem:[%s4030_s20 + $0x98] sm:$0xff] %vm367_vm2, %v1903_v47  ;;  %v2064_v7 = vadd.f32 %v2060_v32, %v2043_v30  ;;  %v2063_v41 = vadd.f32 %v2058_v43, %v2042_v12 }
 0x1bc   : > { %3167 = vst.msk [vmem:[%s4030_s20 + $0x90] sm:$0xff] %vm367_vm2, %v1902_v18  ;;  %2743 = vrot.lane.b32.xlu1 %v2740_v35, %s3508_s29  ;;  %2741 = vrot.lane.b32.xlu0 %v2738_v63, %s3508_s29  ;;  %v2128_v27 = vsel %vm243_vm0, %v2125_v6, %v2127_v13  ;;  %v2126_v44 = vsel %vm243_vm0, %v2124_v19, %v2125_v6 }
 0x1bd   : > { %v2068_v5 = vmul.f32 0.70710677, %v2064_v7  ;;  %v2067_v4 = vmul.f32 0.70710677, %v2063_v41  ;;  %v2187_v58 = vsel %vm303_vm1, %v2184_v31, %v2186_v56  ;;  %v2185_v38 = vsel %vm303_vm1, %v2183_v33, %v2184_v31 }
 0x1be   : > { %v2097_v9 = vpop.permute.xlu1 %2096  ;;  %v2095_v34 = vpop.permute.xlu0 %2094  ;;  %v2066_v36 = vmul.f32 0.5, %v2064_v7  ;;  %v2065_v28 = vmul.f32 0.5, %v2063_v41 }
 0x1bf   : > { %3361 = verf.f32 %v2068_v5  ;;  %v2101_v21 = vadd.f32 %v2097_v9, %v2087_v15  ;;  %v2100_v24 = vadd.f32 %v2095_v34, %v2086_v26 }
 0x1c0   : > { %3363 = verf.f32 %v2067_v4  ;;  %2912 = vrot.lane.b32.xlu1 %v2909_v8, %s3508_s29  ;;  %2910 = vrot.lane.b32.xlu0 %v2907_v10, %s3508_s29  ;;  %s3200_s29 = sld [smem:[#allocation2 + $0x6c]] }
 0x1c2   : > { %v2111_v42 = vpop.permute.xlu1 %2110  ;;  %v2109_v57 = vpop.permute.xlu0 %2108 }
 0x1c3   : > { %v2115_v50 = vadd.f32 %v2111_v42, %v2101_v21  ;;  %v2114_v51 = vadd.f32 %v2109_v57, %v2100_v24 }
 0x1c5   : > { %v2132_v52 = vadd.f32 %v2128_v27, %v2115_v50  ;;  %v2131_v22 = vadd.f32 %v2126_v44, %v2114_v51 }
 0x1c6   : > { %v2149_v40 = vpop.permute.xlu1 %2148  ;;  %v2147_v25 = vpop.permute.xlu0 %2146 }
 0x1c7   : > { %v2153_v2 = vadd.f32 %v2149_v40, %v2132_v52  ;;  %v2152_v14 = vadd.f32 %v2147_v25, %v2131_v22 }
 0x1ca   : > { %v2170_v60 = vpop.permute.xlu1 %2169  ;;  %v2168_v3 = vpop.permute.xlu0 %2167 }
 0x1cb   : > { %v2174_v0 = vadd.f32 %v2170_v60, %v2153_v2  ;;  %v2173_v39 = vadd.f32 %v2168_v3, %v2152_v14  ;;  %v2255_v2 = vstv %s3200_s29  ;;  %v2424_v14 = vstv %s3212_s7  ;;  %v5109_v3 = vld [vmem:[%s3621_s27 + $0x98] sm:$0xff]  ;;  %s3255_s29 = sshll.u32 %s3554_s16, 12  ;;  %s5292_s16 = scalar_lea.sflag [#allocation3], %s188_s8 }
 0x1cc   : > { %v3362_v1 = vpop.eup %3361  ;;  %v2597_v60 = vstv %s5087_s10  ;;  %s5282_s10 = scalar_lea.hbm %s5335_s3, %s3255_s29 }
 0x1cd   : > { %v3364_v11 = vpop.eup %3363  ;;  %v2072_v29 = vadd.f32 1.0, %v3362_v1  ;;  %v2191_v17 = vadd.f32 %v2187_v58, %v2174_v0  ;;  %v2190_v20 = vadd.f32 %v2185_v38, %v2173_v39  ;;  %v2257_v58 = vmul.f32 %v5109_v3, %v2255_v2 }
 0x1ce   : > { %v2071_v49 = vadd.f32 1.0, %v3364_v11  ;;  %v2208_v37 = vpop.permute.xlu1 %2207  ;;  %v2206_v35 = vpop.permute.xlu0 %2205  ;;  %v2258_v38 = vstv %s5079_s6  ;;  %v2290_v0 = vstv %s3203_s11  ;;  %v5118_v11 = vld [vmem:[%s3621_s27 + $0x90] sm:$0xff]  ;;  %s2947_s6 = sshll.u32 %s4030_s20, 4  ;;  %s5284_s6 = int_to_ptr.vmem [resolvable:$true] %s2947_s6 }
 0x1cf   : > { %v2074_v63 = vmul.f32 %v2072_v29, %v2066_v36  ;;  %v2212_v62 = vadd.f32 %v2208_v37, %v2191_v17  ;;  %v2211_v23 = vadd.f32 %v2206_v35, %v2190_v20  ;;  %v2256_v36 = vmul.f32 %v5118_v11, %v2255_v2  ;;  %s3436_s11 = scalar_lea.vmem %s5284_s6, 4096 }
 0x1d0   : > { %v2073_v59 = vmul.f32 %v2071_v49, %v2065_v28  ;;  %v2426_v29 = vmul.f32 %v5109_v3, %v2424_v14  ;;  %v2425_v17 = vmul.f32 %v5118_v11, %v2424_v14  ;;  %v2459_v20 = vstv %s3215_s17  ;;  %v5127_v49 = vld [vmem:[%s3621_s27 + $0xb0] sm:$0xff]  ;;  %p3437_p10 = scmp.ne.s32.totalorder %s5284_s6, %s3436_s11  ;;  %s3510_s17 = smov [#allocation7]  }
 0x1d1   : > { %v2076_v61 = vmul.f32 %v2074_v63, %v2064_v7  ;;  %v2427_v28 = vstv %s5085_s9  ;;  %v2599_v37 = vmul.f32 %v5127_v49, %v2597_v60  ;;  %v2600_v35 = vstv %s5093_s19  ;;  %s3440_s19 = sshll.u32 %s3510_s17, 4  ;;  %s3441_s19 = int_to_ptr.vmem [resolvable:$false] %s3440_s19 }
 0x1d2   : > { %v2075_v53 = vmul.f32 %v2073_v59, %v2063_v41  ;;  %v2229_v47 = vpop.permute.xlu1 %2228  ;;  %v2227_v30 = vpop.permute.xlu0 %2226  ;;  %v2766_v63 = vstv %s5095_s24  ;;  %v2292_v59 = vmul.f32 %v5109_v3, %v2290_v0  ;;  %v2801_v14 = vstv %s5106_s28  ;;  %p3438_p0 = pnand %p3437_p10, %p5368_p12  ;;  %s3442_s24 = scalar_lea.vmem %s3441_s19, 8192 }
 0x1d3   : > { %3183 = vst.msk [vmem:[%s4030_s20 + $0xa8] sm:$0xff] %vm367_vm2, %v2076_v61  ;;  %v2233_v12 = vadd.f32 %v2229_v47, %v2212_v62  ;;  %v2232_v54 = vadd.f32 %v2227_v30, %v2211_v23  ;;  %v3403_v61 = vld [vmem:[%s3621_s27 + $0xa0] sm:$0xf]  ;;  %v2291_v23 = vmul.f32 %v5118_v11, %v2290_v0  ;;  %v5138_v47 = vld [vmem:[%s3621_s27 + $0xa8] sm:$0xff]  ;;  %p3443_p8 = scmp.lt.s32.totalorder %s5284_s6, %s3441_s19  ;;  %p3444_p11 = scmp.lt.s32.totalorder %s3442_s24, %s3436_s11 }
 0x1d4   : > { %3182 = vst.msk [vmem:[%s4030_s20 + $0xa0] sm:$0xff] %vm367_vm2, %v2075_v53  ;;  %v2293_v62 = vmul.f32 %v3403_v61, %v2290_v0  ;;  %v2260_v53 = vadd.f32 %v2258_v38, %v2257_v58  ;;  %v2598_v30 = vmul.f32 %v5138_v47, %v2597_v60  ;;  %v2460_v0 = vmul.f32 %v5118_v11, %v2459_v20  ;;  %p3439_p7 = pneg %p3438_p0 }
 0x1d5   : > { %v2237_v18 = vmul.f32 0.70710677, %v2233_v12  ;;  %v2236_v32 = vmul.f32 0.70710677, %v2232_v54  ;;  %v2235_v10 = vmul.f32 0.5, %v2233_v12  ;;  %v2234_v9 = vmul.f32 0.5, %v2232_v54  ;;  %p3445_p13 = por %p3444_p11, %p3443_p8 }
 0x1d6   : > { %v5039_v43 = vpop.permute.xlu1 %2269  ;;  %v5041_v46 = vpop.permute.xlu0 %2267  ;;  %v2297_v2 = vrot.slane %v2291_v23, 2  ;;  %v5157_v60 = vadd.f32 %v2600_v35, %v2598_v30 }
 0x1d7   : > { %3365 = verf.f32 %v2237_v18  ;;  %p3446_p1 = pnand %p3445_p13, %p3439_p7 }
 0x1d8   : > { %3367 = verf.f32 %v2236_v32 }
 0x1da   : > { %v5043_v7 = vpop.permute.xlu1 %2438  ;;  %v5045_v15 = vpop.permute.xlu0 %2436 }
 0x1de   : > { %v5047_v41 = vpop.permute.xlu1 %2611  ;;  %v5049_v26 = vpop.permute.xlu0 %2609 }
 0x1e2   : > { %v5051_v8 = vpop.permute.xlu1 %2780  ;;  %v5053_v6 = vpop.permute.xlu0 %2778 }
 0x1e4   : > { %v3366_v5 = vpop.eup %3365 }
 0x1e5   : > { %v3368_v4 = vpop.eup %3367  ;;  %v2241_v13 = vadd.f32 1.0, %v3366_v5  ;;  %v2259_v5 = vadd.f32 %v2258_v38, %v2256_v36 }
 0x1e6   : > { %v2240_v34 = vadd.f32 1.0, %v3368_v4  ;;  %v5055_v19 = vpop.permute.xlu1 %2283  ;;  %v5057_v45 = vpop.permute.xlu0 %2281  ;;  %v5146_v4 = vadd.f32 %v2427_v28, %v2426_v29 }
 0x1e7   : > { %v2243_v21 = vmul.f32 %v2241_v13, %v2235_v10  ;;  %v5148_v10 = vadd.f32 %v2427_v28, %v2425_v17  ;;  %v2769_v13 = vstv %s5101_s25  ;;  %v5166_v28 = vld [vmem:[%s3621_s27 + $0xb8] sm:$0xf]  ;;  %s5194_s27 = sld [smem:[#allocation2 + $0x8d]] }
 0x1e8   : > { %v2242_v24 = vmul.f32 %v2240_v34, %v2234_v9  ;;  %v5151_v9 = vadd.f32 %v2600_v35, %v2599_v37  ;;  %v2768_v34 = vmul.f32 %v5127_v49, %v2766_v63  ;;  %v2804_v23 = vmul.f32 %v5166_v28, %v2801_v14 }
 0x1e9   : > { %v2245_v27 = vmul.f32 %v2243_v21, %v2233_v12  ;;  %v2461_v12 = vmul.f32 %v5109_v3, %v2459_v20  ;;  %v2767_v21 = vmul.f32 %v5138_v47, %v2766_v63 }
 0x1ea   : > { %v2244_v42 = vmul.f32 %v2242_v24, %v2232_v54  ;;  %v5059_v57 = vpop.permute.xlu1 %2452  ;;  %v5061_v44 = vpop.permute.xlu0 %2450  ;;  %v2462_v54 = vmul.f32 %v3403_v61, %v2459_v20  ;;  %v2632_v24 = vstv %s5103_s26  ;;  %v5173_v35 = vadd.f32 %v2769_v13, %v2768_v34 }
 0x1eb   : > { %3195 = vst.msk [vmem:[%s4030_s20 + $0xb8] sm:$0xff] %vm367_vm2, %v2245_v27  ;;  %v2298_v27 = vrot.slane %v2292_v59, 2  ;;  %v2467_v58 = vrot.slane %v2461_v12, 2  ;;  %v2634_v17 = vmul.f32 %v5127_v49, %v2632_v24  ;;  %v2635_v37 = vmul.f32 %v5166_v28, %v2632_v24 }
 0x1ec   : > { %3194 = vst.msk [vmem:[%s4030_s20 + $0xb0] sm:$0xff] %vm367_vm2, %v2244_v42  ;;  %v2300_v42 = vrot.slane %v2293_v62, 2  ;;  %v2469_v38 = vrot.slane %v2462_v54, 2  ;;  %v2633_v63 = vmul.f32 %v5138_v47, %v2632_v24  ;;  %v2349_v59 = vstv %s5123_s4 }
 0x1ed   : > { %v5175_v62 = vadd.f32 %v2769_v13, %v2767_v21  ;;  %v2803_v20 = vmul.f32 %v5127_v49, %v2801_v14  ;;  %v2299_v12 = vsel %vm243_vm0, %v2297_v2, %v2298_v27  ;;  %v2802_v54 = vmul.f32 %v5138_v47, %v2801_v14 }
 0x1ee   : > { %v5067_v48 = vpop.permute.xlu1 %2625  ;;  %v5069_v55 = vpop.permute.xlu0 %2623  ;;  %v2301_v30 = vsel %vm243_vm0, %v2298_v27, %v2300_v42  ;;  %v2351_v34 = vmul.f32 %v5109_v3, %v2349_v59  ;;  %v2352_v13 = vmul.f32 %v3403_v61, %v2349_v59  ;;  %v2350_v21 = vmul.f32 %v5118_v11, %v2349_v59 }
 0x1ef   : > { %v2639_v42 = vrot.slane %v2633_v63, 2  ;;  %v2811_v27 = vrot.slane %v2804_v23, 2 }
 0x1f0   : > { %v2356_v59 = vrot.slane %v2350_v21, 4 }
 0x1f2   : > { %v5071_v16 = vpop.permute.xlu1 %2794  ;;  %v5073_v50 = vpop.permute.xlu0 %2792 }
 0x1f6   : > { %v5075_v51 = vpop.permute.xlu1 %2321  ;;  %v5077_v52 = vpop.permute.xlu0 %2319 }
 0x1fa   : > { %v5081_v22 = vpop.permute.xlu1 %2490  ;;  %v5083_v40 = vpop.permute.xlu0 %2488 }
 0x1fe   : > { %v5089_v25 = vpop.permute.xlu1 %2663  ;;  %v5091_v31 = vpop.permute.xlu0 %2661 }
 0x1ff   : > { %5348 = vst [vmem:[#allocation11_spill] sm:$0xff] %v5089_v25  ;;  %5349 = vst [vmem:[#allocation12_spill] sm:$0xff] %v5091_v31  ;;  %v2640_v31 = vrot.slane %v2634_v17, 2  ;;  %v2642_v25 = vrot.slane %v2635_v37, 2  ;;  %v2357_v17 = vrot.slane %v2351_v34, 4  ;;  %v2359_v37 = vrot.slane %v2352_v13, 4 }
 0x202   : > { %v5097_v56 = vpop.permute.xlu1 %2832  ;;  %v5099_v33 = vpop.permute.xlu0 %2830 }
 0x203   : > { %5350 = vst [vmem:[#allocation13_spill] sm:$0xff] %v5097_v56  ;;  %5351 = vst [vmem:[#allocation14_spill] sm:$0xff] %v5099_v33  ;;  %v2518_v33 = vstv %s5135_s5  ;;  %v2466_v56 = vrot.slane %v2460_v0, 2  ;;  %v2274_v0 = vadd.f32 %v5039_v43, %v2260_v53 }
 0x204   : > { %v2520_v2 = vmul.f32 %v5109_v3, %v2518_v33  ;;  %v2521_v14 = vmul.f32 %v3403_v61, %v2518_v33  ;;  %v2691_v61 = vstv %s5171_s30 }
 0x205   : > { %v2288_v3 = vadd.f32 %v5055_v19, %v2274_v0  ;;  %v2694_v34 = vmul.f32 %v5166_v28, %v2691_v61  ;;  %v2692_v13 = vmul.f32 %v5138_v47, %v2691_v61 }
 0x206   : > { %v5113_v39 = vpop.permute.xlu1 %2342  ;;  %v5115_v1 = vpop.permute.xlu0 %2340  ;;  %v2526_v53 = vrot.slane %v2520_v2, 4 }
 0x20a   : > { %v5142_v18 = vpop.permute.xlu1 %2511  ;;  %v5144_v32 = vpop.permute.xlu0 %2509 }
 0x20b   : > { %5352 = vst [vmem:[#allocation15_spill] sm:$0xff] %v5142_v18  ;;  %5353 = vst [vmem:[#allocation16_spill] sm:$0xff] %v5144_v32  ;;  %v2809_v32 = vrot.slane %v2803_v20, 2  ;;  %v2519_v18 = vmul.f32 %v5118_v11, %v2518_v33  ;;  %v2641_v33 = vsel %vm243_vm0, %v2639_v42, %v2640_v31 }
 0x20d   : > { %v2812_v11 = vsel %vm243_vm0, %v2809_v32, %v2811_v27  ;;  %v2525_v19 = vrot.slane %v2519_v18, 4  ;;  %v2616_v18 = vadd.f32 %v5047_v41, %v5151_v9  ;;  %v2860_v27 = vstv %s5194_s27 }
 0x20e   : > { %v5160_v36 = vpop.permute.xlu1 %2684  ;;  %v5162_v29 = vpop.permute.xlu0 %2682  ;;  %v2701_v41 = vrot.slane %v2694_v34, 4 }
 0x20f   : > { %5354 = vst [vmem:[#allocation17_spill] sm:$0xff] %v5160_v36  ;;  %5355 = vst [vmem:[#allocation18_spill] sm:$0xff] %v5162_v29  ;;  %v2470_v36 = vsel %vm243_vm0, %v2467_v58, %v2469_v38  ;;  %v2468_v38 = vsel %vm243_vm0, %v2466_v56, %v2467_v58  ;;  %v2528_v56 = vrot.slane %v2521_v14, 4  ;;  %v2442_v58 = vadd.f32 %v5045_v15, %v5148_v10 }
 0x210   : > { %v2615_v10 = vadd.f32 %v5049_v26, %v5157_v60 }
 0x211   : > { %v2456_v15 = vadd.f32 %v5061_v44, %v2442_v58  ;;  %v2630_v44 = vadd.f32 %v5067_v48, %v2616_v18  ;;  %v2862_v48 = vmul.f32 %v5127_v49, %v2860_v27 }
 0x212   : > { %v5183_v24 = vpop.permute.xlu1 %2853  ;;  %v5185_v29 = vpop.permute.xlu0 %2851 }
 0x213   : > { %5356 = vst [vmem:[#allocation19_spill] sm:$0xff] %v5183_v24  ;;  %5357 = vst [vmem:[#allocation20_spill] sm:$0xff] %v5185_v29  ;;  %v2273_v29 = vadd.f32 %v5041_v46, %v2259_v5  ;;  %v2808_v24 = vrot.slane %v2802_v54, 2  ;;  %v2643_v46 = vsel %vm243_vm0, %v2640_v31, %v2642_v25  ;;  %v2443_v5 = vadd.f32 %v5043_v7, %v5146_v4 }
 0x214   : > { %v2358_v25 = vsel %vm303_vm1, %v2356_v59, %v2357_v17  ;;  %v2693_v54 = vmul.f32 %v5127_v49, %v2691_v61  ;;  %v2305_v4 = vadd.f32 %v2301_v30, %v2288_v3  ;;  %v2629_v30 = vadd.f32 %v5069_v55, %v2615_v10 }
 0x215   : > { %v2287_v43 = vadd.f32 %v5057_v45, %v2273_v29  ;;  %v2810_v23 = vsel %vm243_vm0, %v2808_v24, %v2809_v32  ;;  %v2360_v45 = vsel %vm303_vm1, %v2357_v17, %v2359_v37  ;;  %v2457_v7 = vadd.f32 %v5059_v57, %v2443_v5 }
 0x216   : > { %v5197_v63 = vpop.permute.xlu1 %2380  ;;  %v5199_v20 = vpop.permute.xlu0 %2378  ;;  %v2529_v24 = vsel %vm303_vm1, %v2526_v53, %v2528_v56  ;;  %v2326_v21 = vadd.f32 %v5075_v51, %v2305_v4  ;;  %v2527_v57 = vsel %vm303_vm1, %v2525_v19, %v2526_v53  ;;  %v2473_v60 = vadd.f32 %v2468_v38, %v2456_v15  ;;  %v5360_v53 = vld [vmem:[#allocation11_spill] sm:$0xff]  ;;  %v5361_v56 = vld [vmem:[#allocation12_spill] sm:$0xff] }
 0x217   : > { %v2304_v32 = vadd.f32 %v2299_v12, %v2287_v43  ;;  %v2699_v12 = vrot.slane %v2693_v54, 4  ;;  %v2474_v26 = vadd.f32 %v2470_v36, %v2457_v7  ;;  %v2785_v51 = vadd.f32 %v5051_v8, %v5173_v35  ;;  %v5359_v43 = vld [vmem:[#allocation16_spill] sm:$0xff]  ;;  %v5362_v54 = vld [vmem:[#allocation17_spill] sm:$0xff] }
 0x218   : > { %v2347_v14 = vadd.f32 %v5113_v39, %v2326_v21  ;;  %v2698_v17 = vrot.slane %v2692_v13, 4  ;;  %v2494_v37 = vadd.f32 %v5083_v40, %v2473_v60  ;;  %v2863_v36 = vmul.f32 %v5166_v28, %v2860_v27  ;;  %v5364_v13 = vld [vmem:[#allocation13_spill] sm:$0xff] }
 0x219   : > { %v2325_v42 = vadd.f32 %v5077_v52, %v2304_v32  ;;  %v2784_v52 = vadd.f32 %v5053_v6, %v5175_v62  ;;  %v2495_v55 = vadd.f32 %v5081_v22, %v2474_v26  ;;  %v2861_v38 = vmul.f32 %v5138_v47, %v2860_v27  ;;  %v5358_v6 = vld [vmem:[#allocation15_spill] sm:$0xff] }
 0x21a   : > { %v5214_v29 = vpop.permute.xlu1 %2549  ;;  %v5216_v31 = vpop.permute.xlu0 %2547  ;;  %v2799_v39 = vadd.f32 %v5071_v16, %v2785_v51  ;;  %v2647_v59 = vadd.f32 %v2643_v46, %v2630_v44  ;;  %v2646_v8 = vadd.f32 %v2641_v33, %v2629_v30  ;;  %v2515_v49 = vadd.f32 %v5359_v43, %v2494_v37  ;;  %v5366_v30 = vld [vmem:[#allocation19_spill] sm:$0xff] }
 0x21b   : > { %v2346_v0 = vadd.f32 %v5115_v1, %v2325_v42  ;;  %v2798_v1 = vadd.f32 %v5073_v50, %v2784_v52  ;;  %v2516_v62 = vadd.f32 %v5358_v6, %v2495_v55  ;;  %v2364_v61 = vadd.f32 %v2360_v45, %v2347_v14  ;;  %v5363_v45 = vld [vmem:[#allocation18_spill] sm:$0xff]  ;;  %v5367_v14 = vld [vmem:[#allocation20_spill] sm:$0xff] }
 0x21c   : > { %v2668_v40 = vadd.f32 %v5360_v53, %v2647_v59  ;;  %v2667_v28 = vadd.f32 %v5361_v56, %v2646_v8  ;;  %v2702_v47 = vsel %vm303_vm1, %v2699_v12, %v2701_v41  ;;  %v2700_v16 = vsel %vm303_vm1, %v2698_v17, %v2699_v12  ;;  %v5365_v42 = vld [vmem:[#allocation14_spill] sm:$0xff] }
 0x21d   : > { %v2363_v22 = vadd.f32 %v2358_v25, %v2346_v0  ;;  %v2385_v50 = vadd.f32 %v5197_v63, %v2364_v61  ;;  %v2868_v33 = vrot.slane %v2862_v48, 4  ;;  %v2870_v5 = vrot.slane %v2863_v36, 4 }
 0x21e   : > { %v2723_v9 = vpop.permute.xlu1 %2722  ;;  %v2721_v2 = vpop.permute.xlu0 %2720  ;;  %v2816_v58 = vadd.f32 %v2812_v11, %v2799_v39  ;;  %v2815_v19 = vadd.f32 %v2810_v23, %v2798_v1  ;;  %v2689_v34 = vadd.f32 %v5362_v54, %v2668_v40  ;;  %v2688_v25 = vadd.f32 %v5363_v45, %v2667_v28 }
 0x21f   : > { %v2384_v46 = vadd.f32 %v5199_v20, %v2363_v22  ;;  %v2533_v4 = vadd.f32 %v2529_v24, %v2516_v62  ;;  %v2532_v32 = vadd.f32 %v2527_v57, %v2515_v49  ;;  %v2867_v27 = vrot.slane %v2861_v38, 4 }
 0x220   : > { %v2837_v21 = vadd.f32 %v5364_v13, %v2816_v58  ;;  %v2836_v63 = vadd.f32 %v5365_v42, %v2815_v19  ;;  %v2706_v41 = vadd.f32 %v2702_v47, %v2689_v34  ;;  %v2705_v26 = vadd.f32 %v2700_v16, %v2688_v25 }
 0x221   : > { %v2554_v20 = vadd.f32 %v5214_v29, %v2533_v4  ;;  %v2553_v11 = vadd.f32 %v5216_v31, %v2532_v32  ;;  %v2871_v24 = vsel %vm303_vm1, %v2868_v33, %v2870_v5  ;;  %v2869_v17 = vsel %vm303_vm1, %v2867_v27, %v2868_v33 }
 0x222   : > { %v2892_v35 = vpop.permute.xlu1 %2891  ;;  %v2890_v3 = vpop.permute.xlu0 %2889  ;;  %v2858_v12 = vadd.f32 %v5366_v30, %v2837_v21  ;;  %v2857_v0 = vadd.f32 %v5367_v14, %v2836_v63  ;;  %v2727_v29 = vadd.f32 %v2723_v9, %v2706_v41  ;;  %v2726_v31 = vadd.f32 %v2721_v2, %v2705_v26 }
 0x224   : > { %v2875_v37 = vadd.f32 %v2871_v24, %v2858_v12  ;;  %v2874_v39 = vadd.f32 %v2869_v17, %v2857_v0 }
 0x226   : > { %v2402_v7 = vpop.permute.xlu1 %2401  ;;  %v2400_v15 = vpop.permute.xlu0 %2399  ;;  %v2896_v8 = vadd.f32 %v2892_v35, %v2875_v37  ;;  %v2895_v6 = vadd.f32 %v2890_v3, %v2874_v39 }
 0x227   : > { %v2406_v18 = vadd.f32 %v2402_v7, %v2385_v50  ;;  %v2405_v10 = vadd.f32 %v2400_v15, %v2384_v46 }
 0x229   : > { %v2410_v23 = vmul.f32 0.70710677, %v2406_v18  ;;  %v2409_v44 = vmul.f32 0.70710677, %v2405_v10  ;;  %v2408_v28 = vmul.f32 0.5, %v2406_v18  ;;  %v2407_v35 = vmul.f32 0.5, %v2405_v10 }
 0x22a   : > { %v2571_v57 = vpop.permute.xlu1 %2570  ;;  %v2569_v60 = vpop.permute.xlu0 %2568 }
 0x22b   : > { %3369 = verf.f32 %v2410_v23  ;;  %v2575_v51 = vadd.f32 %v2571_v57, %v2554_v20  ;;  %v2574_v52 = vadd.f32 %v2569_v60, %v2553_v11 }
 0x22c   : > { %3371 = verf.f32 %v2409_v44 }
 0x22d   : > { %v2579_v48 = vmul.f32 0.70710677, %v2575_v51  ;;  %v2578_v55 = vmul.f32 0.70710677, %v2574_v52  ;;  %v2577_v58 = vmul.f32 0.5, %v2575_v51  ;;  %v2576_v34 = vmul.f32 0.5, %v2574_v52 }
 0x22e   : > { %v2744_v36 = vpop.permute.xlu1 %2743  ;;  %v2742_v38 = vpop.permute.xlu0 %2741 }
 0x22f   : > { %3373 = verf.f32 %v2579_v48  ;;  %v2748_v1 = vadd.f32 %v2744_v36, %v2727_v29  ;;  %v2747_v59 = vadd.f32 %v2742_v38, %v2726_v31 }
 0x230   : > { %3375 = verf.f32 %v2578_v55 }
 0x231   : > { %v2752_v62 = vmul.f32 0.70710677, %v2748_v1  ;;  %v2751_v43 = vmul.f32 0.70710677, %v2747_v59  ;;  %v2750_v13 = vmul.f32 0.5, %v2748_v1  ;;  %v2749_v42 = vmul.f32 0.5, %v2747_v59 }
 0x232   : > { %v2913_v49 = vpop.permute.xlu1 %2912  ;;  %v2911_v61 = vpop.permute.xlu0 %2910 }
 0x233   : > { %3377 = verf.f32 %v2752_v62  ;;  %v2917_v22 = vadd.f32 %v2913_v49, %v2896_v8  ;;  %v2916_v9 = vadd.f32 %v2911_v61, %v2895_v6 }
 0x234   : > { %3379 = verf.f32 %v2751_v43 }
 0x235   : > { %v2921_v2 = vmul.f32 0.70710677, %v2917_v22  ;;  %v2920_v53 = vmul.f32 0.70710677, %v2916_v9  ;;  %v2919_v44 = vmul.f32 0.5, %v2917_v22  ;;  %v2918_v41 = vmul.f32 0.5, %v2916_v9 }
 0x237   : > { %3381 = verf.f32 %v2921_v2 }
 0x238   : > { %v3370_v40 = vpop.eup %3369  ;;  %3383 = verf.f32 %v2920_v53 }
 0x239   : > { %v3372_v56 = vpop.eup %3371  ;;  %v2414_v47 = vadd.f32 1.0, %v3370_v40 }
 0x23a   : > { %v2413_v3 = vadd.f32 1.0, %v3372_v56 }
 0x23b   : > { %v2416_v16 = vmul.f32 %v2414_v47, %v2408_v28 }
 0x23c   : > { %v3374_v50 = vpop.eup %3373  ;;  %v2415_v46 = vmul.f32 %v2413_v3, %v2407_v35 }
 0x23d   : > { %v3376_v33 = vpop.eup %3375  ;;  %v2418_v5 = vmul.f32 %v2416_v16, %v2406_v18  ;;  %v2583_v19 = vadd.f32 1.0, %v3374_v50 }
 0x23e   : > { %v2417_v54 = vmul.f32 %v2415_v46, %v2405_v10  ;;  %v2582_v45 = vadd.f32 1.0, %v3376_v33 }
 0x23f   : > { %3210 = vst.msk [vmem:[%s4030_s20 + $0xc8] sm:$0xff] %vm367_vm2, %v2418_v5  ;;  %v2585_v25 = vmul.f32 %v2583_v19, %v2577_v58 }
 0x240   : > { %v3378_v7 = vpop.eup %3377  ;;  %3209 = vst.msk [vmem:[%s4030_s20 + $0xc0] sm:$0xff] %vm367_vm2, %v2417_v54  ;;  %v2584_v15 = vmul.f32 %v2582_v45, %v2576_v34 }
 0x241   : > { %v3380_v4 = vpop.eup %3379  ;;  %v2587_v32 = vmul.f32 %v2585_v25, %v2575_v51  ;;  %v2756_v21 = vadd.f32 1.0, %v3378_v7 }
 0x242   : > { %v2586_v18 = vmul.f32 %v2584_v15, %v2574_v52  ;;  %v2755_v10 = vadd.f32 1.0, %v3380_v4 }
 0x243   : > { %3222 = vst.msk [vmem:[%s4030_s20 + $0xd8] sm:$0xff] %vm367_vm2, %v2587_v32  ;;  %v2758_v63 = vmul.f32 %v2756_v21, %v2750_v13 }
 0x244   : > { %v3382_v27 = vpop.eup %3381  ;;  %3221 = vst.msk [vmem:[%s4030_s20 + $0xd0] sm:$0xff] %vm367_vm2, %v2586_v18  ;;  %v2757_v20 = vmul.f32 %v2755_v10, %v2749_v42 }
 0x245   : > { %v3384_v11 = vpop.eup %3383  ;;  %v2760_v23 = vmul.f32 %v2758_v63, %v2748_v1  ;;  %v2925_v30 = vadd.f32 1.0, %v3382_v27 }
 0x246   : > { %v2759_v12 = vmul.f32 %v2757_v20, %v2747_v59  ;;  %v2924_v26 = vadd.f32 1.0, %v3384_v11 }
 0x247   : > { %3237 = vst.msk [vmem:[%s4030_s20 + $0xe8] sm:$0xff] %vm367_vm2, %v2760_v23  ;;  %v2927_v24 = vmul.f32 %v2925_v30, %v2919_v44 }
 0x248   : > { %3236 = vst.msk [vmem:[%s4030_s20 + $0xe0] sm:$0xff] %vm367_vm2, %v2759_v12  ;;  %v2926_v57 = vmul.f32 %v2924_v26, %v2918_v41 }
 0x249   : > { %v2929_v60 = vmul.f32 %v2927_v24, %v2917_v22 }
 0x24a   : > { %v2928_v14 = vmul.f32 %v2926_v57, %v2916_v9 }
 0x24b   : > { %3249 = vst.msk [vmem:[%s4030_s20 + $0xf8] sm:$0xff] %vm367_vm2, %v2929_v60 }
 0x24c   : > { %3248 = vst.msk [vmem:[%s4030_s20 + $0xf0] sm:$0xff] %vm367_vm2, %v2928_v14 }
 0x24d   : > { %3449 = shalt.err (!%p3446_p1)
}
 0x24e   : > { %s3450_s8 = scalar_lea.hbm %s5282_s10, 4096  ;;  %s3454_s26 = scalar_lea.hbm %s5335_s3, 8192 }
 0x24f   : > { %p3451_p2 = scmp.ne.s32.totalorder %s5282_s10, %s3450_s8  ;;  %p3455_p9 = scmp.lt.s32.totalorder %s5282_s10, %s5335_s3 }
 0x250   : > { %p3456_p5 = scmp.lt.s32.totalorder %s3454_s26, %s3450_s8 }
 0x251   : > { %p3452_p3 = pnand %p3451_p2, %p5368_p12 }
 0x252   : > { %p3457_p6 = por %p3456_p5, %p3455_p9 }
 0x253   : > { %p3453_p4 = pneg %p3452_p3 }
 0x255   : > { %p3458_p10 = pnand %p3457_p6, %p3453_p4 }
 0x257   : > { %3461 = shalt.err (!%p3458_p10)
}
 0x258   : > { %s3511_s5 = smov 128   ;;  %s3512_s30 = smov 8  }
 0x259   : > { %3265 = dma.vmem_to_hbm [thread:$0]  (%p5368_p12), %s5284_s6, 4096, %s5282_s10, %s5292_s16, %s3511_s5, %s3511_s5, %s3512_s30  }
 0x25a PF: > { %p3282_p0 = scmp.ge.s32.totalorder %s3504_s15, 2  ;;  %s2962_s27 = sand.u32 1, %s3492_s12  }
 0x25b   : > { %p5369_p7 = scmp.ne.s32.totalorder %s5340_s23, 0  ;;  %s2963_s29 = scalar_lea.sflag [#allocation3], %s2962_s27 }
 0x25d   : > { %p3275_p8 = pnand %p3282_p0, %p5369_p7 }
 0x25f   : > { %p3276_p11 = pneg %p3275_p8 }
 0x261   : > { %3487 = dma.done.wait (%p3276_p11), %s2963_s29, 4096  }
 0x262   : > { %3489 = vsyncadd (%p3276_p11), %s2963_s29, 4294963200  ;;  %p15_p13 = scmp.ge.s32.totalorder %s3558_s18, 4   ;;  %s5370_s12 = smov %s3496_s13 }
 0x263   : > { %s5371_s13 = smov %s3500_s14  ;;  %s5372_s14 = smov %s3569_s21 }
 0x264   : > { %s5373_s15 = smov %s3558_s18  ;;  %17 = sbr.rel (!%p15_p13) target bundleno = 5 (0x5), region = 98 }
 0x269   :  { %2968 = vsyncpa [#allocation3], 1 }
 0x26a   :  { %2970 = vsyncpa [#allocation3 + $0x1], 1 }
 0x26b   :  { %2971 = vsyncpa [#allocation4], 1 }
 0x26c   :  { %2973 = vsyncpa [#allocation4 + $0x1], 1 }
 0x26d   :  { %2974 = vsyncpa [#allocation6], 1 }

</bundles_post_ra>
